<compile_context>
chip_gen: v5e
topology: v5e:2x2
jax: 0.10.0
libtpu: 0.0.40
codegen_flags: <defaults>
</compile_context>

<pallas_src>
import jax
import jax.numpy as jnp
from jax import lax
from jax.experimental import pallas as pl
from jax.experimental.pallas import tpu as pltpu

KSIZE = 3  # 3x3 body convs, 'same' padding


def _rcab_kernel(x_ref, w1_ref, b1_ref, w2_ref, b2_ref,
                 wdu1_ref, bdu1_ref, wdu2_ref, bdu2_ref,
                 out_ref, pad_scr, col_scr):
    """One batch element per grid step.

    x_ref    : (1, H, W*C)   lane-dense input slab (also the residual source)
    w1/w2    : (9*C, C)      3x3 conv weights, HWIO flattened to (kh*kw*cin, cout)
    b1/b2    : (1, C)
    wdu1     : (C, Cr), bdu1 (1, Cr)   channel-attention squeeze
    wdu2     : (Cr, C), bdu2 (1, C)    channel-attention excite
    out_ref  : (1, H, W*C)
    pad_scr  : VMEM (H+2, W+2, C)      zero-halo padded activation
    col_scr  : VMEM (H, W, 9*C)        im2col buffer
    """
    Hp2, Wp2, C = pad_scr.shape
    H, W = Hp2 - 2, Wp2 - 2

    # Zero only the 1-pixel halo; the interior is always overwritten below.
    zero_row = jnp.zeros((1, W + 2, C), jnp.float32)
    zero_col = jnp.zeros((H + 2, 1, C), jnp.float32)
    pad_scr[0:1, :, :] = zero_row
    pad_scr[H + 1:H + 2, :, :] = zero_row
    pad_scr[:, 0:1, :] = zero_col
    pad_scr[:, W + 1:W + 2, :] = zero_col

    x3d = x_ref[0].reshape(H, W, C)          # un-flatten the lane-dense slab

    def conv3x3(w_ref):
        # im2col into VMEM, then a single (H*W, 9C) x (9C, C) contraction:
        # 9x better MXU K-fill and in-MXU accumulation instead of 9 separate
        # pushes + 8 VPU accumulate adds.
        for dh in range(KSIZE):
            for dw in range(KSIZE):
                k = dh * KSIZE + dw
                col_scr[:, :, k * C:(k + 1) * C] = pad_scr[dh:dh + H, dw:dw + W, :]
        return lax.dot_general(
            col_scr[...], w_ref[...],
            dimension_numbers=(((2,), (0,)), ((), ())),
            preferred_element_type=jnp.float32)            # (H, W, C)

    # ---- conv1 (3x3, same) + ReLU --------------------------------------------
    pad_scr[1:H + 1, 1:W + 1, :] = x3d
    h = conv3x3(w1_ref) + b1_ref[0, :][None, None, :]
    h = jnp.maximum(h, 0.0)

    # ---- conv2 (3x3, same) -----------------------------------------------------
    pad_scr[1:H + 1, 1:W + 1, :] = h
    h = conv3x3(w2_ref) + b2_ref[0, :][None, None, :]       # (H, W, C)

    # ---- channel attention (CALayer), kept in f32 ------------------------------
    avg = jnp.mean(h.reshape(H * W, C), axis=0, keepdims=True)        # (1, C)
    y = jnp.maximum(
        jnp.dot(avg, wdu1_ref[...], preferred_element_type=jnp.float32)
        + bdu1_ref[...], 0.0)                                         # (1, Cr)
    y = jax.nn.sigmoid(
        jnp.dot(y, wdu2_ref[...], preferred_element_type=jnp.float32)
        + bdu2_ref[...])                                              # (1, C)

    # ---- channel scale + residual add, lane-dense store ------------------------
    out = h * y[0, :][None, None, :] + x3d
    out_ref[0] = out.reshape(H, W * C).astype(out_ref.dtype)


@jax.jit
def rcab_forward(x_nchw, params):
    """RCAB forward. x_nchw: (N, C, H, W) float32 -> (N, C, H, W) float32."""
    x = jnp.transpose(x_nchw, (0, 2, 3, 1)).astype(jnp.float32)     # NHWC
    N, H, W, C = x.shape
    Cr = params["wdu1"].shape[1]

    x_slab = x.reshape(N, H, W * C)                      # lane-dense, row-major (free)
    w1_2d = params["w1"].reshape(KSIZE * KSIZE * C, C)   # im2col weight layout
    w2_2d = params["w2"].reshape(KSIZE * KSIZE * C, C)

    out_slab = pl.pallas_call(
        _rcab_kernel,
        out_shape=jax.ShapeDtypeStruct((N, H, W * C), jnp.float32),
        grid_spec=pltpu.PrefetchScalarGridSpec(
            num_scalar_prefetch=0,
            grid=(N,),
            in_specs=[
                pl.BlockSpec((1, H, W * C), lambda b: (b, 0, 0)),
                pl.BlockSpec((KSIZE * KSIZE * C, C), lambda b: (0, 0)),
                pl.BlockSpec((1, C), lambda b: (0, 0)),
                pl.BlockSpec((KSIZE * KSIZE * C, C), lambda b: (0, 0)),
                pl.BlockSpec((1, C), lambda b: (0, 0)),
                pl.BlockSpec((C, Cr), lambda b: (0, 0)),
                pl.BlockSpec((1, Cr), lambda b: (0, 0)),
                pl.BlockSpec((Cr, C), lambda b: (0, 0)),
                pl.BlockSpec((1, C), lambda b: (0, 0)),
            ],
            out_specs=pl.BlockSpec((1, H, W * C), lambda b: (b, 0, 0)),
            scratch_shapes=[
                pltpu.VMEM((H + 2, W + 2, C), jnp.float32),           # pad_scr
                pltpu.VMEM((H, W, KSIZE * KSIZE * C), jnp.float32),   # col_scr
            ],
        ),
        compiler_params=pltpu.CompilerParams(
            dimension_semantics=("parallel",)),
    )(x_slab, w1_2d, params["b1"], w2_2d, params["b2"],
      params["wdu1"], params["bdu1"], params["wdu2"], params["bdu2"])

    out = out_slab.reshape(N, H, W, C)
    return jnp.transpose(out, (0, 3, 1, 2))              # back to NCHW


def rcab_reference(x_nchw, params):
    """Pure-JAX reference matching PyTorch RCAB semantics."""
    x = jnp.transpose(x_nchw, (0, 2, 3, 1)).astype(jnp.float32)
    dn = ("NHWC", "HWIO", "NHWC")
    h = lax.conv_general_dilated(x, params["w1"], (1, 1), "SAME",
                                 dimension_numbers=dn) + params["b1"][0]
    h = jnp.maximum(h, 0.0)
    h = lax.conv_general_dilated(h, params["w2"], (1, 1), "SAME",
                                 dimension_numbers=dn) + params["b2"][0]
    avg = jnp.mean(h, axis=(1, 2))                                 # (N, C)
    y = jnp.maximum(avg @ params["wdu1"] + params["bdu1"][0], 0.0)
    y = jax.nn.sigmoid(y @ params["wdu2"] + params["bdu2"][0])
    out = h * y[:, None, None, :] + x
    return jnp.transpose(out, (0, 3, 1, 2))


def init_params(key, n_feat, reduction):
    c, cr = n_feat, n_feat // reduction
    ks = jax.random.split(key, 8)
    s = 0.05
    return {
        "w1": jax.random.normal(ks[0], (KSIZE, KSIZE, c, c), jnp.float32) * s,
        "b1": jax.random.normal(ks[1], (1, c), jnp.float32) * s,
        "w2": jax.random.normal(ks[2], (KSIZE, KSIZE, c, c), jnp.float32) * s,
        "b2": jax.random.normal(ks[3], (1, c), jnp.float32) * s,
        "wdu1": jax.random.normal(ks[4], (c, cr), jnp.float32) * s,
        "bdu1": jax.random.normal(ks[5], (1, cr), jnp.float32) * s,
        "wdu2": jax.random.normal(ks[6], (cr, c), jnp.float32) * s,
        "bdu2": jax.random.normal(ks[7], (1, c), jnp.float32) * s,
    }


if __name__ == "__main__":
    N, C, H, W = 2, 16, 16, 16
    reduction = 4

    key = jax.random.PRNGKey(0)
    k_param, k_x = jax.random.split(key)
    params = init_params(k_param, C, reduction)
    x = jax.random.normal(k_x, (N, C, H, W), jnp.float32)

    out = rcab_forward(x, params)
    out = jax.block_until_ready(out)

    ref = jax.block_until_ready(rcab_reference(x, params))
    assert out.shape == (N, C, H, W)
    assert jnp.allclose(out, ref, rtol=1e-4, atol=1e-4), (
        float(jnp.max(jnp.abs(out - ref))))

    print("KERNEL_OK")
</pallas_src>

<mosaic_0001>
module attributes {stable_mosaic.version = 11 : i64} {
  func.func @_rcab_kernel(%arg0: i32, %arg1: memref<1x16x256xf32, #tpu.memory_space<vmem>>, %arg2: memref<144x16xf32, #tpu.memory_space<vmem>>, %arg3: memref<1x16xf32, #tpu.memory_space<vmem>>, %arg4: memref<144x16xf32, #tpu.memory_space<vmem>>, %arg5: memref<1x16xf32, #tpu.memory_space<vmem>>, %arg6: memref<16x4xf32, #tpu.memory_space<vmem>>, %arg7: memref<1x4xf32, #tpu.memory_space<vmem>>, %arg8: memref<4x16xf32, #tpu.memory_space<vmem>>, %arg9: memref<1x16xf32, #tpu.memory_space<vmem>>, %arg10: memref<1x16x256xf32, #tpu.memory_space<vmem>>, %arg11: memref<18x18x16xf32, #tpu.memory_space<vmem>>, %arg12: memref<16x16x144xf32, #tpu.memory_space<vmem>>) attributes {dimension_semantics = [#tpu.dimension_semantics<parallel>], iteration_bounds = array<i64: 2>, scalar_prefetch = 0 : i64, scratch_operands = 2 : i64, tpu.core_type = #tpu.core_type<tc>, window_params = [{transform_indices = @transform_0, window_bounds = array<i64: 1, 16, 256>}, {pipeline_mode = #tpu.pipeline_mode<synchronous>, transform_indices = @transform_1, window_bounds = array<i64: 144, 16>}, {pipeline_mode = #tpu.pipeline_mode<synchronous>, transform_indices = @transform_2, window_bounds = array<i64: 1, 16>}, {pipeline_mode = #tpu.pipeline_mode<synchronous>, transform_indices = @transform_3, window_bounds = array<i64: 144, 16>}, {pipeline_mode = #tpu.pipeline_mode<synchronous>, transform_indices = @transform_4, window_bounds = array<i64: 1, 16>}, {pipeline_mode = #tpu.pipeline_mode<synchronous>, transform_indices = @transform_5, window_bounds = array<i64: 16, 4>}, {pipeline_mode = #tpu.pipeline_mode<synchronous>, transform_indices = @transform_6, window_bounds = array<i64: 1, 4>}, {pipeline_mode = #tpu.pipeline_mode<synchronous>, transform_indices = @transform_7, window_bounds = array<i64: 4, 16>}, {pipeline_mode = #tpu.pipeline_mode<synchronous>, transform_indices = @transform_8, window_bounds = array<i64: 1, 16>}, {transform_indices = @transform_9, window_bounds = array<i64: 1, 16, 256>}]} {
    %cst = arith.constant 0.000000e+00 : f32
    %0 = vector.broadcast %cst : f32 to vector<1x18x16xf32>
    %cst_0 = arith.constant 0.000000e+00 : f32
    %1 = vector.broadcast %cst_0 : f32 to vector<18x1x16xf32>
    %c0 = arith.constant 0 : index
    %c0_1 = arith.constant 0 : index
    %c0_2 = arith.constant 0 : index
    %2 = vector.load %arg11[%c0, %c0_1, %c0_2] : memref<18x18x16xf32, #tpu.memory_space<vmem>>, vector<1x18x16xf32>
    tpu.vector_store %arg11[%c0, %c0_1, %c0_2], %0 {strides = array<i32>} : memref<18x18x16xf32, #tpu.memory_space<vmem>>, vector<1x18x16xf32>,
    %c17 = arith.constant 17 : index
    %c0_3 = arith.constant 0 : index
    %c0_4 = arith.constant 0 : index
    %3 = vector.load %arg11[%c17, %c0_3, %c0_4] : memref<18x18x16xf32, #tpu.memory_space<vmem>>, vector<1x18x16xf32>
    tpu.vector_store %arg11[%c17, %c0_3, %c0_4], %0 {strides = array<i32>} : memref<18x18x16xf32, #tpu.memory_space<vmem>>, vector<1x18x16xf32>,
    %c0_5 = arith.constant 0 : index
    %c0_6 = arith.constant 0 : index
    %c0_7 = arith.constant 0 : index
    %4 = vector.load %arg11[%c0_5, %c0_6, %c0_7] : memref<18x18x16xf32, #tpu.memory_space<vmem>>, vector<18x1x16xf32>
    tpu.vector_store %arg11[%c0_5, %c0_6, %c0_7], %1 {strides = array<i32>} : memref<18x18x16xf32, #tpu.memory_space<vmem>>, vector<18x1x16xf32>,
    %c0_8 = arith.constant 0 : index
    %c17_9 = arith.constant 17 : index
    %c0_10 = arith.constant 0 : index
    %5 = vector.load %arg11[%c0_8, %c17_9, %c0_10] : memref<18x18x16xf32, #tpu.memory_space<vmem>>, vector<18x1x16xf32>
    tpu.vector_store %arg11[%c0_8, %c17_9, %c0_10], %1 {strides = array<i32>} : memref<18x18x16xf32, #tpu.memory_space<vmem>>, vector<18x1x16xf32>,
    %c0_11 = arith.constant 0 : index
    %c0_12 = arith.constant 0 : index
    %c0_13 = arith.constant 0 : index
    %6 = vector.load %arg1[%c0_11, %c0_12, %c0_13] : memref<1x16x256xf32, #tpu.memory_space<vmem>>, vector<1x16x256xf32>
    %7 = vector.shape_cast %6 : vector<1x16x256xf32> to vector<16x256xf32>
    %8 = vector.shape_cast %7 : vector<16x256xf32> to vector<16x16x16xf32>
    %c1 = arith.constant 1 : index
    %c1_14 = arith.constant 1 : index
    %c0_15 = arith.constant 0 : index
    %9 = vector.load %arg11[%c1, %c1_14, %c0_15] : memref<18x18x16xf32, #tpu.memory_space<vmem>>, vector<16x16x16xf32>
    tpu.vector_store %arg11[%c1, %c1_14, %c0_15], %8 {strides = array<i32>} : memref<18x18x16xf32, #tpu.memory_space<vmem>>, vector<16x16x16xf32>,
    %c0_16 = arith.constant 0 : index
    %c0_17 = arith.constant 0 : index
    %c0_18 = arith.constant 0 : index
    %10 = vector.load %arg11[%c0_16, %c0_17, %c0_18] : memref<18x18x16xf32, #tpu.memory_space<vmem>>, vector<16x16x16xf32>
    %c0_19 = arith.constant 0 : index
    %c0_20 = arith.constant 0 : index
    %c0_21 = arith.constant 0 : index
    %11 = vector.load %arg12[%c0_19, %c0_20, %c0_21] : memref<16x16x144xf32, #tpu.memory_space<vmem>>, vector<16x16x16xf32>
    tpu.vector_store %arg12[%c0_19, %c0_20, %c0_21], %10 {strides = array<i32>} : memref<16x16x144xf32, #tpu.memory_space<vmem>>, vector<16x16x16xf32>,
    %c0_22 = arith.constant 0 : index
    %c1_23 = arith.constant 1 : index
    %c0_24 = arith.constant 0 : index
    %12 = vector.load %arg11[%c0_22, %c1_23, %c0_24] : memref<18x18x16xf32, #tpu.memory_space<vmem>>, vector<16x16x16xf32>
    %c0_25 = arith.constant 0 : index
    %c0_26 = arith.constant 0 : index
    %c16 = arith.constant 16 : index
    %13 = vector.load %arg12[%c0_25, %c0_26, %c16] : memref<16x16x144xf32, #tpu.memory_space<vmem>>, vector<16x16x16xf32>
    tpu.vector_store %arg12[%c0_25, %c0_26, %c16], %12 {strides = array<i32>} : memref<16x16x144xf32, #tpu.memory_space<vmem>>, vector<16x16x16xf32>,
    %c0_27 = arith.constant 0 : index
    %c2 = arith.constant 2 : index
    %c0_28 = arith.constant 0 : index
    %14 = vector.load %arg11[%c0_27, %c2, %c0_28] : memref<18x18x16xf32, #tpu.memory_space<vmem>>, vector<16x16x16xf32>
    %c0_29 = arith.constant 0 : index
    %c0_30 = arith.constant 0 : index
    %c32 = arith.constant 32 : index
    %15 = vector.load %arg12[%c0_29, %c0_30, %c32] : memref<16x16x144xf32, #tpu.memory_space<vmem>>, vector<16x16x16xf32>
    tpu.vector_store %arg12[%c0_29, %c0_30, %c32], %14 {strides = array<i32>} : memref<16x16x144xf32, #tpu.memory_space<vmem>>, vector<16x16x16xf32>,
    %c1_31 = arith.constant 1 : index
    %c0_32 = arith.constant 0 : index
    %c0_33 = arith.constant 0 : index
    %16 = vector.load %arg11[%c1_31, %c0_32, %c0_33] : memref<18x18x16xf32, #tpu.memory_space<vmem>>, vector<16x16x16xf32>
    %c0_34 = arith.constant 0 : index
    %c0_35 = arith.constant 0 : index
    %c48 = arith.constant 48 : index
    %17 = vector.load %arg12[%c0_34, %c0_35, %c48] : memref<16x16x144xf32, #tpu.memory_space<vmem>>, vector<16x16x16xf32>
    tpu.vector_store %arg12[%c0_34, %c0_35, %c48], %16 {strides = array<i32>} : memref<16x16x144xf32, #tpu.memory_space<vmem>>, vector<16x16x16xf32>,
    %c1_36 = arith.constant 1 : index
    %c1_37 = arith.constant 1 : index
    %c0_38 = arith.constant 0 : index
    %18 = vector.load %arg11[%c1_36, %c1_37, %c0_38] : memref<18x18x16xf32, #tpu.memory_space<vmem>>, vector<16x16x16xf32>
    %c0_39 = arith.constant 0 : index
    %c0_40 = arith.constant 0 : index
    %c64 = arith.constant 64 : index
    %19 = vector.load %arg12[%c0_39, %c0_40, %c64] : memref<16x16x144xf32, #tpu.memory_space<vmem>>, vector<16x16x16xf32>
    tpu.vector_store %arg12[%c0_39, %c0_40, %c64], %18 {strides = array<i32>} : memref<16x16x144xf32, #tpu.memory_space<vmem>>, vector<16x16x16xf32>,
    %c1_41 = arith.constant 1 : index
    %c2_42 = arith.constant 2 : index
    %c0_43 = arith.constant 0 : index
    %20 = vector.load %arg11[%c1_41, %c2_42, %c0_43] : memref<18x18x16xf32, #tpu.memory_space<vmem>>, vector<16x16x16xf32>
    %c0_44 = arith.constant 0 : index
    %c0_45 = arith.constant 0 : index
    %c80 = arith.constant 80 : index
    %21 = vector.load %arg12[%c0_44, %c0_45, %c80] : memref<16x16x144xf32, #tpu.memory_space<vmem>>, vector<16x16x16xf32>
    tpu.vector_store %arg12[%c0_44, %c0_45, %c80], %20 {strides = array<i32>} : memref<16x16x144xf32, #tpu.memory_space<vmem>>, vector<16x16x16xf32>,
    %c2_46 = arith.constant 2 : index
    %c0_47 = arith.constant 0 : index
    %c0_48 = arith.constant 0 : index
    %22 = vector.load %arg11[%c2_46, %c0_47, %c0_48] : memref<18x18x16xf32, #tpu.memory_space<vmem>>, vector<16x16x16xf32>
    %c0_49 = arith.constant 0 : index
    %c0_50 = arith.constant 0 : index
    %c96 = arith.constant 96 : index
    %23 = vector.load %arg12[%c0_49, %c0_50, %c96] : memref<16x16x144xf32, #tpu.memory_space<vmem>>, vector<16x16x16xf32>
    tpu.vector_store %arg12[%c0_49, %c0_50, %c96], %22 {strides = array<i32>} : memref<16x16x144xf32, #tpu.memory_space<vmem>>, vector<16x16x16xf32>,
    %c2_51 = arith.constant 2 : index
    %c1_52 = arith.constant 1 : index
    %c0_53 = arith.constant 0 : index
    %24 = vector.load %arg11[%c2_51, %c1_52, %c0_53] : memref<18x18x16xf32, #tpu.memory_space<vmem>>, vector<16x16x16xf32>
    %c0_54 = arith.constant 0 : index
    %c0_55 = arith.constant 0 : index
    %c112 = arith.constant 112 : index
    %25 = vector.load %arg12[%c0_54, %c0_55, %c112] : memref<16x16x144xf32, #tpu.memory_space<vmem>>, vector<16x16x16xf32>
    tpu.vector_store %arg12[%c0_54, %c0_55, %c112], %24 {strides = array<i32>} : memref<16x16x144xf32, #tpu.memory_space<vmem>>, vector<16x16x16xf32>,
    %c2_56 = arith.constant 2 : index
    %c2_57 = arith.constant 2 : index
    %c0_58 = arith.constant 0 : index
    %26 = vector.load %arg11[%c2_56, %c2_57, %c0_58] : memref<18x18x16xf32, #tpu.memory_space<vmem>>, vector<16x16x16xf32>
    %c0_59 = arith.constant 0 : index
    %c0_60 = arith.constant 0 : index
    %c128 = arith.constant 128 : index
    %27 = vector.load %arg12[%c0_59, %c0_60, %c128] : memref<16x16x144xf32, #tpu.memory_space<vmem>>, vector<16x16x16xf32>
    tpu.vector_store %arg12[%c0_59, %c0_60, %c128], %26 {strides = array<i32>} : memref<16x16x144xf32, #tpu.memory_space<vmem>>, vector<16x16x16xf32>,
    %c0_61 = arith.constant 0 : index
    %c0_62 = arith.constant 0 : index
    %c0_63 = arith.constant 0 : index
    %28 = vector.load %arg12[%c0_61, %c0_62, %c0_63] : memref<16x16x144xf32, #tpu.memory_space<vmem>>, vector<16x16x144xf32>
    %c0_64 = arith.constant 0 : index
    %c0_65 = arith.constant 0 : index
    %29 = vector.load %arg2[%c0_64, %c0_65] : memref<144x16xf32, #tpu.memory_space<vmem>>, vector<144x16xf32>
    %cst_66 = arith.constant dense<0.000000e+00> : vector<16x16x16xf32>
    %30 = tpu.matmul %28, %29, %cst_66 {dimension_numbers = #tpu.dot_dimension_numbers<[2], [0], [0, 1], [1], [0, 0, 0, 1, 1, 1], [], []>} : vector<16x16x144xf32>, vector<144x16xf32>, vector<16x16x16xf32> -> vector<16x16x16xf32>
    %c0_67 = arith.constant 0 : index
    %c0_68 = arith.constant 0 : index
    %31 = vector.load %arg3[%c0_67, %c0_68] : memref<1x16xf32, #tpu.memory_space<vmem>>, vector<1x16xf32>
    %32 = vector.shape_cast %31 : vector<1x16xf32> to vector<16xf32>
    %33 = vector.shape_cast %32 : vector<16xf32> to vector<1x1x16xf32>
    %34 = vector.broadcast %33 : vector<1x1x16xf32> to vector<16x16x16xf32>
    %35 = arith.addf %30, %34 : vector<16x16x16xf32>
    %cst_69 = arith.constant 0.000000e+00 : f32
    %36 = vector.broadcast %cst_69 : f32 to vector<16x16x16xf32>
    %37 = arith.maximumf %35, %36 : vector<16x16x16xf32>
    %c1_70 = arith.constant 1 : index
    %c1_71 = arith.constant 1 : index
    %c0_72 = arith.constant 0 : index
    %38 = vector.load %arg11[%c1_70, %c1_71, %c0_72] : memref<18x18x16xf32, #tpu.memory_space<vmem>>, vector<16x16x16xf32>
    tpu.vector_store %arg11[%c1_70, %c1_71, %c0_72], %37 {strides = array<i32>} : memref<18x18x16xf32, #tpu.memory_space<vmem>>, vector<16x16x16xf32>,
    %c0_73 = arith.constant 0 : index
    %c0_74 = arith.constant 0 : index
    %c0_75 = arith.constant 0 : index
    %39 = vector.load %arg11[%c0_73, %c0_74, %c0_75] : memref<18x18x16xf32, #tpu.memory_space<vmem>>, vector<16x16x16xf32>
    %c0_76 = arith.constant 0 : index
    %c0_77 = arith.constant 0 : index
    %c0_78 = arith.constant 0 : index
    %40 = vector.load %arg12[%c0_76, %c0_77, %c0_78] : memref<16x16x144xf32, #tpu.memory_space<vmem>>, vector<16x16x16xf32>
    tpu.vector_store %arg12[%c0_76, %c0_77, %c0_78], %39 {strides = array<i32>} : memref<16x16x144xf32, #tpu.memory_space<vmem>>, vector<16x16x16xf32>,
    %c0_79 = arith.constant 0 : index
    %c1_80 = arith.constant 1 : index
    %c0_81 = arith.constant 0 : index
    %41 = vector.load %arg11[%c0_79, %c1_80, %c0_81] : memref<18x18x16xf32, #tpu.memory_space<vmem>>, vector<16x16x16xf32>
    %c0_82 = arith.constant 0 : index
    %c0_83 = arith.constant 0 : index
    %c16_84 = arith.constant 16 : index
    %42 = vector.load %arg12[%c0_82, %c0_83, %c16_84] : memref<16x16x144xf32, #tpu.memory_space<vmem>>, vector<16x16x16xf32>
    tpu.vector_store %arg12[%c0_82, %c0_83, %c16_84], %41 {strides = array<i32>} : memref<16x16x144xf32, #tpu.memory_space<vmem>>, vector<16x16x16xf32>,
    %c0_85 = arith.constant 0 : index
    %c2_86 = arith.constant 2 : index
    %c0_87 = arith.constant 0 : index
    %43 = vector.load %arg11[%c0_85, %c2_86, %c0_87] : memref<18x18x16xf32, #tpu.memory_space<vmem>>, vector<16x16x16xf32>
    %c0_88 = arith.constant 0 : index
    %c0_89 = arith.constant 0 : index
    %c32_90 = arith.constant 32 : index
    %44 = vector.load %arg12[%c0_88, %c0_89, %c32_90] : memref<16x16x144xf32, #tpu.memory_space<vmem>>, vector<16x16x16xf32>
    tpu.vector_store %arg12[%c0_88, %c0_89, %c32_90], %43 {strides = array<i32>} : memref<16x16x144xf32, #tpu.memory_space<vmem>>, vector<16x16x16xf32>,
    %c1_91 = arith.constant 1 : index
    %c0_92 = arith.constant 0 : index
    %c0_93 = arith.constant 0 : index
    %45 = vector.load %arg11[%c1_91, %c0_92, %c0_93] : memref<18x18x16xf32, #tpu.memory_space<vmem>>, vector<16x16x16xf32>
    %c0_94 = arith.constant 0 : index
    %c0_95 = arith.constant 0 : index
    %c48_96 = arith.constant 48 : index
    %46 = vector.load %arg12[%c0_94, %c0_95, %c48_96] : memref<16x16x144xf32, #tpu.memory_space<vmem>>, vector<16x16x16xf32>
    tpu.vector_store %arg12[%c0_94, %c0_95, %c48_96], %45 {strides = array<i32>} : memref<16x16x144xf32, #tpu.memory_space<vmem>>, vector<16x16x16xf32>,
    %c1_97 = arith.constant 1 : index
    %c1_98 = arith.constant 1 : index
    %c0_99 = arith.constant 0 : index
    %47 = vector.load %arg11[%c1_97, %c1_98, %c0_99] : memref<18x18x16xf32, #tpu.memory_space<vmem>>, vector<16x16x16xf32>
    %c0_100 = arith.constant 0 : index
    %c0_101 = arith.constant 0 : index
    %c64_102 = arith.constant 64 : index
    %48 = vector.load %arg12[%c0_100, %c0_101, %c64_102] : memref<16x16x144xf32, #tpu.memory_space<vmem>>, vector<16x16x16xf32>
    tpu.vector_store %arg12[%c0_100, %c0_101, %c64_102], %47 {strides = array<i32>} : memref<16x16x144xf32, #tpu.memory_space<vmem>>, vector<16x16x16xf32>,
    %c1_103 = arith.constant 1 : index
    %c2_104 = arith.constant 2 : index
    %c0_105 = arith.constant 0 : index
    %49 = vector.load %arg11[%c1_103, %c2_104, %c0_105] : memref<18x18x16xf32, #tpu.memory_space<vmem>>, vector<16x16x16xf32>
    %c0_106 = arith.constant 0 : index
    %c0_107 = arith.constant 0 : index
    %c80_108 = arith.constant 80 : index
    %50 = vector.load %arg12[%c0_106, %c0_107, %c80_108] : memref<16x16x144xf32, #tpu.memory_space<vmem>>, vector<16x16x16xf32>
    tpu.vector_store %arg12[%c0_106, %c0_107, %c80_108], %49 {strides = array<i32>} : memref<16x16x144xf32, #tpu.memory_space<vmem>>, vector<16x16x16xf32>,
    %c2_109 = arith.constant 2 : index
    %c0_110 = arith.constant 0 : index
    %c0_111 = arith.constant 0 : index
    %51 = vector.load %arg11[%c2_109, %c0_110, %c0_111] : memref<18x18x16xf32, #tpu.memory_space<vmem>>, vector<16x16x16xf32>
    %c0_112 = arith.constant 0 : index
    %c0_113 = arith.constant 0 : index
    %c96_114 = arith.constant 96 : index
    %52 = vector.load %arg12[%c0_112, %c0_113, %c96_114] : memref<16x16x144xf32, #tpu.memory_space<vmem>>, vector<16x16x16xf32>
    tpu.vector_store %arg12[%c0_112, %c0_113, %c96_114], %51 {strides = array<i32>} : memref<16x16x144xf32, #tpu.memory_space<vmem>>, vector<16x16x16xf32>,
    %c2_115 = arith.constant 2 : index
    %c1_116 = arith.constant 1 : index
    %c0_117 = arith.constant 0 : index
    %53 = vector.load %arg11[%c2_115, %c1_116, %c0_117] : memref<18x18x16xf32, #tpu.memory_space<vmem>>, vector<16x16x16xf32>
    %c0_118 = arith.constant 0 : index
    %c0_119 = arith.constant 0 : index
    %c112_120 = arith.constant 112 : index
    %54 = vector.load %arg12[%c0_118, %c0_119, %c112_120] : memref<16x16x144xf32, #tpu.memory_space<vmem>>, vector<16x16x16xf32>
    tpu.vector_store %arg12[%c0_118, %c0_119, %c112_120], %53 {strides = array<i32>} : memref<16x16x144xf32, #tpu.memory_space<vmem>>, vector<16x16x16xf32>,
    %c2_121 = arith.constant 2 : index
    %c2_122 = arith.constant 2 : index
    %c0_123 = arith.constant 0 : index
    %55 = vector.load %arg11[%c2_121, %c2_122, %c0_123] : memref<18x18x16xf32, #tpu.memory_space<vmem>>, vector<16x16x16xf32>
    %c0_124 = arith.constant 0 : index
    %c0_125 = arith.constant 0 : index
    %c128_126 = arith.constant 128 : index
    %56 = vector.load %arg12[%c0_124, %c0_125, %c128_126] : memref<16x16x144xf32, #tpu.memory_space<vmem>>, vector<16x16x16xf32>
    tpu.vector_store %arg12[%c0_124, %c0_125, %c128_126], %55 {strides = array<i32>} : memref<16x16x144xf32, #tpu.memory_space<vmem>>, vector<16x16x16xf32>,
    %c0_127 = arith.constant 0 : index
    %c0_128 = arith.constant 0 : index
    %c0_129 = arith.constant 0 : index
    %57 = vector.load %arg12[%c0_127, %c0_128, %c0_129] : memref<16x16x144xf32, #tpu.memory_space<vmem>>, vector<16x16x144xf32>
    %c0_130 = arith.constant 0 : index
    %c0_131 = arith.constant 0 : index
    %58 = vector.load %arg4[%c0_130, %c0_131] : memref<144x16xf32, #tpu.memory_space<vmem>>, vector<144x16xf32>
    %cst_132 = arith.constant dense<0.000000e+00> : vector<16x16x16xf32>
    %59 = tpu.matmul %57, %58, %cst_132 {dimension_numbers = #tpu.dot_dimension_numbers<[2], [0], [0, 1], [1], [0, 0, 0, 1, 1, 1], [], []>} : vector<16x16x144xf32>, vector<144x16xf32>, vector<16x16x16xf32> -> vector<16x16x16xf32>
    %c0_133 = arith.constant 0 : index
    %c0_134 = arith.constant 0 : index
    %60 = vector.load %arg5[%c0_133, %c0_134] : memref<1x16xf32, #tpu.memory_space<vmem>>, vector<1x16xf32>
    %61 = vector.shape_cast %60 : vector<1x16xf32> to vector<16xf32>
    %62 = vector.shape_cast %61 : vector<16xf32> to vector<1x1x16xf32>
    %63 = vector.broadcast %62 : vector<1x1x16xf32> to vector<16x16x16xf32>
    %64 = arith.addf %59, %63 : vector<16x16x16xf32>
    %65 = vector.shape_cast %64 : vector<16x16x16xf32> to vector<256x16xf32>
    %cst_135 = arith.constant dense<0.000000e+00> : vector<16xf32>
    %66 = vector.multi_reduction <add>, %65, %cst_135 [0] : vector<256x16xf32> to vector<16xf32>
    %67 = vector.shape_cast %66 : vector<16xf32> to vector<1x16xf32>
    %cst_136 = arith.constant 2.560000e+02 : f32
    %68 = vector.broadcast %cst_136 : f32 to vector<1x16xf32>
    %69 = arith.divf %67, %68 : vector<1x16xf32>
    %c0_137 = arith.constant 0 : index
    %c0_138 = arith.constant 0 : index
    %70 = vector.load %arg6[%c0_137, %c0_138] : memref<16x4xf32, #tpu.memory_space<vmem>>, vector<16x4xf32>
    %cst_139 = arith.constant dense<0.000000e+00> : vector<1x4xf32>
    %71 = tpu.matmul %69, %70, %cst_139 {dimension_numbers = #tpu.dot_dimension_numbers<[1], [0], [0], [1], [0, 0, 1, 1], [], []>} : vector<1x16xf32>, vector<16x4xf32>, vector<1x4xf32> -> vector<1x4xf32>
    %c0_140 = arith.constant 0 : index
    %c0_141 = arith.constant 0 : index
    %72 = vector.load %arg7[%c0_140, %c0_141] : memref<1x4xf32, #tpu.memory_space<vmem>>, vector<1x4xf32>
    %73 = arith.addf %71, %72 : vector<1x4xf32>
    %cst_142 = arith.constant 0.000000e+00 : f32
    %74 = vector.broadcast %cst_142 : f32 to vector<1x4xf32>
    %75 = arith.maximumf %73, %74 : vector<1x4xf32>
    %c0_143 = arith.constant 0 : index
    %c0_144 = arith.constant 0 : index
    %76 = vector.load %arg8[%c0_143, %c0_144] : memref<4x16xf32, #tpu.memory_space<vmem>>, vector<4x16xf32>
    %cst_145 = arith.constant dense<0.000000e+00> : vector<1x16xf32>
    %77 = tpu.matmul %75, %76, %cst_145 {dimension_numbers = #tpu.dot_dimension_numbers<[1], [0], [0], [1], [0, 0, 1, 1], [], []>} : vector<1x4xf32>, vector<4x16xf32>, vector<1x16xf32> -> vector<1x16xf32>
    %c0_146 = arith.constant 0 : index
    %c0_147 = arith.constant 0 : index
    %78 = vector.load %arg9[%c0_146, %c0_147] : memref<1x16xf32, #tpu.memory_space<vmem>>, vector<1x16xf32>
    %79 = arith.addf %77, %78 : vector<1x16xf32>
    %80 = arith.negf %79 : vector<1x16xf32>
    %81 = math.exp %80 : vector<1x16xf32>
    %cst_148 = arith.constant 1.000000e+00 : f32
    %82 = vector.broadcast %cst_148 : f32 to vector<1x16xf32>
    %83 = arith.addf %82, %81 : vector<1x16xf32>
    %84 = arith.divf %82, %83 : vector<1x16xf32>
    %85 = vector.shape_cast %84 : vector<1x16xf32> to vector<16xf32>
    %86 = vector.shape_cast %85 : vector<16xf32> to vector<1x1x16xf32>
    %87 = vector.broadcast %86 : vector<1x1x16xf32> to vector<16x16x16xf32>
    %88 = arith.mulf %64, %87 : vector<16x16x16xf32>
    %89 = arith.addf %88, %8 : vector<16x16x16xf32>
    %90 = vector.shape_cast %89 : vector<16x16x16xf32> to vector<16x256xf32>
    %c0_149 = arith.constant 0 : index
    %c0_150 = arith.constant 0 : index
    %c0_151 = arith.constant 0 : index
    %91 = vector.load %arg10[%c0_149, %c0_150, %c0_151] : memref<1x16x256xf32, #tpu.memory_space<vmem>>, vector<1x16x256xf32>
    %92 = vector.shape_cast %91 : vector<1x16x256xf32> to vector<16x256xf32>
    %93 = vector.shape_cast %90 : vector<16x256xf32> to vector<1x16x256xf32>
    tpu.vector_store %arg10[%c0_149, %c0_150, %c0_151], %93 {strides = array<i32>} : memref<1x16x256xf32, #tpu.memory_space<vmem>>, vector<1x16x256xf32>,
    return
  }
  func.func @transform_0(%arg0: i32) -> (i32, i32, i32) {
    %c0_i32 = arith.constant 0 : i32
    %c0_i32_0 = arith.constant 0 : i32
    %c0_i32_1 = arith.constant 0 : i32
    return %arg0, %c0_i32, %c0_i32_0 : i32, i32, i32
  }
  func.func @transform_1(%arg0: i32) -> (i32, i32) {
    %c0_i32 = arith.constant 0 : i32
    %c0_i32_0 = arith.constant 0 : i32
    %c0_i32_1 = arith.constant 0 : i32
    return %c0_i32, %c0_i32_0 : i32, i32
  }
  func.func @transform_2(%arg0: i32) -> (i32, i32) {
    %c0_i32 = arith.constant 0 : i32
    %c0_i32_0 = arith.constant 0 : i32
    %c0_i32_1 = arith.constant 0 : i32
    return %c0_i32, %c0_i32_0 : i32, i32
  }
  func.func @transform_3(%arg0: i32) -> (i32, i32) {
    %c0_i32 = arith.constant 0 : i32
    %c0_i32_0 = arith.constant 0 : i32
    %c0_i32_1 = arith.constant 0 : i32
    return %c0_i32, %c0_i32_0 : i32, i32
  }
  func.func @transform_4(%arg0: i32) -> (i32, i32) {
    %c0_i32 = arith.constant 0 : i32
    %c0_i32_0 = arith.constant 0 : i32
    %c0_i32_1 = arith.constant 0 : i32
    return %c0_i32, %c0_i32_0 : i32, i32
  }
  func.func @transform_5(%arg0: i32) -> (i32, i32) {
    %c0_i32 = arith.constant 0 : i32
    %c0_i32_0 = arith.constant 0 : i32
    %c0_i32_1 = arith.constant 0 : i32
    return %c0_i32, %c0_i32_0 : i32, i32
  }
  func.func @transform_6(%arg0: i32) -> (i32, i32) {
    %c0_i32 = arith.constant 0 : i32
    %c0_i32_0 = arith.constant 0 : i32
    %c0_i32_1 = arith.constant 0 : i32
    return %c0_i32, %c0_i32_0 : i32, i32
  }
  func.func @transform_7(%arg0: i32) -> (i32, i32) {
    %c0_i32 = arith.constant 0 : i32
    %c0_i32_0 = arith.constant 0 : i32
    %c0_i32_1 = arith.constant 0 : i32
    return %c0_i32, %c0_i32_0 : i32, i32
  }
  func.func @transform_8(%arg0: i32) -> (i32, i32) {
    %c0_i32 = arith.constant 0 : i32
    %c0_i32_0 = arith.constant 0 : i32
    %c0_i32_1 = arith.constant 0 : i32
    return %c0_i32, %c0_i32_0 : i32, i32
  }
  func.func @transform_9(%arg0: i32) -> (i32, i32, i32) {
    %c0_i32 = arith.constant 0 : i32
    %c0_i32_0 = arith.constant 0 : i32
    %c0_i32_1 = arith.constant 0 : i32
    return %arg0, %c0_i32, %c0_i32_0 : i32, i32, i32
  }
}

</mosaic_0001>

<bundles_post_ra>
// kernel: rcab_forward.1
= control target key start
LH: loop header
LB: loop body
LE: loop exit
PB: predicated region body
PF: predicated region fallthrough
CT: control target
= control target key end

     0   :  { %s5834_s30 = smov 0   ;;  %s9348_s0 = inlined_call_operand.vmem [shape: f32[2,16,256], index: 0, kind: input, shape index: {}]   ;;  %s9349_s1 = inlined_call_operand.vmem [shape: f32[144,16], index: 1, kind: input, shape index: {}]   ;;  %s9350_s2 = inlined_call_operand.vmem [shape: f32[1,16], index: 2, kind: input, shape index: {}]   ;;  %s9351_s3 = inlined_call_operand.vmem [shape: f32[144,16], index: 3, kind: input, shape index: {}]   ;;  %s9352_s4 = inlined_call_operand.vmem [shape: f32[1,16], index: 4, kind: input, shape index: {}]   ;;  %s9353_s5 = inlined_call_operand.vmem [shape: f32[16,4], index: 5, kind: input, shape index: {}]   ;;  %s9354_s6 = inlined_call_operand.vmem [shape: f32[1,4], index: 6, kind: input, shape index: {}]   ;;  %s9355_s7 = inlined_call_operand.vmem [shape: f32[4,16], index: 7, kind: input, shape index: {}]   ;;  %s9356_s8 = inlined_call_operand.vmem [shape: f32[1,16], index: 8, kind: input, shape index: {}]   ;;  %s9357_s9 = inlined_call_operand.vmem [shape: f32[2,16,256], index: 9, kind: output, shape index: {}]  }
   0x1 LB: > { %s5656_s10 = sadd.s32 4294967295, %s5771_s30   ;;  %p5660_p0 = scmp.ge.s32.totalorder %s5771_s30, 1  ;;  %s5771_s30 = sphi %s5834_s30, %s19_s30  }
   0x2   : > { %p287_p1 = scmp.lt.s32.totalorder %s5771_s30, 3 }
   0x4   : > { %p288_p2 = pnand %p5660_p0, %p287_p1 }
   0x6   : > { %291 = sbr.rel (%p288_p2) target bundleno = 2296 (0x8f8), region = 56 }
   0xb   : > { %p323_p3 = scmp.lt.s32.totalorder %s5656_s10, 1  ;;  %s5773_s15 = smov 96   ;;  %v5780_v12 = vmov 1983009808   ;;  %vm472_vm0 = vcmask 1047556   ;;  %vm333_vm1 = vcmask 130048  }
   0xc   : > { %s5774_s16 = smov 112   ;;  %s5775_s17 = smov 80   ;;  %v477_v13 = vunpack.c.l.s4 %v5780_v12  ;;  %vm336_vm2 = vcmask 123904   ;;  %v5781_v34 = vmov 0.0   ;;  %v5782_v39 = vmov 1934713408  }
   0xd   : > { %s9502_s10 = smov (!%p323_p3, %s5656_s10), 1  ;;  %s5776_s18 = smov 64   ;;  %335 = vst.msk [vmem:[#allocation2 + $0x8] sm:$0xff] %vm333_vm1, %v5781_v34  ;;  %v525_v40 = vunpack.c.l.s4 %v5782_v39  ;;  %vm342_vm3 = vcmask 122880   ;;  %vm1177_vm4 = vcmask 261248   ;;  %vm1370_vm5 = vcmask 392448  }
   0xe   : > { %s5735_s11 = sshll.u32 %s9502_s10, 5  ;;  %s5777_s19 = smov 48   ;;  %v5909_v19 = vunpack.c.0.s8 %v477_v13  ;;  %337 = vst.msk [vmem:[#allocation2 + $0x10] sm:$0x3] %vm336_vm2, %v5781_v34  ;;  %vm1563_vm6 = vcmask 523648   ;;  %vm1756_vm7 = vcmask 654848  }
   0xf   : > { %s327_s14 = scalar_lea.vmem %s9348_s0, %s5735_s11  ;;  %s5778_s20 = smov 32   ;;  %334 = vst.msk [vmem:[#allocation2] sm:$0xff] %vm333_vm1, %v5781_v34  ;;  %v5945_v52 = vunpack.c.0.s8 %v525_v40  ;;  %vm1949_vm8 = vcmask 786048   ;;  %vm2143_vm9 = vcmask 917248   ;;  %vm2336_vm10 = vcmask 1048448  }
  0x10   : > { %v5850_v0 = vld [vmem:[%s327_s14] sm:$0xff]  ;;  %v381_v1 = vld [vmem:[%s327_s14 + $0x10] sm:$0xff]  ;;  %s5779_s21 = smov 16   ;;  %v5873_v2 = vld [vmem:[%s327_s14 + $0x8] sm:$0xff]  ;;  %9407 = vst [vmem:[#allocation4_spill] sm:$0xff] %v5909_v19  ;;  %vm4895_vm11 = vcmask 1043456  }
  0x11   : > { %391 = vrot.lane.b32.xlu1 %v5850_v0, %s5773_s15  ;;  %385 = vrot.lane.b32.xlu0 %v5850_v0, %s5774_s16  ;;  %v5877_v3 = vld [vmem:[%s327_s14 + $0x18] sm:$0xff]  ;;  %v698_v15 = vrot.slane %v381_v1, 4  ;;  %v474_v22 = vrot.slane %v5850_v0, 4  ;;  %339 = vst.msk [vmem:[#allocation2 + $0x198] sm:$0xff] %vm333_vm1, %v5781_v34  ;;  %vm4891_vm13 = vcmask 31744  }
  0x12   : > { %397 = vrot.lane.b32.xlu2 %v5850_v0, %s5775_s17  ;;  %340 = vst.msk [vmem:[#allocation2 + $0x1a0] sm:$0xff] %vm333_vm1, %v5781_v34 }
  0x13   : > { %341 = vst.msk [vmem:[#allocation2 + $0x1a8] sm:$0x3] %vm336_vm2, %v5781_v34 }
  0x14   : > { %9408 = vst [vmem:[#allocation5_spill] sm:$0xff] %v5945_v52 }
  0x15   : > { %363 = vst.msk [vmem:[#allocation2 + $0x41] sm:$0x1] %vm342_vm3, %v5781_v34  ;;  %v1018_v61 = vld [vmem:[#allocation2 + $0x9] sm:$0xff] }
  0x16   : > { %343 = vst.msk [vmem:[#allocation2] sm:$0x1] %vm342_vm3, %v5781_v34 }
  0x17   : > { %344 = vst.msk [vmem:[#allocation2 + $0x18] sm:$0x1] %vm342_vm3, %v5781_v34 }
  0x18   : > { %345 = vst.msk [vmem:[#allocation2 + $0x30] sm:$0x1] %vm342_vm3, %v5781_v34 }
  0x19   : > { %393 = vrot.lane.b32.xlu1 %v381_v1, %s5773_s15  ;;  %387 = vrot.lane.b32.xlu0 %v381_v1, %s5774_s16  ;;  %346 = vst.msk [vmem:[#allocation2 + $0x48] sm:$0x1] %vm342_vm3, %v5781_v34 }
  0x1a   : > { %399 = vrot.lane.b32.xlu2 %v381_v1, %s5775_s17  ;;  %347 = vst.msk [vmem:[#allocation2 + $0x60] sm:$0x1] %vm342_vm3, %v5781_v34 }
  0x1b   : > { %348 = vst.msk [vmem:[#allocation2 + $0x78] sm:$0x1] %vm342_vm3, %v5781_v34 }
  0x1c   : > { %349 = vst.msk [vmem:[#allocation2 + $0x90] sm:$0x1] %vm342_vm3, %v5781_v34 }
  0x1d   : > { %350 = vst.msk [vmem:[#allocation2 + $0xa8] sm:$0x1] %vm342_vm3, %v5781_v34 }
  0x1e   : > { %351 = vst.msk [vmem:[#allocation2 + $0xc0] sm:$0x1] %vm342_vm3, %v5781_v34 }
  0x1f   : > { %352 = vst.msk [vmem:[#allocation2 + $0xd8] sm:$0x1] %vm342_vm3, %v5781_v34 }
  0x20   : > { %353 = vst.msk [vmem:[#allocation2 + $0xf0] sm:$0x1] %vm342_vm3, %v5781_v34 }
  0x21   : > { %405 = vrot.lane.b32.xlu1 %v381_v1, %s5776_s18  ;;  %403 = vrot.lane.b32.xlu0 %v5850_v0, %s5776_s18  ;;  %354 = vst.msk [vmem:[#allocation2 + $0x108] sm:$0x1] %vm342_vm3, %v5781_v34 }
  0x22   : > { %409 = vrot.lane.b32.xlu2 %v5850_v0, %s5777_s19  ;;  %355 = vst.msk [vmem:[#allocation2 + $0x120] sm:$0x1] %vm342_vm3, %v5781_v34 }
  0x23   : > { %356 = vst.msk [vmem:[#allocation2 + $0x138] sm:$0x1] %vm342_vm3, %v5781_v34 }
  0x24   : > { %357 = vst.msk [vmem:[#allocation2 + $0x150] sm:$0x1] %vm342_vm3, %v5781_v34 }
  0x25   : > { %358 = vst.msk [vmem:[#allocation2 + $0x168] sm:$0x1] %vm342_vm3, %v5781_v34 }
  0x26   : > { %359 = vst.msk [vmem:[#allocation2 + $0x180] sm:$0x1] %vm342_vm3, %v5781_v34 }
  0x27   : > { %360 = vst.msk [vmem:[#allocation2 + $0x198] sm:$0x1] %vm342_vm3, %v5781_v34 }
  0x28   : > { %361 = vst.msk [vmem:[#allocation2 + $0x11] sm:$0x1] %vm342_vm3, %v5781_v34 }
  0x29   : > { %415 = vrot.lane.b32.xlu1 %v5850_v0, %s5778_s20  ;;  %411 = vrot.lane.b32.xlu0 %v381_v1, %s5777_s19  ;;  %362 = vst.msk [vmem:[#allocation2 + $0x29] sm:$0x1] %vm342_vm3, %v5781_v34 }
  0x2a   : > { %417 = vrot.lane.b32.xlu2 %v381_v1, %s5778_s20  ;;  %364 = vst.msk [vmem:[#allocation2 + $0x59] sm:$0x1] %vm342_vm3, %v5781_v34 }
  0x2b   : > { %365 = vst.msk [vmem:[#allocation2 + $0x71] sm:$0x1] %vm342_vm3, %v5781_v34 }
  0x2c   : > { %366 = vst.msk [vmem:[#allocation2 + $0x89] sm:$0x1] %vm342_vm3, %v5781_v34 }
  0x2d   : > { %367 = vst.msk [vmem:[#allocation2 + $0xa1] sm:$0x1] %vm342_vm3, %v5781_v34 }
  0x2e   : > { %368 = vst.msk [vmem:[#allocation2 + $0xb9] sm:$0x1] %vm342_vm3, %v5781_v34 }
  0x2f   : > { %369 = vst.msk [vmem:[#allocation2 + $0xd1] sm:$0x1] %vm342_vm3, %v5781_v34 }
  0x30   : > { %370 = vst.msk [vmem:[#allocation2 + $0xe9] sm:$0x1] %vm342_vm3, %v5781_v34 }
  0x31   : > { %423 = vrot.lane.b32.xlu1 %v381_v1, %s5779_s21  ;;  %421 = vrot.lane.b32.xlu0 %v5850_v0, %s5779_s21  ;;  %371 = vst.msk [vmem:[#allocation2 + $0x101] sm:$0x1] %vm342_vm3, %v5781_v34 }
  0x32   : > { %429 = vrot.lane.b32.xlu2 %v5873_v2, %s5774_s16  ;;  %372 = vst.msk [vmem:[#allocation2 + $0x119] sm:$0x1] %vm342_vm3, %v5781_v34 }
  0x33   : > { %373 = vst.msk [vmem:[#allocation2 + $0x131] sm:$0x1] %vm342_vm3, %v5781_v34 }
  0x34   : > { %374 = vst.msk [vmem:[#allocation2 + $0x149] sm:$0x1] %vm342_vm3, %v5781_v34 }
  0x35   : > { %375 = vst.msk [vmem:[#allocation2 + $0x161] sm:$0x1] %vm342_vm3, %v5781_v34 }
  0x36   : > { %376 = vst.msk [vmem:[#allocation2 + $0x179] sm:$0x1] %vm342_vm3, %v5781_v34 }
  0x37   : > { %377 = vst.msk [vmem:[#allocation2 + $0x191] sm:$0x1] %vm342_vm3, %v5781_v34 }
  0x38   : > { %378 = vst.msk [vmem:[#allocation2 + $0x1a9] sm:$0x1] %vm342_vm3, %v5781_v34 }
  0x39   : > { %435 = vrot.lane.b32.xlu1 %v5873_v2, %s5773_s15  ;;  %431 = vrot.lane.b32.xlu0 %v5877_v3, %s5774_s16 }
  0x3a   : > { %437 = vrot.lane.b32.xlu2 %v5877_v3, %s5773_s15 }
  0x41   : > { %443 = vrot.lane.b32.xlu1 %v5877_v3, %s5775_s17  ;;  %441 = vrot.lane.b32.xlu0 %v5873_v2, %s5775_s17 }
  0x42   : > { %447 = vrot.lane.b32.xlu2 %v5873_v2, %s5776_s18 }
  0x49   : > { %453 = vrot.lane.b32.xlu1 %v5873_v2, %s5777_s19  ;;  %449 = vrot.lane.b32.xlu0 %v5877_v3, %s5776_s18 }
  0x4a   : > { %455 = vrot.lane.b32.xlu2 %v5877_v3, %s5777_s19 }
  0x51   : > { %461 = vrot.lane.b32.xlu1 %v5877_v3, %s5778_s20  ;;  %459 = vrot.lane.b32.xlu0 %v5873_v2, %s5778_s20 }
  0x52   : > { %465 = vrot.lane.b32.xlu2 %v5873_v2, %s5779_s21 }
  0x59   : > { %467 = vrot.lane.b32.xlu0 %v5877_v3, %s5779_s21 }
  0x5a   : > { %1083 = vrot.lane.b32.xlu2 %v1018_v61, %s5779_s21 }
  0x6c   : > { %v398_v4 = vpop.permute.xlu2 %397 }
  0x6d   : > { %v484_v17 = vrot.slane %v398_v4, 4 }
  0x74   : > { %v400_v5 = vpop.permute.xlu2 %399 }
  0x75   : > { %v708_v14 = vrot.slane %v400_v5, 4 }
  0x7c   : > { %v5905_v6 = vpop.permute.xlu2 %409 }
  0x83   : > { %v392_v7 = vpop.permute.xlu1 %391  ;;  %v386_v8 = vpop.permute.xlu0 %385 }
  0x84   : > { %v5907_v9 = vpop.permute.xlu2 %417  ;;  %v471_v25 = vrot.slane %v392_v7, 4  ;;  %v485_v26 = vsel %vm472_vm0, %v484_v17, %v386_v8  ;;  %v486_v27 = vrot.slane %v386_v8, 4  ;;  %v475_v35 = vsel %vm472_vm0, %v392_v7, %v474_v22 }
  0x85   : > { %v491_v36 = vperm.slane %v485_v26, %v5909_v19  ;;  %v483_v43 = vperm.slane %v475_v35, %v5909_v19  ;;  %v720_v54 = vrot.slane %v5907_v9, 4 }
  0x86   : > { %v473_v37 = vsel %vm472_vm0, %v471_v25, %v5850_v0  ;;  %v487_v41 = vsel %vm472_vm0, %v398_v4, %v486_v27 }
  0x87   : > { %v479_v46 = vperm.slane %v473_v37, %v5909_v19  ;;  %v520_v47 = vrot.slane %v491_v36, 4  ;;  %v495_v48 = vperm.slane %v487_v41, %v5909_v19  ;;  %v534_v57 = vrot.slane %v483_v43, 4 }
  0x89   : > { %v522_v62 = vrot.slane %v479_v46, 4  ;;  %v521_v63 = vsel %vm472_vm0, %v520_v47, %v479_v46  ;;  %v5978_v13 = vsel %vm472_vm0, %v495_v48, %v534_v57 }
  0x8b   : > { %v394_v10 = vpop.permute.xlu1 %393  ;;  %v388_v11 = vpop.permute.xlu0 %387 }
  0x8c   : > { %v696_v16 = vrot.slane %v394_v10, 4  ;;  %v710_v18 = vrot.slane %v388_v11, 4  ;;  %v709_v20 = vsel %vm472_vm0, %v708_v14, %v388_v11  ;;  %v5912_v21 = vpop.permute.xlu2 %429  ;;  %v699_v24 = vsel %vm472_vm0, %v394_v10, %v698_v15 }
  0x8d   : > { %v715_v29 = vperm.slane %v709_v20, %v5909_v19  ;;  %v707_v33 = vperm.slane %v699_v24, %v5909_v19  ;;  %v5985_v15 = vsel %vm472_vm0, %v491_v36, %v522_v62 }
  0x8e   : > { %v697_v23 = vsel %vm472_vm0, %v696_v16, %v381_v1  ;;  %v711_v28 = vsel %vm472_vm0, %v400_v5, %v710_v18  ;;  %v532_v1 = vrot.slane %v495_v48, 4  ;;  %v5988_v16 = vperm.slane %v521_v63, %v5945_v52 }
  0x8f   : > { %v703_v32 = vperm.slane %v697_v23, %v5909_v19  ;;  %v719_v38 = vperm.slane %v711_v28, %v5909_v19  ;;  %v744_v42 = vrot.slane %v715_v29, 4  ;;  %v758_v45 = vrot.slane %v707_v33, 4 }
  0x90   : > { %v5997_v20 = vsel %vm472_vm0, %v532_v1, %v483_v43 }
  0x91   : > { %v746_v44 = vrot.slane %v703_v32, 4  ;;  %v756_v49 = vrot.slane %v719_v38, 4  ;;  %v745_v53 = vsel %vm472_vm0, %v744_v42, %v703_v32  ;;  %v759_v59 = vsel %vm472_vm0, %v719_v38, %v758_v45 }
  0x92   : > { %v5960_v4 = vperm.slane %v745_v53, %v5945_v52  ;;  %v5971_v10 = vperm.slane %v759_v59, %v5945_v52 }
  0x93   : > { %v406_v30 = vpop.permute.xlu1 %405  ;;  %v404_v31 = vpop.permute.xlu0 %403  ;;  %v747_v58 = vsel %vm472_vm0, %v715_v29, %v746_v44  ;;  %v757_v5 = vsel %vm472_vm0, %v756_v49, %v707_v33 }
  0x94   : > { %v722_v50 = vrot.slane %v406_v30, 4  ;;  %v5943_v51 = vpop.permute.xlu2 %437  ;;  %v498_v0 = vrot.slane %v404_v31, 4  ;;  %v5968_v8 = vperm.slane %v747_v58, %v5945_v52  ;;  %v721_v11 = vsel %vm472_vm0, %v720_v54, %v406_v30 }
  0x95   : > { %v5991_v17 = vperm.slane %v757_v5, %v5945_v52  ;;  %v727_v22 = vperm.slane %v721_v11, %v5909_v19  ;;  %v794_v25 = vrot.slane %v5960_v4, 4  ;;  %v806_v27 = vrot.slane %v5971_v10, 4 }
  0x96   : > { %v723_v7 = vsel %vm472_vm0, %v5907_v9, %v722_v50  ;;  %v510_v9 = vrot.slane %v5905_v6, 4  ;;  %v798_v26 = vrot.slane %v5968_v8, 4 }
  0x97   : > { %v731_v18 = vperm.slane %v723_v7, %v5909_v19  ;;  %v802_v37 = vrot.slane %v5991_v17, 4  ;;  %v770_v41 = vrot.slane %v727_v22, 4 }
  0x99   : > { %v782_v38 = vrot.slane %v731_v18, 4 }
  0x9b   : > { %v416_v55 = vpop.permute.xlu1 %415  ;;  %v412_v56 = vpop.permute.xlu0 %411 }
  0x9c   : > { %v496_v60 = vrot.slane %v416_v55, 4  ;;  %v499_v12 = vsel %vm472_vm0, %v416_v55, %v498_v0  ;;  %v734_v24 = vrot.slane %v412_v56, 4  ;;  %v6011_v36 = vpop.permute.xlu2 %447 }
  0x9d   : > { %v507_v23 = vperm.slane %v499_v12, %v5909_v19 }
  0x9e   : > { %v497_v14 = vsel %vm472_vm0, %v496_v60, %v404_v31 }
  0x9f   : > { %v503_v28 = vperm.slane %v497_v14, %v5909_v19  ;;  %v558_v42 = vrot.slane %v507_v23, 4 }
  0xa1   : > { %v546_v49 = vrot.slane %v503_v28, 4 }
  0xa3   : > { %v424_v29 = vpop.permute.xlu1 %423  ;;  %v422_v30 = vpop.permute.xlu0 %421 }
  0xa4   : > { %v732_v31 = vrot.slane %v424_v29, 4  ;;  %v735_v32 = vsel %vm472_vm0, %v424_v29, %v734_v24  ;;  %v508_v33 = vrot.slane %v422_v30, 4  ;;  %v511_v35 = vsel %vm472_vm0, %v422_v30, %v510_v9  ;;  %v6081_v29 = vpop.permute.xlu2 %455 }
  0xa5   : > { %v743_v39 = vperm.slane %v735_v32, %v5909_v19  ;;  %v519_v40 = vperm.slane %v511_v35, %v5909_v19  ;;  %v543_v35 = vperm.slane %v5978_v13, %v5945_v52  ;;  %v586_v13 = vrot.slane %v5873_v2, 4 }
  0xa6   : > { %v733_v43 = vsel %vm472_vm0, %v732_v31, %v412_v56  ;;  %v509_v44 = vsel %vm472_vm0, %v508_v33, %v5905_v6 }
  0xa7   : > { %v739_v45 = vperm.slane %v733_v43, %v5909_v19  ;;  %v780_v46 = vrot.slane %v743_v39, 4  ;;  %v783_v47 = vsel %vm472_vm0, %v743_v39, %v782_v38  ;;  %v515_v48 = vperm.slane %v509_v44, %v5909_v19 }
  0xa8   : > { %v791_v50 = vperm.slane %v783_v47, %v5945_v52  ;;  %v556_v53 = vrot.slane %v519_v40, 4  ;;  %v559_v54 = vsel %vm472_vm0, %v519_v40, %v558_v42  ;;  %v808_v40 = vrot.slane %v5943_v51, 4 }
  0xa9   : > { %v768_v6 = vrot.slane %v739_v45, 4  ;;  %v771_v55 = vsel %vm472_vm0, %v739_v45, %v770_v41  ;;  %v781_v56 = vsel %vm472_vm0, %v780_v46, %v731_v18  ;;  %v544_v57 = vrot.slane %v515_v48, 4 }
  0xaa   : > { %v779_v58 = vperm.slane %v771_v55, %v5945_v52  ;;  %v787_v59 = vperm.slane %v781_v56, %v5945_v52  ;;  %v804_v60 = vrot.slane %v791_v50, 4  ;;  %v6041_v61 = vsel %vm472_vm0, %v791_v50, %v806_v27 }
  0xab   : > { %9409 = vst [vmem:[#allocation6_spill] sm:$0xff] %v6041_v61  ;;  %v769_v62 = vsel %vm472_vm0, %v768_v6, %v727_v22  ;;  %v545_v63 = vsel %vm472_vm0, %v544_v57, %v503_v28  ;;  %v547_v0 = vsel %vm472_vm0, %v515_v48, %v546_v49  ;;  %v557_v1 = vsel %vm472_vm0, %v556_v53, %v507_v23  ;;  %v436_v5 = vpop.permute.xlu1 %435  ;;  %v6051_v7 = vpop.permute.xlu0 %431 }
  0xac   : > { %951 = vst.msk [vmem:[#allocation2 + $0x181] sm:$0xff] %vm333_vm1, %v6041_v61  ;;  %v775_v11 = vperm.slane %v769_v62, %v5945_v52  ;;  %v796_v12 = vrot.slane %v779_v58, 4  ;;  %v6055_v9 = vsel %vm472_vm0, %v779_v58, %v798_v26  ;;  %v800_v14 = vrot.slane %v787_v59, 4 }
  0xad   : > { %9410 = vst [vmem:[#allocation7_spill] sm:$0xff] %v6055_v9  ;;  %v531_v18 = vperm.slane %v5985_v15, %v5945_v52  ;;  %v6062_v22 = vsel %vm472_vm0, %v787_v59, %v802_v37  ;;  %v551_v23 = vperm.slane %v545_v63, %v5945_v52  ;;  %v555_v24 = vperm.slane %v547_v0, %v5945_v52 }
  0xae   : > { %9411 = vst [vmem:[#allocation8_spill] sm:$0xff] %v6062_v22  ;;  %v539_v26 = vperm.slane %v5997_v20, %v5945_v52  ;;  %v792_v27 = vrot.slane %v775_v11, 4  ;;  %v6073_v28 = vsel %vm472_vm0, %v775_v11, %v794_v25  ;;  %v6077_v15 = vsel %vm472_vm0, %v796_v12, %v5968_v8 }
  0xaf   : > { %943 = vst.msk [vmem:[#allocation2 + $0x121] sm:$0xff] %vm333_vm1, %v6055_v9  ;;  %v6085_v30 = vsel %vm472_vm0, %v800_v14, %v5991_v17  ;;  %v563_v20 = vperm.slane %v557_v1, %v5945_v52  ;;  %v567_v25 = vperm.slane %v559_v54, %v5945_v52  ;;  %v568_v31 = vrot.slane %v551_v23, 4 }
  0xb0   : > { %9412 = vst [vmem:[#allocation9_spill] sm:$0xff] %v6073_v28  ;;  %v570_v8 = vrot.slane %v5988_v16, 4  ;;  %v6094_v32 = vsel %vm472_vm0, %v792_v27, %v5960_v4  ;;  %v6098_v33 = vsel %vm472_vm0, %v804_v60, %v5971_v10  ;;  %v572_v17 = vrot.slane %v555_v24, 4 }
  0xb1   : > { %9413 = vst [vmem:[#allocation10_spill] sm:$0xff] %v6077_v15  ;;  %v6108_v37 = vsel %vm472_vm0, %v568_v31, %v5988_v16  ;;  %v576_v4 = vrot.slane %v563_v20, 4  ;;  %v584_v38 = vrot.slane %v436_v5, 4  ;;  %v574_v39 = vrot.slane %v531_v18, 4 }
  0xb2   : > { %947 = vst.msk [vmem:[#allocation2 + $0x151] sm:$0xff] %vm333_vm1, %v6062_v22  ;;  %v6113_v10 = vsel %vm472_vm0, %v551_v23, %v570_v8  ;;  %v598_v41 = vrot.slane %v5912_v21, 4  ;;  %v6121_v16 = vsel %vm472_vm0, %v572_v17, %v531_v18  ;;  %v580_v42 = vrot.slane %v567_v25, 4  ;;  %v2513_v17 = vld [vmem:[%s9349_s1 + $0x80] sm:$0xff] }
  0xb3   : > { %9414 = vst [vmem:[#allocation11_spill] sm:$0xff] %v6085_v30  ;;  %v810_v43 = vrot.slane %v5877_v3, 4  ;;  %v444_v44 = vpop.permute.xlu1 %443  ;;  %v442_v45 = vpop.permute.xlu0 %441  ;;  %v578_v46 = vrot.slane %v539_v26, 4  ;;  %v6125_v47 = vsel %vm472_vm0, %v555_v24, %v574_v39  ;;  %v582_v50 = vrot.slane %v543_v35, 4 }
  0xb4   : > { %939 = vst.msk [vmem:[#allocation2 + $0xf1] sm:$0xff] %vm333_vm1, %v6073_v28  ;;  %v820_v48 = vrot.slane %v444_v44, 4  ;;  %v596_v49 = vrot.slane %v442_v45, 4  ;;  %v6130_v53 = vsel %vm472_vm0, %v576_v4, %v539_v26  ;;  %v585_v54 = vsel %vm472_vm0, %v584_v38, %v5873_v2 }
  0xb5   : > { %9415 = vst [vmem:[#allocation12_spill] sm:$0xff] %v6094_v32  ;;  %v599_v6 = vsel %vm472_vm0, %v442_v45, %v598_v41  ;;  %v6138_v55 = vsel %vm472_vm0, %v563_v20, %v578_v46  ;;  %v809_v56 = vsel %vm472_vm0, %v808_v40, %v5877_v3  ;;  %v587_v57 = vsel %vm472_vm0, %v436_v5, %v586_v13  ;;  %v466_v5 = vpop.permute.xlu2 %465  ;;  %v1017_v20 = vld [vmem:[#allocation2 + $0x1] sm:$0xff] }
  0xb6   : > { %9416 = vst [vmem:[#allocation13_spill] sm:$0xff] %v6098_v33  ;;  %v822_v58 = vrot.slane %v6051_v7, 4  ;;  %v6147_v59 = vsel %vm472_vm0, %v580_v42, %v543_v35  ;;  %v811_v2 = vsel %vm472_vm0, %v5943_v51, %v810_v43  ;;  %v821_v60 = vsel %vm472_vm0, %v820_v48, %v6051_v7  ;;  %1081 = vrot.lane.b32.xlu1 %v1017_v20, %s5779_s21 }
  0xb7   : > { %941 = vst.msk [vmem:[#allocation2 + $0x109] sm:$0xff] %vm333_vm1, %v6077_v15  ;;  %v597_v62 = vsel %vm472_vm0, %v596_v49, %v5912_v21  ;;  %v6158_v3 = vsel %vm472_vm0, %v567_v25, %v582_v50  ;;  %v591_v63 = vperm.slane %v585_v54, %v5909_v19  ;;  %v607_v1 = vperm.slane %v599_v6, %v5909_v19  ;;  %v2514_v25 = vld [vmem:[%s9349_s1 + $0x88] sm:$0xff] }
  0xb8   : > { %937 = vst.msk [vmem:[#allocation2 + $0xd9] sm:$0xff] %vm333_vm1, %v6094_v32  ;;  %v823_v0 = vsel %vm472_vm0, %v444_v44, %v822_v58  ;;  %v815_v51 = vperm.slane %v809_v56, %v5909_v19  ;;  %v595_v21 = vperm.slane %v587_v57, %v5909_v19  ;;  %v827_v7 = vperm.slane %v821_v60, %v5909_v19 }
  0xb9   : > { %9417 = vst [vmem:[#allocation14_spill] sm:$0xff] %v6108_v37  ;;  %v603_v11 = vperm.slane %v597_v62, %v5909_v19  ;;  %v819_v12 = vperm.slane %v811_v2, %v5909_v19  ;;  %v831_v14 = vperm.slane %v823_v0, %v5909_v19  ;;  %v620_v24 = vrot.slane %v466_v5, 4  ;;  %2742 = vmatpush.msra.mxu1 %v2514_v25 }
  0xba   : > { %945 = vst.msk [vmem:[#allocation2 + $0x139] sm:$0xff] %vm333_vm1, %v6085_v30  ;;  %v634_v26 = vrot.slane %v591_v63, 4  ;;  %v644_v27 = vrot.slane %v607_v1, 4  ;;  %v858_v31 = vrot.slane %v815_v51, 4  ;;  %v646_v8 = vrot.slane %v595_v21, 4 }
  0xbb   : > { %9418 = vst [vmem:[#allocation15_spill] sm:$0xff] %v6113_v10  ;;  %v454_v18 = vpop.permute.xlu1 %453  ;;  %v6177_v23 = vpop.permute.xlu0 %449  ;;  %v856_v35 = vrot.slane %v827_v7, 4  ;;  %v632_v4 = vrot.slane %v603_v11, 4  ;;  %v870_v39 = vrot.slane %v819_v12, 4  ;;  %v868_v13 = vrot.slane %v831_v14, 4  ;;  %2743 = vmatpush.msra.mxu1 %v2513_v17 }
  0xbc   : > { %949 = vst.msk [vmem:[#allocation2 + $0x169] sm:$0xff] %vm333_vm1, %v6098_v33  ;;  %v622_v38 = vrot.slane %v454_v18, 4  ;;  %v859_v40 = vsel %vm472_vm0, %v827_v7, %v858_v31  ;;  %v621_v41 = vsel %vm472_vm0, %v620_v24, %v454_v18  ;;  %v610_v42 = vrot.slane %v6011_v36, 4 }
  0xbd   : > { %9419 = vst [vmem:[#allocation16_spill] sm:$0xff] %v6121_v16  ;;  %v635_v43 = vsel %vm472_vm0, %v603_v11, %v634_v26  ;;  %v645_v44 = vsel %vm472_vm0, %v644_v27, %v595_v21  ;;  %v647_v46 = vsel %vm472_vm0, %v607_v1, %v646_v8  ;;  %v846_v48 = vrot.slane %v6081_v29, 4 }
  0xbe   : > { %9420 = vst [vmem:[#allocation17_spill] sm:$0xff] %v6125_v47  ;;  %v623_v45 = vsel %vm472_vm0, %v466_v5, %v622_v38  ;;  %v627_v49 = vperm.slane %v621_v41, %v5909_v19  ;;  %v857_v54 = vsel %vm472_vm0, %v856_v35, %v815_v51  ;;  %v6206_v6 = vperm.slane %v859_v40, %v5945_v52 }
  0xbf   : > { %921 = vst.msk [vmem:[#allocation2 + $0x19] sm:$0xff] %vm333_vm1, %v6108_v37  ;;  %v631_v50 = vperm.slane %v623_v45, %v5909_v19  ;;  %v871_v56 = vsel %vm472_vm0, %v831_v14, %v870_v39  ;;  %v633_v57 = vsel %vm472_vm0, %v632_v4, %v591_v63  ;;  %v869_v2 = vsel %vm472_vm0, %v868_v13, %v819_v12 }
  0xc0   : > { %9421 = vst [vmem:[#allocation18_spill] sm:$0xff] %v6130_v53  ;;  %v6214_v60 = vperm.slane %v635_v43, %v5945_v52  ;;  %v651_v62 = vperm.slane %v645_v44, %v5945_v52  ;;  %v834_v63 = vrot.slane %v6177_v23, 4  ;;  %v6225_v11 = vperm.slane %v871_v56, %v5945_v52 }
  0xc1   : > { %923 = vst.msk [vmem:[#allocation2 + $0x31] sm:$0xff] %vm333_vm1, %v6113_v10  ;;  %v668_v0 = vrot.slane %v631_v50, 4  ;;  %v639_v12 = vperm.slane %v633_v57, %v5945_v52  ;;  %v656_v14 = vrot.slane %v627_v49, 4  ;;  %v6232_v24 = vperm.slane %v857_v54, %v5945_v52  ;;  %v6582_v10 = vld [vmem:[#allocation2 + $0xd8] sm:$0xff] }
  0xc2   : > { %9422 = vst [vmem:[#allocation19_spill] sm:$0xff] %v6138_v55  ;;  %v6235_v26 = vperm.slane %v869_v2, %v5945_v52  ;;  %v655_v25 = vperm.slane %v647_v46, %v5945_v52  ;;  %v686_v31 = vrot.slane %v6214_v60, 4  ;;  %v690_v35 = vrot.slane %v651_v62, 4  ;;  %v6621_v30 = vld [vmem:[#allocation2 + $0x138] sm:$0xff] }
  0xc3   : > { %925 = vst.msk [vmem:[#allocation2 + $0x49] sm:$0xff] %vm333_vm1, %v6121_v16  ;;  %v462_v1 = vpop.permute.xlu1 %461  ;;  %v460_v5 = vpop.permute.xlu0 %459  ;;  %v682_v39 = vrot.slane %v639_v12, 4  ;;  %v6631_v32 = vld [vmem:[#allocation2 + $0x168] sm:$0xff] }
  0xc4   : > { %9423 = vst [vmem:[#allocation20_spill] sm:$0xff] %v6147_v59  ;;  %v832_v51 = vrot.slane %v462_v1, 4  ;;  %v608_v21 = vrot.slane %v460_v5, 4  ;;  %v611_v7 = vsel %vm472_vm0, %v460_v5, %v610_v42  ;;  %v835_v27 = vsel %vm472_vm0, %v462_v1, %v834_v63 }
  0xc5   : > { %927 = vst.msk [vmem:[#allocation2 + $0x61] sm:$0xff] %vm333_vm1, %v6125_v47  ;;  %v619_v18 = vperm.slane %v611_v7, %v5909_v19  ;;  %v843_v40 = vperm.slane %v835_v27, %v5909_v19  ;;  %v694_v46 = vrot.slane %v655_v25, 4 }
  0xc6   : > { %9424 = vst [vmem:[#allocation21_spill] sm:$0xff] %v6158_v3  ;;  %v609_v20 = vsel %vm472_vm0, %v608_v21, %v6011_v36  ;;  %v833_v4 = vsel %vm472_vm0, %v832_v51, %v6177_v23 }
  0xc7   : > { %929 = vst.msk [vmem:[#allocation2 + $0x79] sm:$0xff] %vm333_vm1, %v6130_v53  ;;  %v615_v8 = vperm.slane %v609_v20, %v5909_v19  ;;  %v669_v17 = vsel %vm472_vm0, %v668_v0, %v619_v18  ;;  %v670_v38 = vrot.slane %v619_v18, 4  ;;  %v839_v54 = vperm.slane %v833_v4, %v5909_v19 }
  0xc8   : > { %931 = vst.msk [vmem:[#allocation2 + $0x91] sm:$0xff] %vm333_vm1, %v6138_v55  ;;  %v675_v36 = vperm.slane %v669_v17, %v5945_v52  ;;  %v1021_v42 = vld [vmem:[#allocation2 + $0x31] sm:$0xff]  ;;  %v894_v5 = vrot.slane %v843_v40, 4  ;;  %v918_v17 = vrot.slane %v6225_v11, 4 }
  0xc9   : > { %933 = vst.msk [vmem:[#allocation2 + $0xa9] sm:$0xff] %vm333_vm1, %v6147_v59  ;;  %v657_v13 = vsel %vm472_vm0, %v656_v14, %v615_v8  ;;  %v658_v41 = vrot.slane %v615_v8, 4  ;;  %v671_v23 = vsel %vm472_vm0, %v631_v50, %v670_v38  ;;  %v882_v18 = vrot.slane %v839_v54, 4 }
  0xca   : > { %935 = vst.msk [vmem:[#allocation2 + $0xc1] sm:$0xff] %vm333_vm1, %v6158_v3  ;;  %v663_v43 = vperm.slane %v657_v13, %v5945_v52  ;;  %v688_v44 = vrot.slane %v675_v36, 4  ;;  %v6260_v45 = vsel %vm472_vm0, %v675_v36, %v690_v35  ;;  %v679_v57 = vperm.slane %v671_v23, %v5945_v52  ;;  %v1037_v3 = vld [vmem:[#allocation2 + $0xf1] sm:$0xff] }
  0xcb   : > { %9425 = vst [vmem:[#allocation22_spill] sm:$0xff] %v6260_v45  ;;  %v659_v56 = vsel %vm472_vm0, %v627_v49, %v658_v41  ;;  %v468_v50 = vpop.permute.xlu0 %467  ;;  %v910_v38 = vrot.slane %v6206_v6, 4  ;;  %v906_v41 = vrot.slane %v6232_v24, 4 }
  0xcc   : > { %932 = vst.msk [vmem:[#allocation2 + $0x99] sm:$0xff] %vm333_vm1, %v6260_v45  ;;  %v680_v2 = vrot.slane %v663_v43, 4  ;;  %v6272_v0 = vsel %vm472_vm0, %v663_v43, %v682_v39  ;;  %v6275_v1 = vsel %vm472_vm0, %v688_v44, %v651_v62  ;;  %v692_v49 = vrot.slane %v679_v57, 4  ;;  %v6550_v45 = vld [vmem:[#allocation2 + $0x150] sm:$0xff] }
  0xcd   : > { %9426 = vst [vmem:[#allocation23_spill] sm:$0xff] %v6272_v0  ;;  %v844_v63 = vrot.slane %v468_v50, 4  ;;  %v847_v51 = vsel %vm472_vm0, %v468_v50, %v846_v48  ;;  %v6297_v20 = vsel %vm472_vm0, %v679_v57, %v694_v46 }
  0xce   : > { %9427 = vst [vmem:[#allocation24_spill] sm:$0xff] %v6275_v1  ;;  %v6285_v21 = vsel %vm472_vm0, %v680_v2, %v639_v12  ;;  %v855_v14 = vperm.slane %v847_v51, %v5909_v19  ;;  %v6294_v27 = vsel %vm472_vm0, %v692_v49, %v655_v25 }
  0xcf   : > { %924 = vst.msk [vmem:[#allocation2 + $0x39] sm:$0xff] %vm333_vm1, %v6272_v0  ;;  %v845_v48 = vsel %vm472_vm0, %v844_v63, %v6081_v29 }
  0xd0   : > { %9428 = vst [vmem:[#allocation25_spill] sm:$0xff] %v6285_v21  ;;  %v892_v25 = vrot.slane %v855_v14, 4  ;;  %v895_v8 = vsel %vm472_vm0, %v855_v14, %v894_v5  ;;  %v1027_v14 = vld [vmem:[#allocation2 + $0x79] sm:$0xff]  ;;  %v6576_v55 = vld [vmem:[#allocation2 + $0xa8] sm:$0xff] }
  0xd1   : > { %v1033_v58 = vld [vmem:[#allocation2 + $0xc1] sm:$0xff]  ;;  %930 = vst.msk [vmem:[#allocation2 + $0x81] sm:$0xff] %vm333_vm1, %v6275_v1  ;;  %v903_v35 = vperm.slane %v895_v8, %v5945_v52  ;;  %v6555_v1 = vld [vmem:[#allocation2 + $0xa9] sm:$0xff] }
  0xd2   : > { %1113 = vrot.lane.b32.xlu2 %v1033_v58, %s5779_s21  ;;  %v667_v58 = vperm.slane %v659_v56, %v5945_v52  ;;  %9430 = vst [vmem:[#allocation27_spill] sm:$0xff] %v6294_v27  ;;  %v893_v4 = vsel %vm472_vm0, %v892_v25, %v843_v40  ;;  %v954_v8 = vld [vmem:[#allocation2 + $0x8] sm:$0xff]  ;;  %v6412_v34 = vld [vmem:[#allocation2 + $0xc0] sm:$0xff] }
  0xd3   : > { %9431 = vst [vmem:[#allocation28_spill] sm:$0xff] %v6297_v20  ;;  %v899_v39 = vperm.slane %v893_v4, %v5945_v52  ;;  %v6325_v13 = vsel %vm472_vm0, %v903_v35, %v918_v17  ;;  %v916_v23 = vrot.slane %v903_v35, 4  ;;  %v1030_v4 = vld [vmem:[#allocation2 + $0x99] sm:$0xff] }
  0xd4   : > { %v684_v7 = vrot.slane %v667_v58, 4  ;;  %v6288_v62 = vsel %vm472_vm0, %v667_v58, %v686_v31  ;;  %922 = vst.msk [vmem:[#allocation2 + $0x21] sm:$0xff] %vm333_vm1, %v6285_v21  ;;  %v851_v31 = vperm.slane %v845_v48, %v5909_v19  ;;  %v6610_v19 = vld [vmem:[#allocation2 + $0x120] sm:$0xff] }
  0xd5   : > { %9429 = vst [vmem:[#allocation26_spill] sm:$0xff] %v6288_v62  ;;  %v912_v57 = vrot.slane %v899_v39, 4 }
  0xd6   : > { %v6305_v12 = vsel %vm472_vm0, %v684_v7, %v6214_v60  ;;  %928 = vst.msk [vmem:[#allocation2 + $0x69] sm:$0xff] %vm333_vm1, %v6288_v62  ;;  %v880_v29 = vrot.slane %v851_v31, 4  ;;  %v883_v60 = vsel %vm472_vm0, %v851_v31, %v882_v18  ;;  %v6332_v40 = vld [vmem:[#allocation2 + $0x32] sm:$0xff]  ;;  %v6374_v7 = vld [vmem:[#allocation2 + $0x3a] sm:$0xff] }
  0xd7   : > { %9432 = vst [vmem:[#allocation29_spill] sm:$0xff] %v6305_v12  ;;  %v891_v36 = vperm.slane %v883_v60, %v5945_v52  ;;  %v6357_v49 = vsel %vm472_vm0, %v912_v57, %v6235_v26  ;;  %v1019_v31 = vld [vmem:[#allocation2 + $0x19] sm:$0xff]  ;;  %v6417_v60 = vld [vmem:[#allocation2 + $0x30] sm:$0xff] }
  0xd8   : > { %926 = vst.msk [vmem:[#allocation2 + $0x51] sm:$0xff] %vm333_vm1, %v6305_v12  ;;  %v881_v43 = vsel %vm472_vm0, %v880_v29, %v839_v54  ;;  %v6455_v57 = vld [vmem:[#allocation2 + $0x91] sm:$0xff]  ;;  %v6567_v0 = vld [vmem:[#allocation2 + $0x80] sm:$0xff] }
  0xd9   : > { %934 = vst.msk [vmem:[#allocation2 + $0xb1] sm:$0xff] %vm333_vm1, %v6294_v27  ;;  %v887_v44 = vperm.slane %v881_v43, %v5945_v52  ;;  %v908_v46 = vrot.slane %v891_v36, 4  ;;  %v6336_v56 = vsel %vm472_vm0, %v891_v36, %v910_v38  ;;  %v6426_v38 = vld [vmem:[#allocation2 + $0x7a] sm:$0xff]  ;;  %v6430_v36 = vld [vmem:[#allocation2 + $0x82] sm:$0xff]  ;;  %v6546_v27 = vld [vmem:[#allocation2 + $0x90] sm:$0xff] }
  0xda   : > { %1089 = vrot.lane.b32.xlu2 %v1021_v42, %s5779_s21  ;;  %936 = vst.msk [vmem:[#allocation2 + $0xc9] sm:$0xff] %vm333_vm1, %v6297_v20  ;;  %v914_v42 = vrot.slane %v6235_v26, 4  ;;  %v6599_v52 = vld [vmem:[#allocation2 + $0xf0] sm:$0xff] }
  0xdb   : > { %9433 = vst [vmem:[#allocation30_spill] sm:$0xff] %v6325_v13  ;;  %v1020_v54 = vld [vmem:[#allocation2 + $0x21] sm:$0xff]  ;;  %v904_v58 = vrot.slane %v887_v44, 4  ;;  %v6346_v2 = vsel %vm472_vm0, %v887_v44, %v906_v41  ;;  %v6350_v5 = vsel %vm472_vm0, %v908_v46, %v6206_v6  ;;  %v6367_v6 = vsel %vm472_vm0, %v916_v23, %v6225_v11  ;;  %v6434_v41 = vld [vmem:[#allocation2 + $0x39] sm:$0xff] }
  0xdc   : > { %952 = vst.msk [vmem:[#allocation2 + $0x189] sm:$0xff] %vm333_vm1, %v6325_v13  ;;  %v6341_v50 = vsel %vm472_vm0, %v899_v39, %v914_v42  ;;  %1087 = vrot.lane.b32.xlu1 %v1020_v54, %s5779_s21  ;;  %v6432_v39 = vld [vmem:[#allocation2 + $0x92] sm:$0xff]  ;;  %v6438_v42 = vld [vmem:[#allocation2 + $0x9a] sm:$0xff]  ;;  %v6505_v13 = vld [vmem:[#allocation2 + $0x108] sm:$0xff] }
  0xdd   : > { %9434 = vst [vmem:[#allocation31_spill] sm:$0xff] %v6336_v56  ;;  %v6363_v51 = vsel %vm472_vm0, %v904_v58, %v6232_v24  ;;  %v1023_v24 = vld [vmem:[#allocation2 + $0x49] sm:$0xff]  ;;  %v6459_v54 = vld [vmem:[#allocation2 + $0x78] sm:$0xff] }
  0xde   : > { %2401 = vst.msk [vmem:[#allocation3 + $0x8] sm:$0xff] %vm333_vm1, %v6332_v40  ;;  %v6400_v25 = vld [vmem:[#allocation2 + $0x62] sm:$0xff]  ;;  %v6407_v35 = vld [vmem:[#allocation2 + $0x6a] sm:$0xff] }
  0xdf   : > { %9435 = vst [vmem:[#allocation32_spill] sm:$0xff] %v6341_v50  ;;  %v1024_v63 = vld [vmem:[#allocation2 + $0x51] sm:$0xff]  ;;  %v6414_v29 = vld [vmem:[#allocation2 + $0x69] sm:$0xff] }
  0xe0   : > { %944 = vst.msk [vmem:[#allocation2 + $0x129] sm:$0xff] %vm333_vm1, %v6336_v56  ;;  %v6391_v18 = vld [vmem:[#allocation2 + $0x4a] sm:$0xff]  ;;  %v6396_v48 = vld [vmem:[#allocation2 + $0x52] sm:$0xff] }
  0xe1   : > { %9436 = vst [vmem:[#allocation33_spill] sm:$0xff] %v6346_v2  ;;  %v1034_v26 = vld [vmem:[#allocation2 + $0xc9] sm:$0xff]  ;;  %v6453_v46 = vld [vmem:[#allocation2 + $0xb2] sm:$0xff] }
  0xe2   : > { %9437 = vst [vmem:[#allocation34_spill] sm:$0xff] %v6350_v5  ;;  %1095 = vrot.lane.b32.xlu2 %v1024_v63, %s5779_s21  ;;  %1115 = vrot.lane.b32.xlu0 %v1034_v26, %s5779_s21  ;;  %v6446_v23 = vld [vmem:[#allocation2 + $0xaa] sm:$0xff]  ;;  %v6465_v58 = vld [vmem:[#allocation2 + $0xc2] sm:$0xff]  ;;  %v6469_v26 = vld [vmem:[#allocation2 + $0x98] sm:$0xff] }
  0xe3   : > { %948 = vst.msk [vmem:[#allocation2 + $0x159] sm:$0xff] %vm333_vm1, %v6341_v50  ;;  %v6451_v44 = vld [vmem:[#allocation2 + $0x50] sm:$0xff]  ;;  %v6519_v56 = vld [vmem:[#allocation2 + $0x38] sm:$0xff] }
  0xe4   : > { %9438 = vst [vmem:[#allocation35_spill] sm:$0xff] %v6357_v49  ;;  %1093 = vrot.lane.b32.xlu1 %v1023_v24, %s5779_s21  ;;  %v6476_v24 = vld [vmem:[#allocation2 + $0x61] sm:$0xff]  ;;  %v6571_v21 = vld [vmem:[#allocation2 + $0xb0] sm:$0xff] }
  0xe5   : > { %940 = vst.msk [vmem:[#allocation2 + $0xf9] sm:$0xff] %vm333_vm1, %v6346_v2  ;;  %v2434_v11 = vld [vmem:[#allocation3 + $0x8] sm:$0xff] }
  0xe6   : > { %9439 = vst [vmem:[#allocation36_spill] sm:$0xff] %v6363_v51  ;;  %5665 = vmatmul.msk.f32.vlgmr.msra.gmra.mxu1 %vm333_vm1, %v2434_v11  ;;  %v6474_v11 = vld [vmem:[#allocation2 + $0xca] sm:$0xff]  ;;  %v6534_v2 = vld [vmem:[#allocation2 + $0xd9] sm:$0xff] }
  0xe7   : > { %9440 = vst [vmem:[#allocation37_spill] sm:$0xff] %v6367_v6  ;;  %v6542_v20 = vld [vmem:[#allocation2 + $0x128] sm:$0xff] }
  0xe8   : > { %942 = vst.msk [vmem:[#allocation2 + $0x111] sm:$0xff] %vm333_vm1, %v6350_v5  ;;  %v6602_v47 = vld [vmem:[#allocation2 + $0x122] sm:$0xff]  ;;  %v6613_v22 = vld [vmem:[#allocation2 + $0x12a] sm:$0xff] }
  0xe9   : > { %938 = vst.msk [vmem:[#allocation2 + $0xe1] sm:$0xff] %vm333_vm1, %v6363_v51  ;;  %v6538_v51 = vld [vmem:[#allocation2 + $0x60] sm:$0xff] }
  0xea   : > { %946 = vst.msk [vmem:[#allocation2 + $0x141] sm:$0xff] %vm333_vm1, %v6357_v49  ;;  %1101 = vrot.lane.b32.xlu2 %v1027_v14, %s5779_s21  ;;  %1085 = vrot.lane.b32.xlu0 %v1019_v31, %s5779_s21  ;;  %v6480_v14 = vld [vmem:[#allocation2 + $0xc8] sm:$0xff]  ;;  %v6486_v31 = vld [vmem:[#allocation2 + $0x20] sm:$0xff] }
  0xeb   : > { %950 = vst.msk [vmem:[#allocation2 + $0x171] sm:$0xff] %vm333_vm1, %v6367_v6  ;;  %v6508_v6 = vld [vmem:[#allocation2 + $0x81] sm:$0xff] }
  0xec   : > { %2402 = vst.msk [vmem:[#allocation3 + $0x18] sm:$0xff] %vm333_vm1, %v6374_v7  ;;  %1099 = vrot.lane.b32.xlu1 %v6414_v29, %s5779_s21  ;;  %v6527_v5 = vld [vmem:[#allocation2 + $0xf2] sm:$0xff]  ;;  %v6557_v62 = vld [vmem:[#allocation2 + $0xfa] sm:$0xff] }
  0xed   : > { %2403 = vst.msk [vmem:[#allocation3 + $0x28] sm:$0xff] %vm333_vm1, %v6391_v18  ;;  %v6578_v53 = vld [vmem:[#allocation2 + $0xf9] sm:$0xff] }
  0xee   : > { %2404 = vst.msk [vmem:[#allocation3 + $0x38] sm:$0xff] %vm333_vm1, %v6396_v48  ;;  %v6643_v15 = vld [vmem:[#allocation2 + $0xf8] sm:$0xff] }
  0xef   : > { %2405 = vst.msk [vmem:[#allocation3 + $0x48] sm:$0xff] %vm333_vm1, %v6400_v25  ;;  %v6586_v37 = vld [vmem:[#allocation2 + $0x112] sm:$0xff]  ;;  %v6595_v59 = vld [vmem:[#allocation2 + $0x10a] sm:$0xff] }
  0xf0   : > { %9441 = vst [vmem:[#allocation38_spill] sm:$0xff] %v6414_v29  ;;  %v1036_v63 = vld [vmem:[#allocation2 + $0xe1] sm:$0xff]  ;;  %v1040_v33 = vld [vmem:[#allocation2 + $0x111] sm:$0xff]  ;;  %v6687_v29 = vld [vmem:[#allocation2 + $0x169] sm:$0xff] }
  0xf1   : > { %986 = vst.msk [vmem:[#allocation3 + $0x10] sm:$0xff] %vm333_vm1, %v954_v8  ;;  %v6513_v50 = vld [vmem:[#allocation2 + $0xe0] sm:$0xff] }
  0xf2   : > { %2406 = vst.msk [vmem:[#allocation3 + $0x58] sm:$0xff] %vm333_vm1, %v6407_v35  ;;  %1107 = vrot.lane.b32.xlu2 %v1030_v4, %s5779_s21  ;;  %1091 = vrot.lane.b32.xlu0 %v6434_v41, %s5779_s21  ;;  %v6495_v4 = vld [vmem:[#allocation2 + $0xb1] sm:$0xff]  ;;  %v6515_v49 = vld [vmem:[#allocation2 + $0xda] sm:$0xff]  ;;  %v6563_v12 = vld [vmem:[#allocation2 + $0xe2] sm:$0xff] }
  0xf3   : > { %v2436_v17 = vld [vmem:[#allocation3 + $0x18] sm:$0xff]  ;;  %1001 = vst.msk [vmem:[#allocation3 + $0x100] sm:$0xff] %vm333_vm1, %v6412_v34  ;;  %v6604_v16 = vld [vmem:[#allocation2 + $0x170] sm:$0xff]  ;;  %v6625_v28 = vld [vmem:[#allocation2 + $0x13a] sm:$0xff] }
  0xf4   : > { %5666 = vmatmul.msk.f32.gmra.mxu1 %vm333_vm1, %v2436_v17  ;;  %989 = vst.msk [vmem:[#allocation3 + $0x40] sm:$0xff] %vm333_vm1, %v6417_v60  ;;  %v2438_v43 = vld [vmem:[#allocation3 + $0x28] sm:$0xff]  ;;  %1105 = vrot.lane.b32.xlu1 %v6455_v57, %s5779_s21  ;;  %v6634_v61 = vld [vmem:[#allocation2 + $0x142] sm:$0xff] }
  0xf5   : > { %9442 = vst [vmem:[#allocation39_spill] sm:$0xff] %v6434_v41  ;;  %v2440_v8 = vld [vmem:[#allocation3 + $0x38] sm:$0xff]  ;;  %v6490_v17 = vld [vmem:[#allocation2 + $0x18] sm:$0xff] }
  0xf6   : > { %2407 = vst.msk [vmem:[#allocation3 + $0x68] sm:$0xff] %vm333_vm1, %v6426_v38 }
  0xf7   : > { %2408 = vst.msk [vmem:[#allocation3 + $0x78] sm:$0xff] %vm333_vm1, %v6430_v36 }
  0xf8   : > { %2409 = vst.msk [vmem:[#allocation3 + $0x88] sm:$0xff] %vm333_vm1, %v6432_v39 }
  0xf9   : > { %2410 = vst.msk [vmem:[#allocation3 + $0x98] sm:$0xff] %vm333_vm1, %v6438_v42 }
  0xfa   : > { %9443 = vst [vmem:[#allocation40_spill] sm:$0xff] %v6455_v57  ;;  %1119 = vrot.lane.b32.xlu2 %v1036_v63, %s5779_s21  ;;  %1097 = vrot.lane.b32.xlu0 %v6476_v24, %s5779_s21  ;;  %v1084_v63 = vpop.permute.xlu2 %1083 }
  0xfb   : > { %2411 = vst.msk [vmem:[#allocation3 + $0xa8] sm:$0xff] %vm333_vm1, %v6446_v23 }
  0xfc   : > { %5667 = vmatmul.msk.f32.gmra.mxu1 %vm333_vm1, %v2438_v43  ;;  %992 = vst.msk [vmem:[#allocation3 + $0x70] sm:$0xff] %vm333_vm1, %v6451_v44  ;;  %v6499_v43 = vld [vmem:[#allocation2 + $0x48] sm:$0xff]  ;;  %1111 = vrot.lane.b32.xlu1 %v6495_v4, %s5779_s21 }
  0xfd   : > { %2412 = vst.msk [vmem:[#allocation3 + $0xb8] sm:$0xff] %vm333_vm1, %v6453_v46 }
  0xfe   : > { %995 = vst.msk [vmem:[#allocation3 + $0xa0] sm:$0xff] %vm333_vm1, %v6459_v54  ;;  %v2448_v9 = vld [vmem:[#allocation3 + $0x78] sm:$0xff] }
  0xff   : > { %9444 = vst [vmem:[#allocation41_spill] sm:$0xff] %v6476_v24  ;;  %v2397_v24 = vld [vmem:[#allocation2 + $0x182] sm:$0xff]  ;;  %v2450_v57 = vld [vmem:[#allocation3 + $0x88] sm:$0xff] }
 0x100   : > { %2413 = vst.msk [vmem:[#allocation3 + $0xc8] sm:$0xff] %vm333_vm1, %v6465_v58 }
 0x101   : > { %998 = vst.msk [vmem:[#allocation3 + $0xd0] sm:$0xff] %vm333_vm1, %v6469_v26 }
 0x102   : > { %2414 = vst.msk [vmem:[#allocation3 + $0xd8] sm:$0xff] %vm333_vm1, %v6474_v11  ;;  %1103 = vrot.lane.b32.xlu0 %v6508_v6, %s5779_s21 }
 0x103   : > { %1002 = vst.msk [vmem:[#allocation3 + $0x110] sm:$0xff] %vm333_vm1, %v6480_v14 }
 0x104   : > { %5668 = vmatmul.msk.f32.gmra.mxu1 %vm333_vm1, %v2440_v8  ;;  %9445 = vst [vmem:[#allocation42_spill] sm:$0xff] %v6495_v4  ;;  %v1039_v8 = vld [vmem:[#allocation2 + $0x109] sm:$0xff]  ;;  %1117 = vrot.lane.b32.xlu1 %v6534_v2, %s5779_s21  ;;  %v6673_v4 = vld [vmem:[#allocation2 + $0x172] sm:$0xff] }
 0x105   : > { %988 = vst.msk [vmem:[#allocation3 + $0x30] sm:$0xff] %vm333_vm1, %v6486_v31  ;;  %1125 = vrot.lane.b32.xlu2 %v1039_v8, %s5779_s21  ;;  %v2442_v8 = vld [vmem:[#allocation3 + $0x48] sm:$0xff] }
 0x106   : > { %987 = vst.msk [vmem:[#allocation3 + $0x20] sm:$0xff] %vm333_vm1, %v6490_v17 }
 0x107   : > { %1179 = vst.msk [vmem:[#allocation3 + $0x10] sm:$0xff] %vm1177_vm4, %v1084_v63  ;;  %v6525_v63 = vld [vmem:[#allocation2 + $0x68] sm:$0xff] }
 0x108   : > { %9446 = vst [vmem:[#allocation43_spill] sm:$0xff] %v6508_v6  ;;  %v6668_v6 = vld [vmem:[#allocation2 + $0x140] sm:$0xff] }
 0x109   : > { %991 = vst.msk [vmem:[#allocation3 + $0x60] sm:$0xff] %vm333_vm1, %v6499_v43 }
 0x10a   : > { %1007 = vst.msk [vmem:[#allocation3 + $0x160] sm:$0xff] %vm333_vm1, %v6505_v13  ;;  %1109 = vrot.lane.b32.xlu0 %v6555_v1, %s5779_s21 }
 0x10b   : > { %1004 = vst.msk [vmem:[#allocation3 + $0x130] sm:$0xff] %vm333_vm1, %v6513_v50 }
 0x10c   : > { %2415 = vst.msk [vmem:[#allocation3 + $0xe8] sm:$0xff] %vm333_vm1, %v6515_v49  ;;  %5669 = vmatmul.msk.f32.gmra.mxu1 %vm333_vm1, %v2442_v8  ;;  %v1042_v8 = vld [vmem:[#allocation2 + $0x129] sm:$0xff]  ;;  %1123 = vrot.lane.b32.xlu1 %v6578_v53, %s5779_s21 }
 0x10d   : > { %990 = vst.msk [vmem:[#allocation3 + $0x50] sm:$0xff] %vm333_vm1, %v6519_v56  ;;  %1131 = vrot.lane.b32.xlu2 %v1042_v8, %s5779_s21  ;;  %v2444_v8 = vld [vmem:[#allocation3 + $0x58] sm:$0xff] }
 0x10e   : > { %9447 = vst [vmem:[#allocation44_spill] sm:$0xff] %v6534_v2  ;;  %v6666_v2 = vld [vmem:[#allocation2 + $0x16a] sm:$0xff] }
 0x10f   : > { %994 = vst.msk [vmem:[#allocation3 + $0x90] sm:$0xff] %vm333_vm1, %v6525_v63 }
 0x110   : > { %2417 = vst.msk [vmem:[#allocation3 + $0x108] sm:$0xff] %vm333_vm1, %v6527_v5 }
 0x111   : > { %1010 = vst.msk [vmem:[#allocation3 + $0x190] sm:$0xff] %vm333_vm1, %v6542_v20 }
 0x112   : > { %993 = vst.msk [vmem:[#allocation3 + $0x80] sm:$0xff] %vm333_vm1, %v6538_v51  ;;  %1121 = vrot.lane.b32.xlu0 %v1037_v3, %s5779_s21  ;;  %v6617_v3 = vld [vmem:[#allocation2 + $0x121] sm:$0xff] }
 0x113   : > { %9448 = vst [vmem:[#allocation45_spill] sm:$0xff] %v6555_v1  ;;  %v6662_v1 = vld [vmem:[#allocation2 + $0x15a] sm:$0xff] }
 0x114   : > { %997 = vst.msk [vmem:[#allocation3 + $0xc0] sm:$0xff] %vm333_vm1, %v6546_v27  ;;  %5670 = vmatmul.msk.f32.gmra.mxu1 %vm333_vm1, %v2444_v8  ;;  %v1045_v8 = vld [vmem:[#allocation2 + $0x151] sm:$0xff]  ;;  %1129 = vrot.lane.b32.xlu1 %v6617_v3, %s5779_s21 }
 0x115   : > { %1013 = vst.msk [vmem:[#allocation3 + $0x1c0] sm:$0xff] %vm333_vm1, %v6550_v45  ;;  %1137 = vrot.lane.b32.xlu2 %v1045_v8, %s5779_s21  ;;  %v2446_v8 = vld [vmem:[#allocation3 + $0x68] sm:$0xff] }
 0x116   : > { %2416 = vst.msk [vmem:[#allocation3 + $0xf8] sm:$0xff] %vm333_vm1, %v6563_v12 }
 0x117   : > { %2418 = vst.msk [vmem:[#allocation3 + $0x118] sm:$0xff] %vm333_vm1, %v6557_v62 }
 0x118   : > { %9449 = vst [vmem:[#allocation46_spill] sm:$0xff] %v6578_v53  ;;  %v6654_v53 = vld [vmem:[#allocation2 + $0x141] sm:$0xff] }
 0x119   : > { %996 = vst.msk [vmem:[#allocation3 + $0xb0] sm:$0xff] %vm333_vm1, %v6567_v0 }
 0x11a   : > { %1000 = vst.msk [vmem:[#allocation3 + $0xf0] sm:$0xff] %vm333_vm1, %v6571_v21  ;;  %1127 = vrot.lane.b32.xlu0 %v1040_v33, %s5779_s21  ;;  %v6658_v33 = vld [vmem:[#allocation2 + $0x158] sm:$0xff] }
 0x11b   : > { %999 = vst.msk [vmem:[#allocation3 + $0xe0] sm:$0xff] %vm333_vm1, %v6576_v55 }
 0x11c   : > { %1003 = vst.msk [vmem:[#allocation3 + $0x120] sm:$0xff] %vm333_vm1, %v6582_v10  ;;  %5671 = vmatmul.msk.f32.gmra.mxu1 %vm333_vm1, %v2446_v8  ;;  %v1048_v8 = vld [vmem:[#allocation2 + $0x171] sm:$0xff]  ;;  %1135 = vrot.lane.b32.xlu1 %v6654_v53, %s5779_s21 }
 0x11d   : > { %2420 = vst.msk [vmem:[#allocation3 + $0x138] sm:$0xff] %vm333_vm1, %v6586_v37  ;;  %1143 = vrot.lane.b32.xlu2 %v1048_v8, %s5779_s21  ;;  %v6648_v8 = vld [vmem:[#allocation2 + $0x152] sm:$0xff] }
 0x11e   : > { %9450 = vst [vmem:[#allocation47_spill] sm:$0xff] %v6604_v16 }
 0x11f   : > { %2419 = vst.msk [vmem:[#allocation3 + $0x128] sm:$0xff] %vm333_vm1, %v6595_v59 }
 0x120   : > { %1016 = vst.msk [vmem:[#allocation3 + $0x1f0] sm:$0xff] %vm333_vm1, %v6604_v16  ;;  %v2452_v16 = vld [vmem:[#allocation3 + $0x98] sm:$0xff] }
 0x121   : > { %1005 = vst.msk [vmem:[#allocation3 + $0x140] sm:$0xff] %vm333_vm1, %v6599_v52 }
 0x122   : > { %9451 = vst [vmem:[#allocation48_spill] sm:$0xff] %v6617_v3  ;;  %v6652_v3 = vld [vmem:[#allocation2 + $0x110] sm:$0xff] }
 0x123   : > { %2421 = vst.msk [vmem:[#allocation3 + $0x148] sm:$0xff] %vm333_vm1, %v6602_v47 }
 0x124   : > { %1009 = vst.msk [vmem:[#allocation3 + $0x180] sm:$0xff] %vm333_vm1, %v6610_v19  ;;  %5672 = vmatmul.msk.f32.gmra.mxu1 %vm333_vm1, %v2448_v9  ;;  %v1212_v9 = vld [vmem:[#allocation2 + $0x1a] sm:$0xff]  ;;  %1141 = vrot.lane.b32.xlu1 %v6687_v29, %s5779_s21 }
 0x125   : > { %2422 = vst.msk [vmem:[#allocation3 + $0x158] sm:$0xff] %vm333_vm1, %v6613_v22  ;;  %1278 = vrot.lane.b32.xlu2 %v1212_v9, %s5778_s20  ;;  %v2398_v9 = vld [vmem:[#allocation2 + $0x18a] sm:$0xff] }
 0x126   : > { %9452 = vst [vmem:[#allocation49_spill] sm:$0xff] %v6631_v32 }
 0x127   : > { %1011 = vst.msk [vmem:[#allocation3 + $0x1a0] sm:$0xff] %vm333_vm1, %v6621_v30 }
 0x128   : > { %2423 = vst.msk [vmem:[#allocation3 + $0x168] sm:$0xff] %vm333_vm1, %v6625_v28 }
 0x129   : > { %1015 = vst.msk [vmem:[#allocation3 + $0x1e0] sm:$0xff] %vm333_vm1, %v6631_v32  ;;  %v953_v32 = vld [vmem:[#allocation2] sm:$0xff] }
 0x12a   : > { %2424 = vst.msk [vmem:[#allocation3 + $0x178] sm:$0xff] %vm333_vm1, %v6634_v61 }
 0x12b   : > { %1006 = vst.msk [vmem:[#allocation3 + $0x150] sm:$0xff] %vm333_vm1, %v6643_v15 }
 0x12c   : > { %9453 = vst [vmem:[#allocation50_spill] sm:$0xff] %v6654_v53  ;;  %v1043_v53 = vld [vmem:[#allocation2 + $0x139] sm:$0xff]  ;;  %v1114_v41 = vpop.permute.xlu2 %1113  ;;  %5673 = vmatmul.msk.f32.gmra.mxu1 %vm333_vm1, %v2450_v57  ;;  %v1211_v57 = vld [vmem:[#allocation2 + $0xa] sm:$0xff] }
 0x12d   : > { %1008 = vst.msk [vmem:[#allocation3 + $0x170] sm:$0xff] %vm333_vm1, %v6652_v3  ;;  %1133 = vrot.lane.b32.xlu0 %v1043_v53, %s5779_s21  ;;  %1284 = vrot.lane.b32.xlu2 %v6374_v7, %s5778_s20  ;;  %v1046_v53 = vld [vmem:[#allocation2 + $0x159] sm:$0xff] }
 0x12e   : > { %1014 = vst.msk [vmem:[#allocation3 + $0x1d0] sm:$0xff] %vm333_vm1, %v6658_v33  ;;  %1276 = vrot.lane.b32.xlu1 %v1211_v57, %s5778_s20  ;;  %v2454_v7 = vld [vmem:[#allocation3 + $0xa8] sm:$0xff] }
 0x12f   : > { %2425 = vst.msk [vmem:[#allocation3 + $0x188] sm:$0xff] %vm333_vm1, %v6648_v8 }
 0x130   : > { %1012 = vst.msk [vmem:[#allocation3 + $0x1b0] sm:$0xff] %vm333_vm1, %v6668_v6 }
 0x131   : > { %2426 = vst.msk [vmem:[#allocation3 + $0x198] sm:$0xff] %vm333_vm1, %v6662_v1 }
 0x132   : > { %2427 = vst.msk [vmem:[#allocation3 + $0x1a8] sm:$0xff] %vm333_vm1, %v6666_v2 }
 0x133   : > { %2428 = vst.msk [vmem:[#allocation3 + $0x1b8] sm:$0xff] %vm333_vm1, %v6673_v4 }
 0x134   : > { %2429 = vst.msk [vmem:[#allocation3 + $0x1c8] sm:$0xff] %vm333_vm1, %v2397_v24  ;;  %v1090_v24 = vpop.permute.xlu2 %1089  ;;  %5674 = vmatmul.msk.f32.gmra.mxu1 %vm333_vm1, %v2452_v16  ;;  %v1213_v16 = vld [vmem:[#allocation2 + $0x22] sm:$0xff] }
 0x135   : > { %1194 = vst.msk [vmem:[#allocation3 + $0x100] sm:$0xff] %vm1177_vm4, %v1114_v41  ;;  %1139 = vrot.lane.b32.xlu0 %v1046_v53, %s5779_s21  ;;  %v1210_v41 = vld [vmem:[#allocation2 + $0x2] sm:$0xff]  ;;  %1290 = vrot.lane.b32.xlu2 %v6400_v25, %s5778_s20 }
 0x136   : > { %2430 = vst.msk [vmem:[#allocation3 + $0x1d8] sm:$0xff] %vm333_vm1, %v2398_v9  ;;  %1282 = vrot.lane.b32.xlu1 %v6332_v40, %s5778_s20  ;;  %v2456_v25 = vld [vmem:[#allocation3 + $0xb8] sm:$0xff] }
 0x137   : > { %985 = vst.msk [vmem:[#allocation3] sm:$0xff] %vm333_vm1, %v953_v32  ;;  %v1082_v32 = vpop.permute.xlu1 %1081 }
 0x138   : > { %1182 = vst.msk [vmem:[#allocation3 + $0x40] sm:$0xff] %vm1177_vm4, %v1090_v24 }
 0x139   : > { %1178 = vst.msk [vmem:[#allocation3] sm:$0xff] %vm1177_vm4, %v1082_v32  ;;  %v2474_v32 = vld [vmem:[#allocation3 + $0x148] sm:$0xff] }
 0x13c   : > { %5675 = vmatmul.msk.f32.gmra.mxu1 %vm333_vm1, %v2454_v7  ;;  %v1096_v9 = vpop.permute.xlu2 %1095 }
 0x13d   : > { %1274 = vrot.lane.b32.xlu0 %v1210_v41, %s5778_s20  ;;  %1296 = vrot.lane.b32.xlu2 %v6430_v36, %s5778_s20  ;;  %1185 = vst.msk [vmem:[#allocation3 + $0x70] sm:$0xff] %vm1177_vm4, %v1096_v9  ;;  %v2458_v36 = vld [vmem:[#allocation3 + $0xc8] sm:$0xff]  ;;  %v2476_v9 = vld [vmem:[#allocation3 + $0x158] sm:$0xff] }
 0x13e   : > { %1288 = vrot.lane.b32.xlu1 %v6396_v48, %s5778_s20 }
 0x144   : > { %5676 = vmatmul.msk.f32.gmra.mxu1 %vm333_vm1, %v2456_v25  ;;  %v1102_v40 = vpop.permute.xlu2 %1101 }
 0x145   : > { %1280 = vrot.lane.b32.xlu0 %v1213_v16, %s5778_s20  ;;  %1302 = vrot.lane.b32.xlu2 %v6446_v23, %s5778_s20  ;;  %1188 = vst.msk [vmem:[#allocation3 + $0xa0] sm:$0xff] %vm1177_vm4, %v1102_v40  ;;  %v2460_v23 = vld [vmem:[#allocation3 + $0xd8] sm:$0xff]  ;;  %v2478_v40 = vld [vmem:[#allocation3 + $0x168] sm:$0xff] }
 0x146   : > { %1294 = vrot.lane.b32.xlu1 %v6426_v38, %s5778_s20 }
 0x14c   : > { %5677 = vmatmul.msk.f32.gmra.mxu1 %vm333_vm1, %v2458_v36  ;;  %v1108_v48 = vpop.permute.xlu2 %1107 }
 0x14d   : > { %1286 = vrot.lane.b32.xlu0 %v6391_v18, %s5778_s20  ;;  %1308 = vrot.lane.b32.xlu2 %v6474_v11, %s5778_s20  ;;  %1191 = vst.msk [vmem:[#allocation3 + $0xd0] sm:$0xff] %vm1177_vm4, %v1108_v48 }
 0x14e   : > { %1300 = vrot.lane.b32.xlu1 %v6438_v42, %s5778_s20  ;;  %v1088_v18 = vpop.permute.xlu1 %1087 }
 0x14f   : > { %1181 = vst.msk [vmem:[#allocation3 + $0x30] sm:$0xff] %vm1177_vm4, %v1088_v18  ;;  %v2480_v18 = vld [vmem:[#allocation3 + $0x178] sm:$0xff] }
 0x154   : > { %5678 = vmatmul.msk.f32.gmra.mxu1 %vm333_vm1, %v2460_v23  ;;  %v1120_v38 = vpop.permute.xlu2 %1119  ;;  %v1116_v11 = vpop.permute.xlu0 %1115 }
 0x155   : > { %1292 = vrot.lane.b32.xlu0 %v6407_v35, %s5778_s20  ;;  %1314 = vrot.lane.b32.xlu2 %v6527_v5, %s5778_s20  ;;  %1197 = vst.msk [vmem:[#allocation3 + $0x130] sm:$0xff] %vm1177_vm4, %v1120_v38  ;;  %v2462_v35 = vld [vmem:[#allocation3 + $0xe8] sm:$0xff] }
 0x156   : > { %1195 = vst.msk [vmem:[#allocation3 + $0x110] sm:$0xff] %vm1177_vm4, %v1116_v11  ;;  %1306 = vrot.lane.b32.xlu1 %v6465_v58, %s5778_s20  ;;  %v1094_v42 = vpop.permute.xlu1 %1093 }
 0x157   : > { %1184 = vst.msk [vmem:[#allocation3 + $0x60] sm:$0xff] %vm1177_vm4, %v1094_v42 }
 0x15c   : > { %5679 = vmatmul.msk.f32.gmra.mxu1 %vm333_vm1, %v2462_v35  ;;  %v1086_v53 = vpop.permute.xlu0 %1085 }
 0x15d   : > { %1298 = vrot.lane.b32.xlu0 %v6432_v39, %s5778_s20  ;;  %1320 = vrot.lane.b32.xlu2 %v6586_v37, %s5778_s20  ;;  %v2464_v39 = vld [vmem:[#allocation3 + $0xf8] sm:$0xff]  ;;  %1180 = vst.msk [vmem:[#allocation3 + $0x20] sm:$0xff] %vm1177_vm4, %v1086_v53 }
 0x15e   : > { %1312 = vrot.lane.b32.xlu1 %v6563_v12, %s5778_s20  ;;  %v1100_v58 = vpop.permute.xlu1 %1099  ;;  %v2488_v53 = vld [vmem:[#allocation3 + $0x1b8] sm:$0xff] }
 0x15f   : > { %v1126_v5 = vpop.permute.xlu2 %1125  ;;  %1187 = vst.msk [vmem:[#allocation3 + $0x90] sm:$0xff] %vm1177_vm4, %v1100_v58 }
 0x160   : > { %1200 = vst.msk [vmem:[#allocation3 + $0x160] sm:$0xff] %vm1177_vm4, %v1126_v5 }
 0x163   : > { %v6822_v48 = vpop.f32.mrf.mxu1 }
 0x164   : > { %5680 = vmatmul.msk.f32.gmra.mxu1 %vm333_vm1, %v2464_v39  ;;  %v1092_v57 = vpop.permute.xlu0 %1091 }
 0x165   : > { %1304 = vrot.lane.b32.xlu0 %v6453_v46, %s5778_s20  ;;  %1326 = vrot.lane.b32.xlu2 %v6625_v28, %s5778_s20  ;;  %v2466_v46 = vld [vmem:[#allocation3 + $0x108] sm:$0xff]  ;;  %1183 = vst.msk [vmem:[#allocation3 + $0x50] sm:$0xff] %vm1177_vm4, %v1092_v57 }
 0x166   : > { %1318 = vrot.lane.b32.xlu1 %v6595_v59, %s5778_s20  ;;  %v1106_v12 = vpop.permute.xlu1 %1105 }
 0x167   : > { %v1132_v37 = vpop.permute.xlu2 %1131  ;;  %1190 = vst.msk [vmem:[#allocation3 + $0xc0] sm:$0xff] %vm1177_vm4, %v1106_v12 }
 0x168   : > { %1203 = vst.msk [vmem:[#allocation3 + $0x190] sm:$0xff] %vm1177_vm4, %v1132_v37 }
 0x16c   : > { %5681 = vmatmul.msk.f32.gmra.mxu1 %vm333_vm1, %v2466_v46  ;;  %v1098_v24 = vpop.permute.xlu0 %1097  ;;  %v2490_v46 = vld [vmem:[#allocation3 + $0x1c8] sm:$0xff] }
 0x16d   : > { %1310 = vrot.lane.b32.xlu0 %v6515_v49, %s5778_s20  ;;  %1332 = vrot.lane.b32.xlu2 %v6662_v1, %s5778_s20  ;;  %v2468_v49 = vld [vmem:[#allocation3 + $0x118] sm:$0xff]  ;;  %1186 = vst.msk [vmem:[#allocation3 + $0x80] sm:$0xff] %vm1177_vm4, %v1098_v24 }
 0x16e   : > { %1324 = vrot.lane.b32.xlu1 %v6613_v22, %s5778_s20  ;;  %v1112_v59 = vpop.permute.xlu1 %1111 }
 0x16f   : > { %v1138_v28 = vpop.permute.xlu2 %1137  ;;  %1193 = vst.msk [vmem:[#allocation3 + $0xf0] sm:$0xff] %vm1177_vm4, %v1112_v59  ;;  %v6899_v59 = vld [vmem:[#allocation2 + $0x49] sm:$0xff] }
 0x170   : > { %1206 = vst.msk [vmem:[#allocation3 + $0x1c0] sm:$0xff] %vm1177_vm4, %v1138_v28  ;;  %v2492_v28 = vld [vmem:[#allocation3 + $0x1d8] sm:$0xff] }
 0x171   : > { %v6837_v35 = vpop.f32.mrf.mxu1 }
 0x174   : > { %5682 = vmatmul.msk.f32.gmra.mxu1 %vm333_vm1, %v2468_v49  ;;  %v1104_v41 = vpop.permute.xlu0 %1103 }
 0x175   : > { %1316 = vrot.lane.b32.xlu0 %v6557_v62, %s5778_s20  ;;  %1467 = vrot.lane.b32.xlu2 %v6490_v17, %s5777_s19  ;;  %v2470_v62 = vld [vmem:[#allocation3 + $0x128] sm:$0xff]  ;;  %1189 = vst.msk [vmem:[#allocation3 + $0xb0] sm:$0xff] %vm1177_vm4, %v1104_v41  ;;  %v2472_v17 = vld [vmem:[#allocation3 + $0x138] sm:$0xff] }
 0x176   : > { %1330 = vrot.lane.b32.xlu1 %v6648_v8, %s5778_s20  ;;  %v1118_v22 = vpop.permute.xlu1 %1117 }
 0x177   : > { %v1144_v1 = vpop.permute.xlu2 %1143  ;;  %1196 = vst.msk [vmem:[#allocation3 + $0x120] sm:$0xff] %vm1177_vm4, %v1118_v22  ;;  %v1596_v22 = vld [vmem:[#allocation2 + $0x19] sm:$0xff] }
 0x178   : > { %1209 = vst.msk [vmem:[#allocation3 + $0x1f0] sm:$0xff] %vm1177_vm4, %v1144_v1 }
 0x179   : > { %v6851_v5 = vpop.f32.mrf.mxu1 }
 0x17c   : > { %5683 = vmatmul.msk.f32.gmra.mxu1 %vm333_vm1, %v2470_v62  ;;  %v1110_v7 = vpop.permute.xlu0 %1109 }
 0x17d   : > { %1322 = vrot.lane.b32.xlu0 %v6602_v47, %s5778_s20  ;;  %1473 = vrot.lane.b32.xlu2 %v6519_v56, %s5777_s19  ;;  %1192 = vst.msk [vmem:[#allocation3 + $0xe0] sm:$0xff] %vm1177_vm4, %v1110_v7  ;;  %v1434_v7 = vld [vmem:[#allocation2 + $0x188] sm:$0xff] }
 0x17e   : > { %1336 = vrot.lane.b32.xlu1 %v6673_v4, %s5778_s20  ;;  %v1124_v8 = vpop.permute.xlu1 %1123 }
 0x17f   : > { %v1279_v47 = vpop.permute.xlu2 %1278  ;;  %1199 = vst.msk [vmem:[#allocation3 + $0x150] sm:$0xff] %vm1177_vm4, %v1124_v8 }
 0x180   : > { %1373 = vst.msk [vmem:[#allocation3 + $0x20] sm:$0xff] %vm1370_vm5, %v1279_v47 }
 0x184   : > { %5684 = vmatmul.msk.f32.gmra.mxu1 %vm333_vm1, %v2472_v17  ;;  %v1122_v16 = vpop.permute.xlu0 %1121  ;;  %v9456_v17 = vld [vmem:[#allocation38_spill] sm:$0xff] }
 0x185   : > { %1328 = vrot.lane.b32.xlu0 %v6634_v61, %s5778_s20  ;;  %1479 = vrot.lane.b32.xlu2 %v6538_v51, %s5777_s19  ;;  %1198 = vst.msk [vmem:[#allocation3 + $0x140] sm:$0xff] %vm1177_vm4, %v1122_v16 }
 0x186   : > { %1471 = vrot.lane.b32.xlu1 %v6417_v60, %s5777_s19  ;;  %v1130_v4 = vpop.permute.xlu1 %1129 }
 0x187   : > { %v1285_v61 = vpop.permute.xlu2 %1284  ;;  %1202 = vst.msk [vmem:[#allocation3 + $0x180] sm:$0xff] %vm1177_vm4, %v1130_v4  ;;  %v9458_v4 = vld [vmem:[#allocation40_spill] sm:$0xff] }
 0x188   : > { %1376 = vst.msk [vmem:[#allocation3 + $0x50] sm:$0xff] %vm1370_vm5, %v1285_v61 }
 0x18c   : > { %5685 = vmatmul.msk.f32.gmra.mxu1 %vm333_vm1, %v2474_v32  ;;  %v1128_v25 = vpop.permute.xlu0 %1127  ;;  %v9457_v32 = vld [vmem:[#allocation39_spill] sm:$0xff] }
 0x18d   : > { %1334 = vrot.lane.b32.xlu0 %v6666_v2, %s5778_s20  ;;  %1485 = vrot.lane.b32.xlu2 %v6567_v0, %s5777_s19  ;;  %1201 = vst.msk [vmem:[#allocation3 + $0x170] sm:$0xff] %vm1177_vm4, %v1128_v25 }
 0x18e   : > { %1477 = vrot.lane.b32.xlu1 %v6451_v44, %s5777_s19  ;;  %v1136_v60 = vpop.permute.xlu1 %1135 }
 0x18f   : > { %v1291_v2 = vpop.permute.xlu2 %1290  ;;  %1205 = vst.msk [vmem:[#allocation3 + $0x1b0] sm:$0xff] %vm1177_vm4, %v1136_v60  ;;  %v9459_v60 = vld [vmem:[#allocation41_spill] sm:$0xff] }
 0x190   : > { %1379 = vst.msk [vmem:[#allocation3 + $0x80] sm:$0xff] %vm1370_vm5, %v1291_v2  ;;  %v6919_v2 = vld [vmem:[#allocation2 + $0x31] sm:$0xff] }
 0x194   : > { %5686 = vmatmul.msk.f32.gmra.mxu1 %vm333_vm1, %v2476_v9 }
 0x195   : > { %1469 = vrot.lane.b32.xlu0 %v6486_v31, %s5777_s19  ;;  %1491 = vrot.lane.b32.xlu2 %v6576_v55, %s5777_s19 }
 0x196   : > { %1483 = vrot.lane.b32.xlu1 %v6459_v54, %s5777_s19  ;;  %v1142_v44 = vpop.permute.xlu1 %1141 }
 0x197   : > { %v1297_v31 = vpop.permute.xlu2 %1296  ;;  %1208 = vst.msk [vmem:[#allocation3 + $0x1e0] sm:$0xff] %vm1177_vm4, %v1142_v44 }
 0x198   : > { %1382 = vst.msk [vmem:[#allocation3 + $0xb0] sm:$0xff] %vm1370_vm5, %v1297_v31 }
 0x19c   : > { %5687 = vmatmul.msk.f32.gmra.mxu1 %vm333_vm1, %v2478_v40  ;;  %v9460_v40 = vld [vmem:[#allocation42_spill] sm:$0xff] }
 0x19d   : > { %1475 = vrot.lane.b32.xlu0 %v6499_v43, %s5777_s19  ;;  %1497 = vrot.lane.b32.xlu2 %v6480_v14, %s5777_s19 }
 0x19e   : > { %1489 = vrot.lane.b32.xlu1 %v6469_v26, %s5777_s19  ;;  %v2484_v26 = vld [vmem:[#allocation3 + $0x198] sm:$0xff] }
 0x19f   : > { %v1134_v36 = vpop.permute.xlu0 %1133  ;;  %v1303_v23 = vpop.permute.xlu2 %1302 }
 0x1a0   : > { %1204 = vst.msk [vmem:[#allocation3 + $0x1a0] sm:$0xff] %vm1177_vm4, %v1134_v36  ;;  %v1277_v54 = vpop.permute.xlu1 %1276  ;;  %v6930_v36 = vld [vmem:[#allocation2 + $0x51] sm:$0xff] }
 0x1a1   : > { %1385 = vst.msk [vmem:[#allocation3 + $0xe0] sm:$0xff] %vm1370_vm5, %v1303_v23 }
 0x1a2   : > { %1372 = vst.msk [vmem:[#allocation3 + $0x10] sm:$0xff] %vm1370_vm5, %v1277_v54  ;;  %v9462_v54 = vld [vmem:[#allocation44_spill] sm:$0xff] }
 0x1a4   : > { %5688 = vmatmul.msk.f32.gmra.mxu1 %vm333_vm1, %v2480_v18  ;;  %v9461_v18 = vld [vmem:[#allocation43_spill] sm:$0xff] }
 0x1a5   : > { %1481 = vrot.lane.b32.xlu0 %v6525_v63, %s5777_s19  ;;  %1503 = vrot.lane.b32.xlu2 %v6599_v52, %s5777_s19  ;;  %v2482_v63 = vld [vmem:[#allocation3 + $0x188] sm:$0xff] }
 0x1a6   : > { %1495 = vrot.lane.b32.xlu1 %v6412_v34, %s5777_s19 }
 0x1a7   : > { %v1140_v38 = vpop.permute.xlu0 %1139  ;;  %v1309_v14 = vpop.permute.xlu2 %1308 }
 0x1a8   : > { %1207 = vst.msk [vmem:[#allocation3 + $0x1d0] sm:$0xff] %vm1177_vm4, %v1140_v38  ;;  %v1283_v52 = vpop.permute.xlu1 %1282 }
 0x1a9   : > { %1388 = vst.msk [vmem:[#allocation3 + $0x110] sm:$0xff] %vm1370_vm5, %v1309_v14  ;;  %v6941_v14 = vld [vmem:[#allocation2 + $0x79] sm:$0xff] }
 0x1aa   : > { %1375 = vst.msk [vmem:[#allocation3 + $0x40] sm:$0xff] %vm1370_vm5, %v1283_v52  ;;  %v9463_v52 = vld [vmem:[#allocation45_spill] sm:$0xff] }
 0x1ac   : > { %5689 = vmatmul.msk.f32.gmra.mxu1 %vm333_vm1, %v2482_v63 }
 0x1ad   : > { %1487 = vrot.lane.b32.xlu0 %v6546_v27, %s5777_s19  ;;  %1509 = vrot.lane.b32.xlu2 %v6652_v3, %s5777_s19  ;;  %v2486_v3 = vld [vmem:[#allocation3 + $0x1a8] sm:$0xff] }
 0x1ae   : > { %1501 = vrot.lane.b32.xlu1 %v6513_v50, %s5777_s19  ;;  %v6865_v50 = vpop.f32.mrf.mxu1 }
 0x1af   : > { %v1275_v11 = vpop.permute.xlu0 %1274  ;;  %v1315_v27 = vpop.permute.xlu2 %1314 }
 0x1b0   : > { %1371 = vst.msk [vmem:[#allocation3] sm:$0xff] %vm1370_vm5, %v1275_v11  ;;  %v1289_v34 = vpop.permute.xlu1 %1288 }
 0x1b1   : > { %1391 = vst.msk [vmem:[#allocation3 + $0x140] sm:$0xff] %vm1370_vm5, %v1315_v27 }
 0x1b2   : > { %1378 = vst.msk [vmem:[#allocation3 + $0x70] sm:$0xff] %vm1370_vm5, %v1289_v34 }
 0x1b4   : > { %5690 = vmatmul.msk.f32.gmra.mxu1 %vm333_vm1, %v2484_v26  ;;  %v9464_v26 = vld [vmem:[#allocation46_spill] sm:$0xff] }
 0x1b5   : > { %1493 = vrot.lane.b32.xlu0 %v6571_v21, %s5777_s19  ;;  %1515 = vrot.lane.b32.xlu2 %v6621_v30, %s5777_s19 }
 0x1b6   : > { %1507 = vrot.lane.b32.xlu1 %v6505_v13, %s5777_s19  ;;  %v1433_v13 = vld [vmem:[#allocation2 + $0x180] sm:$0xff] }
 0x1b7   : > { %v1281_v42 = vpop.permute.xlu0 %1280  ;;  %v1321_v21 = vpop.permute.xlu2 %1320 }
 0x1b8   : > { %1374 = vst.msk [vmem:[#allocation3 + $0x30] sm:$0xff] %vm1370_vm5, %v1281_v42  ;;  %v1295_v30 = vpop.permute.xlu1 %1294  ;;  %v6952_v42 = vld [vmem:[#allocation2 + $0x99] sm:$0xff] }
 0x1b9   : > { %1394 = vst.msk [vmem:[#allocation3 + $0x170] sm:$0xff] %vm1370_vm5, %v1321_v21 }
 0x1ba   : > { %1381 = vst.msk [vmem:[#allocation3 + $0xa0] sm:$0xff] %vm1370_vm5, %v1295_v30  ;;  %v9465_v30 = vld [vmem:[#allocation48_spill] sm:$0xff] }
 0x1bc   : > { %5691 = vmatmul.msk.f32.gmra.mxu1 %vm333_vm1, %v2486_v3  ;;  %v6959_v3 = vld [vmem:[#allocation2 + $0xc9] sm:$0xff] }
 0x1bd   : > { %1499 = vrot.lane.b32.xlu0 %v6582_v10, %s5777_s19  ;;  %1521 = vrot.lane.b32.xlu2 %v6658_v33, %s5777_s19  ;;  %v6879_v33 = vpop.f32.mrf.mxu1 }
 0x1be   : > { %1513 = vrot.lane.b32.xlu1 %v6542_v20, %s5777_s19  ;;  %v1597_v20 = vld [vmem:[#allocation2 + $0x21] sm:$0xff] }
 0x1bf   : > { %v1287_v39 = vpop.permute.xlu0 %1286  ;;  %v1327_v10 = vpop.permute.xlu2 %1326 }
 0x1c0   : > { %1377 = vst.msk [vmem:[#allocation3 + $0x60] sm:$0xff] %vm1370_vm5, %v1287_v39  ;;  %v1301_v37 = vpop.permute.xlu1 %1300 }
 0x1c1   : > { %1397 = vst.msk [vmem:[#allocation3 + $0x1a0] sm:$0xff] %vm1370_vm5, %v1327_v10  ;;  %v6965_v10 = vld [vmem:[#allocation2 + $0xc1] sm:$0xff] }
 0x1c2   : > { %1384 = vst.msk [vmem:[#allocation3 + $0xd0] sm:$0xff] %vm1370_vm5, %v1301_v37 }
 0x1c4   : > { %5692 = vmatmul.msk.f32.gmra.mxu1 %vm333_vm1, %v2488_v53 }
 0x1c5   : > { %1505 = vrot.lane.b32.xlu0 %v6643_v15, %s5777_s19  ;;  %1527 = vrot.lane.b32.xlu2 %v1433_v13, %s5777_s19  ;;  %v6893_v49 = vpop.f32.mrf.mxu1  ;;  %v6972_v13 = vld [vmem:[#allocation2 + $0xf1] sm:$0xff] }
 0x1c6   : > { %1519 = vrot.lane.b32.xlu1 %v6550_v45, %s5777_s19  ;;  %v9454_v45 = vld [vmem:[#allocation47_spill] sm:$0xff] }
 0x1c7   : > { %v1293_v58 = vpop.permute.xlu0 %1292  ;;  %v1333_v15 = vpop.permute.xlu2 %1332 }
 0x1c8   : > { %1380 = vst.msk [vmem:[#allocation3 + $0x90] sm:$0xff] %vm1370_vm5, %v1293_v58  ;;  %v1307_v12 = vpop.permute.xlu1 %1306 }
 0x1c9   : > { %1400 = vst.msk [vmem:[#allocation3 + $0x1d0] sm:$0xff] %vm1370_vm5, %v1333_v15  ;;  %v9466_v15 = vld [vmem:[#allocation50_spill] sm:$0xff] }
 0x1ca   : > { %1387 = vst.msk [vmem:[#allocation3 + $0x100] sm:$0xff] %vm1370_vm5, %v1307_v12  ;;  %v6985_v12 = vld [vmem:[#allocation2 + $0x111] sm:$0xff] }
 0x1cc   : > { %5693 = vmatmul.msk.f32.gmra.mxu1 %vm333_vm1, %v2490_v46  ;;  %v6978_v46 = vld [vmem:[#allocation2 + $0xe1] sm:$0xff] }
 0x1cd   : > { %1511 = vrot.lane.b32.xlu0 %v6610_v19, %s5777_s19  ;;  %1662 = vrot.lane.b32.xlu2 %v1597_v20, %s5776_s18 }
 0x1ce   : > { %1525 = vrot.lane.b32.xlu1 %v9454_v45, %s5777_s19 }
 0x1cf   : > { %v1299_v57 = vpop.permute.xlu0 %1298  ;;  %v1468_v19 = vpop.permute.xlu2 %1467 }
 0x1d0   : > { %1383 = vst.msk [vmem:[#allocation3 + $0xc0] sm:$0xff] %vm1370_vm5, %v1299_v57  ;;  %v1313_v1 = vpop.permute.xlu1 %1312 }
 0x1d1   : > { %1564 = vst.msk [vmem:[#allocation3] sm:$0xff] %vm1563_vm6, %v1468_v19 }
 0x1d2   : > { %1390 = vst.msk [vmem:[#allocation3 + $0x130] sm:$0xff] %vm1370_vm5, %v1313_v1  ;;  %v6998_v1 = vld [vmem:[#allocation2 + $0x139] sm:$0xff] }
 0x1d4   : > { %5694 = vmatmul.msk.f32.gmra.mxu1 %vm333_vm1, %v2492_v28  ;;  %v6991_v28 = vld [vmem:[#allocation2 + $0x109] sm:$0xff] }
 0x1d5   : > { %1517 = vrot.lane.b32.xlu0 %v6668_v6, %s5777_s19  ;;  %1668 = vrot.lane.b32.xlu2 %v6899_v59, %s5776_s18  ;;  %v9455_v6 = vld [vmem:[#allocation49_spill] sm:$0xff] }
 0x1d6   : > { %1660 = vrot.lane.b32.xlu1 %v1596_v22, %s5776_s18 }
 0x1d7   : > { %v1305_v24 = vpop.permute.xlu0 %1304  ;;  %v1474_v62 = vpop.permute.xlu2 %1473 }
 0x1d8   : > { %1386 = vst.msk [vmem:[#allocation3 + $0xf0] sm:$0xff] %vm1370_vm5, %v1305_v24  ;;  %v1319_v47 = vpop.permute.xlu1 %1318 }
 0x1d9   : > { %1567 = vst.msk [vmem:[#allocation3 + $0x30] sm:$0xff] %vm1563_vm6, %v1474_v62  ;;  %v7003_v62 = vld [vmem:[#allocation2 + $0x129] sm:$0xff] }
 0x1da   : > { %1393 = vst.msk [vmem:[#allocation3 + $0x160] sm:$0xff] %vm1370_vm5, %v1319_v47  ;;  %v7010_v47 = vld [vmem:[#allocation2 + $0x159] sm:$0xff] }
 0x1dd   : > { %1523 = vrot.lane.b32.xlu0 %v9455_v6, %s5777_s19  ;;  %1674 = vrot.lane.b32.xlu2 %v9456_v17, %s5776_s18  ;;  %v1627_v6 = vld [vmem:[#allocation2 + $0x189] sm:$0xff]  ;;  %v1791_v17 = vld [vmem:[#allocation2 + $0x32] sm:$0xff] }
 0x1de   : > { %1666 = vrot.lane.b32.xlu1 %v9457_v32, %s5776_s18 }
 0x1df   : > { %v1311_v41 = vpop.permute.xlu0 %1310  ;;  %v1480_v8 = vpop.permute.xlu2 %1479 }
 0x1e0   : > { %1389 = vst.msk [vmem:[#allocation3 + $0x120] sm:$0xff] %vm1370_vm5, %v1311_v41  ;;  %v1325_v16 = vpop.permute.xlu1 %1324 }
 0x1e1   : > { %1570 = vst.msk [vmem:[#allocation3 + $0x60] sm:$0xff] %vm1563_vm6, %v1480_v8  ;;  %v7015_v8 = vld [vmem:[#allocation2 + $0x151] sm:$0xff] }
 0x1e2   : > { %1396 = vst.msk [vmem:[#allocation3 + $0x190] sm:$0xff] %vm1370_vm5, %v1325_v16  ;;  %v1626_v16 = vld [vmem:[#allocation2 + $0x181] sm:$0xff] }
 0x1e5   : > { %1529 = vrot.lane.b32.xlu0 %v1434_v7, %s5777_s19  ;;  %1680 = vrot.lane.b32.xlu2 %v9458_v4, %s5776_s18  ;;  %v1794_v4 = vld [vmem:[#allocation2 + $0x52] sm:$0xff] }
 0x1e6   : > { %1672 = vrot.lane.b32.xlu1 %v9459_v60, %s5776_s18 }
 0x1e7   : > { %v1317_v61 = vpop.permute.xlu0 %1316  ;;  %v1486_v9 = vpop.permute.xlu2 %1485 }
 0x1e8   : > { %1392 = vst.msk [vmem:[#allocation3 + $0x150] sm:$0xff] %vm1370_vm5, %v1317_v61  ;;  %v1331_v31 = vpop.permute.xlu1 %1330 }
 0x1e9   : > { %1573 = vst.msk [vmem:[#allocation3 + $0x90] sm:$0xff] %vm1563_vm6, %v1486_v9 }
 0x1ea   : > { %1399 = vst.msk [vmem:[#allocation3 + $0x1c0] sm:$0xff] %vm1370_vm5, %v1331_v31 }
 0x1ed   : > { %1664 = vrot.lane.b32.xlu0 %v6919_v2, %s5776_s18  ;;  %1686 = vrot.lane.b32.xlu2 %v9460_v40, %s5776_s18  ;;  %v1790_v40 = vld [vmem:[#allocation2 + $0x22] sm:$0xff] }
 0x1ee   : > { %1678 = vrot.lane.b32.xlu1 %v9461_v18, %s5776_s18  ;;  %v1789_v18 = vld [vmem:[#allocation2 + $0x1a] sm:$0xff] }
 0x1ef   : > { %v1323_v25 = vpop.permute.xlu0 %1322  ;;  %v1492_v44 = vpop.permute.xlu2 %1491 }
 0x1f0   : > { %1395 = vst.msk [vmem:[#allocation3 + $0x180] sm:$0xff] %vm1370_vm5, %v1323_v25  ;;  %v1337_v38 = vpop.permute.xlu1 %1336  ;;  %v1625_v25 = vld [vmem:[#allocation2 + $0x171] sm:$0xff] }
 0x1f1   : > { %1576 = vst.msk [vmem:[#allocation3 + $0xc0] sm:$0xff] %vm1563_vm6, %v1492_v44  ;;  %v1797_v44 = vld [vmem:[#allocation2 + $0x7a] sm:$0xff] }
 0x1f2   : > { %1402 = vst.msk [vmem:[#allocation3 + $0x1f0] sm:$0xff] %vm1370_vm5, %v1337_v38 }
 0x1f5   : > { %1670 = vrot.lane.b32.xlu0 %v6930_v36, %s5776_s18  ;;  %1692 = vrot.lane.b32.xlu2 %v9462_v54, %s5776_s18 }
 0x1f6   : > { %1684 = vrot.lane.b32.xlu1 %v9463_v52, %s5776_s18 }
 0x1f7   : > { %v1329_v23 = vpop.permute.xlu0 %1328  ;;  %v1498_v63 = vpop.permute.xlu2 %1497 }
 0x1f8   : > { %1398 = vst.msk [vmem:[#allocation3 + $0x1b0] sm:$0xff] %vm1370_vm5, %v1329_v23  ;;  %v1472_v27 = vpop.permute.xlu1 %1471 }
 0x1f9   : > { %1579 = vst.msk [vmem:[#allocation3 + $0xf0] sm:$0xff] %vm1563_vm6, %v1498_v63  ;;  %v1793_v63 = vld [vmem:[#allocation2 + $0x4a] sm:$0xff] }
 0x1fa   : > { %1566 = vst.msk [vmem:[#allocation3 + $0x20] sm:$0xff] %vm1563_vm6, %v1472_v27  ;;  %v1792_v27 = vld [vmem:[#allocation2 + $0x3a] sm:$0xff] }
 0x1fd   : > { %1676 = vrot.lane.b32.xlu0 %v6941_v14, %s5776_s18  ;;  %1698 = vrot.lane.b32.xlu2 %v9464_v26, %s5776_s18 }
 0x1fe   : > { %1690 = vrot.lane.b32.xlu1 %v6959_v3, %s5776_s18 }
 0x1ff   : > { %v1335_v11 = vpop.permute.xlu0 %1334  ;;  %v1504_v34 = vpop.permute.xlu2 %1503 }
 0x200   : > { %1401 = vst.msk [vmem:[#allocation3 + $0x1e0] sm:$0xff] %vm1370_vm5, %v1335_v11  ;;  %v1478_v39 = vpop.permute.xlu1 %1477  ;;  %v1800_v11 = vld [vmem:[#allocation2 + $0x9a] sm:$0xff] }
 0x201   : > { %1582 = vst.msk [vmem:[#allocation3 + $0x120] sm:$0xff] %vm1563_vm6, %v1504_v34 }
 0x202   : > { %1569 = vst.msk [vmem:[#allocation3 + $0x50] sm:$0xff] %vm1563_vm6, %v1478_v39 }
 0x205   : > { %1682 = vrot.lane.b32.xlu0 %v6952_v42, %s5776_s18  ;;  %1704 = vrot.lane.b32.xlu2 %v9465_v30, %s5776_s18  ;;  %v1795_v30 = vld [vmem:[#allocation2 + $0x62] sm:$0xff] }
 0x206   : > { %1696 = vrot.lane.b32.xlu1 %v6972_v13, %s5776_s18 }
 0x207   : > { %v1470_v21 = vpop.permute.xlu0 %1469  ;;  %v1510_v53 = vpop.permute.xlu2 %1509 }
 0x208   : > { %1565 = vst.msk [vmem:[#allocation3 + $0x10] sm:$0xff] %vm1563_vm6, %v1470_v21  ;;  %v1484_v37 = vpop.permute.xlu1 %1483  ;;  %v1796_v21 = vld [vmem:[#allocation2 + $0x6a] sm:$0xff] }
 0x209   : > { %1585 = vst.msk [vmem:[#allocation3 + $0x150] sm:$0xff] %vm1563_vm6, %v1510_v53 }
 0x20a   : > { %1572 = vst.msk [vmem:[#allocation3 + $0x80] sm:$0xff] %vm1563_vm6, %v1484_v37  ;;  %v1799_v37 = vld [vmem:[#allocation2 + $0x92] sm:$0xff] }
 0x20d   : > { %1688 = vrot.lane.b32.xlu0 %v6965_v10, %s5776_s18  ;;  %1710 = vrot.lane.b32.xlu2 %v9466_v15, %s5776_s18 }
 0x20e   : > { %1702 = vrot.lane.b32.xlu1 %v6985_v12, %s5776_s18 }
 0x20f   : > { %v1476_v58 = vpop.permute.xlu0 %1475  ;;  %v1516_v57 = vpop.permute.xlu2 %1515 }
 0x210   : > { %1568 = vst.msk [vmem:[#allocation3 + $0x40] sm:$0xff] %vm1563_vm6, %v1476_v58  ;;  %v1490_v19 = vpop.permute.xlu1 %1489 }
 0x211   : > { %1588 = vst.msk [vmem:[#allocation3 + $0x180] sm:$0xff] %vm1563_vm6, %v1516_v57  ;;  %v1798_v57 = vld [vmem:[#allocation2 + $0x82] sm:$0xff] }
 0x212   : > { %1575 = vst.msk [vmem:[#allocation3 + $0xb0] sm:$0xff] %vm1563_vm6, %v1490_v19  ;;  %v1986_v19 = vld [vmem:[#allocation2 + $0x50] sm:$0xff] }
 0x215   : > { %1694 = vrot.lane.b32.xlu0 %v6978_v46, %s5776_s18  ;;  %1716 = vrot.lane.b32.xlu2 %v6687_v29, %s5776_s18 }
 0x216   : > { %1708 = vrot.lane.b32.xlu1 %v6998_v1, %s5776_s18 }
 0x217   : > { %v1482_v20 = vpop.permute.xlu0 %1481  ;;  %v1522_v24 = vpop.permute.xlu2 %1521 }
 0x218   : > { %1571 = vst.msk [vmem:[#allocation3 + $0x70] sm:$0xff] %vm1563_vm6, %v1482_v20  ;;  %v1496_v29 = vpop.permute.xlu1 %1495 }
 0x219   : > { %1591 = vst.msk [vmem:[#allocation3 + $0x1b0] sm:$0xff] %vm1563_vm6, %v1522_v24 }
 0x21a   : > { %1578 = vst.msk [vmem:[#allocation3 + $0xe0] sm:$0xff] %vm1563_vm6, %v1496_v29  ;;  %v1801_v29 = vld [vmem:[#allocation2 + $0xaa] sm:$0xff] }
 0x21d   : > { %1700 = vrot.lane.b32.xlu0 %v6991_v28, %s5776_s18  ;;  %1722 = vrot.lane.b32.xlu2 %v1627_v6, %s5776_s18 }
 0x21e   : > { %1714 = vrot.lane.b32.xlu1 %v7010_v47, %s5776_s18 }
 0x21f   : > { %v1488_v45 = vpop.permute.xlu0 %1487  ;;  %v1528_v41 = vpop.permute.xlu2 %1527 }
 0x220   : > { %1574 = vst.msk [vmem:[#allocation3 + $0xa0] sm:$0xff] %vm1563_vm6, %v1488_v45  ;;  %v1502_v7 = vpop.permute.xlu1 %1501  ;;  %v1983_v45 = vld [vmem:[#allocation2 + $0x30] sm:$0xff] }
 0x221   : > { %1594 = vst.msk [vmem:[#allocation3 + $0x1e0] sm:$0xff] %vm1563_vm6, %v1528_v41  ;;  %v2180_v41 = vld [vmem:[#allocation2 + $0x61] sm:$0xff] }
 0x222   : > { %1581 = vst.msk [vmem:[#allocation3 + $0x110] sm:$0xff] %vm1563_vm6, %v1502_v7 }
 0x225   : > { %1706 = vrot.lane.b32.xlu0 %v7003_v62, %s5776_s18  ;;  %1857 = vrot.lane.b32.xlu2 %v1791_v17, %s5775_s17 }
 0x226   : > { %1720 = vrot.lane.b32.xlu1 %v1626_v16, %s5776_s18 }
 0x227   : > { %v1494_v22 = vpop.permute.xlu0 %1493  ;;  %v1663_v61 = vpop.permute.xlu2 %1662 }
 0x228   : > { %1577 = vst.msk [vmem:[#allocation3 + $0xd0] sm:$0xff] %vm1563_vm6, %v1494_v22  ;;  %v1508_v9 = vpop.permute.xlu1 %1507  ;;  %v2177_v22 = vld [vmem:[#allocation2 + $0x39] sm:$0xff] }
 0x229   : > { %1758 = vst.msk [vmem:[#allocation3 + $0x10] sm:$0xff] %vm1756_vm7, %v1663_v61  ;;  %v1802_v61 = vld [vmem:[#allocation2 + $0xb2] sm:$0xff] }
 0x22a   : > { %1584 = vst.msk [vmem:[#allocation3 + $0x140] sm:$0xff] %vm1563_vm6, %v1508_v9 }
 0x22d   : > { %1712 = vrot.lane.b32.xlu0 %v7015_v8, %s5776_s18  ;;  %1863 = vrot.lane.b32.xlu2 %v1794_v4, %s5775_s17 }
 0x22e   : > { %1855 = vrot.lane.b32.xlu1 %v1790_v40, %s5775_s17  ;;  %v1805_v40 = vld [vmem:[#allocation2 + $0xda] sm:$0xff] }
 0x22f   : > { %v1500_v32 = vpop.permute.xlu0 %1499  ;;  %v1669_v60 = vpop.permute.xlu2 %1668 }
 0x230   : > { %1580 = vst.msk [vmem:[#allocation3 + $0x100] sm:$0xff] %vm1563_vm6, %v1500_v32  ;;  %v1514_v23 = vpop.permute.xlu1 %1513  ;;  %v2181_v32 = vld [vmem:[#allocation2 + $0x69] sm:$0xff] }
 0x231   : > { %1761 = vst.msk [vmem:[#allocation3 + $0x40] sm:$0xff] %vm1756_vm7, %v1669_v60 }
 0x232   : > { %1587 = vst.msk [vmem:[#allocation3 + $0x170] sm:$0xff] %vm1563_vm6, %v1514_v23  ;;  %v1989_v23 = vld [vmem:[#allocation2 + $0x78] sm:$0xff] }
 0x235   : > { %1718 = vrot.lane.b32.xlu0 %v1625_v25, %s5776_s18  ;;  %1869 = vrot.lane.b32.xlu2 %v1797_v44, %s5775_s17  ;;  %v1803_v44 = vld [vmem:[#allocation2 + $0xc2] sm:$0xff] }
 0x236   : > { %1861 = vrot.lane.b32.xlu1 %v1793_v63, %s5775_s17 }
 0x237   : > { %v1506_v31 = vpop.permute.xlu0 %1505  ;;  %v1675_v38 = vpop.permute.xlu2 %1674 }
 0x238   : > { %1583 = vst.msk [vmem:[#allocation3 + $0x130] sm:$0xff] %vm1563_vm6, %v1506_v31  ;;  %v1520_v52 = vpop.permute.xlu1 %1519  ;;  %v1988_v31 = vld [vmem:[#allocation2 + $0x68] sm:$0xff] }
 0x239   : > { %1764 = vst.msk [vmem:[#allocation3 + $0x70] sm:$0xff] %vm1756_vm7, %v1675_v38 }
 0x23a   : > { %1590 = vst.msk [vmem:[#allocation3 + $0x1a0] sm:$0xff] %vm1563_vm6, %v1520_v52  ;;  %v2183_v52 = vld [vmem:[#allocation2 + $0x81] sm:$0xff] }
 0x23d   : > { %1853 = vrot.lane.b32.xlu0 %v1789_v18, %s5775_s17  ;;  %1875 = vrot.lane.b32.xlu2 %v1800_v11, %s5775_s17  ;;  %v1806_v18 = vld [vmem:[#allocation2 + $0xe2] sm:$0xff] }
 0x23e   : > { %1867 = vrot.lane.b32.xlu1 %v1796_v21, %s5775_s17  ;;  %v2184_v21 = vld [vmem:[#allocation2 + $0x91] sm:$0xff] }
 0x23f   : > { %v1512_v54 = vpop.permute.xlu0 %1511  ;;  %v1681_v26 = vpop.permute.xlu2 %1680 }
 0x240   : > { %1586 = vst.msk [vmem:[#allocation3 + $0x160] sm:$0xff] %vm1563_vm6, %v1512_v54  ;;  %v1526_v39 = vpop.permute.xlu1 %1525  ;;  %v1804_v54 = vld [vmem:[#allocation2 + $0xca] sm:$0xff] }
 0x241   : > { %1767 = vst.msk [vmem:[#allocation3 + $0xa0] sm:$0xff] %vm1756_vm7, %v1681_v26 }
 0x242   : > { %1593 = vst.msk [vmem:[#allocation3 + $0x1d0] sm:$0xff] %vm1563_vm6, %v1526_v39  ;;  %v1994_v39 = vld [vmem:[#allocation2 + $0xb0] sm:$0xff] }
 0x245   : > { %1859 = vrot.lane.b32.xlu0 %v1792_v27, %s5775_s17  ;;  %2049 = vrot.lane.b32.xlu2 %v6519_v56, %s5773_s15 }
 0x246   : > { %1873 = vrot.lane.b32.xlu1 %v1799_v37, %s5775_s17  ;;  %v2511_v37 = vld [vmem:[%s9349_s1 + $0x70] sm:$0xff] }
 0x247   : > { %v1518_v34 = vpop.permute.xlu0 %1517  ;;  %v1687_v53 = vpop.permute.xlu2 %1686 }
 0x248   : > { %1589 = vst.msk [vmem:[#allocation3 + $0x190] sm:$0xff] %vm1563_vm6, %v1518_v34  ;;  %v1661_v15 = vpop.permute.xlu1 %1660 }
 0x249   : > { %1770 = vst.msk [vmem:[#allocation3 + $0xd0] sm:$0xff] %vm1756_vm7, %v1687_v53  ;;  %v1991_v53 = vld [vmem:[#allocation2 + $0x90] sm:$0xff] }
 0x24a   : > { %1757 = vst.msk [vmem:[#allocation3] sm:$0xff] %vm1756_vm7, %v1661_v15  ;;  %v1995_v15 = vld [vmem:[#allocation2 + $0xc0] sm:$0xff] }
 0x24d   : > { %1865 = vrot.lane.b32.xlu0 %v1795_v30, %s5775_s17  ;;  %2051 = vrot.lane.b32.xlu2 %v6499_v43, %s5773_s15 }
 0x24e   : > { %2240 = vrot.lane.b32.xlu1 %v6919_v2, %s5774_s16 }
 0x24f   : > { %v1524_v58 = vpop.permute.xlu0 %1523  ;;  %v1693_v56 = vpop.permute.xlu2 %1692 }
 0x250   : > { %1592 = vst.msk [vmem:[#allocation3 + $0x1c0] sm:$0xff] %vm1563_vm6, %v1524_v58  ;;  %v1667_v24 = vpop.permute.xlu1 %1666  ;;  %v2512_v58 = vld [vmem:[%s9349_s1 + $0x78] sm:$0xff] }
 0x251   : > { %1773 = vst.msk [vmem:[#allocation3 + $0x100] sm:$0xff] %vm1756_vm7, %v1693_v56  ;;  %2615 = vmatpush.msra.mxu0 %v2512_v58  ;;  %v1992_v56 = vld [vmem:[#allocation2 + $0x98] sm:$0xff] }
 0x252   : > { %1760 = vst.msk [vmem:[#allocation3 + $0x30] sm:$0xff] %vm1756_vm7, %v1667_v24  ;;  %v1807_v24 = vld [vmem:[#allocation2 + $0xf2] sm:$0xff] }
 0x253   : > { %2616 = vmatpush.msra.mxu0 %v2511_v37 }
 0x255   : > { %1871 = vrot.lane.b32.xlu0 %v1798_v57, %s5775_s17  ;;  %2053 = vrot.lane.b32.xlu2 %v1986_v19, %s5773_s15 }
 0x256   : > { %1877 = vrot.lane.b32.xlu1 %v1801_v29, %s5775_s17 }
 0x257   : > { %v1530_v20 = vpop.permute.xlu0 %1529  ;;  %v1699_v43 = vpop.permute.xlu2 %1698 }
 0x258   : > { %1595 = vst.msk [vmem:[#allocation3 + $0x1f0] sm:$0xff] %vm1563_vm6, %v1530_v20  ;;  %v1673_v2 = vpop.permute.xlu1 %1672 }
 0x259   : > { %1776 = vst.msk [vmem:[#allocation3 + $0x130] sm:$0xff] %vm1756_vm7, %v1699_v43  ;;  %v2508_v43 = vld [vmem:[%s9349_s1 + $0x58] sm:$0xff] }
 0x25a   : > { %1763 = vst.msk [vmem:[#allocation3 + $0x60] sm:$0xff] %vm1756_vm7, %v1673_v2 }
 0x25d   : > { %2047 = vrot.lane.b32.xlu0 %v1983_v45, %s5773_s15  ;;  %2248 = vrot.lane.b32.xlu2 %v2180_v41, %s5774_s16  ;;  %v2509_v45 = vld [vmem:[%s9349_s1 + $0x60] sm:$0xff]  ;;  %v2186_v41 = vld [vmem:[#allocation2 + $0xa9] sm:$0xff] }
 0x25e   : > { %1879 = vrot.lane.b32.xlu1 %v1802_v61, %s5775_s17  ;;  %v2504_v61 = vld [vmem:[%s9349_s1 + $0x38] sm:$0xff] }
 0x25f   : > { %v1665_v6 = vpop.permute.xlu0 %1664  ;;  %v1705_v17 = vpop.permute.xlu2 %1704 }
 0x260   : > { %1759 = vst.msk [vmem:[#allocation3 + $0x20] sm:$0xff] %vm1756_vm7, %v1665_v6  ;;  %v1679_v16 = vpop.permute.xlu1 %1678  ;;  %v2507_v6 = vld [vmem:[%s9349_s1 + $0x50] sm:$0xff] }
 0x261   : > { %1779 = vst.msk [vmem:[#allocation3 + $0x160] sm:$0xff] %vm1756_vm7, %v1705_v17 }
 0x262   : > { %1766 = vst.msk [vmem:[#allocation3 + $0x90] sm:$0xff] %vm1756_vm7, %v1679_v16  ;;  %v2503_v16 = vld [vmem:[%s9349_s1 + $0x30] sm:$0xff] }
 0x265   : > { %2242 = vrot.lane.b32.xlu0 %v2177_v22, %s5774_s16  ;;  %2250 = vrot.lane.b32.xlu2 %v2181_v32, %s5774_s16  ;;  %v2506_v22 = vld [vmem:[%s9349_s1 + $0x48] sm:$0xff]  ;;  %v2190_v32 = vld [vmem:[#allocation2 + $0xd9] sm:$0xff] }
 0x266   : > { %2055 = vrot.lane.b32.xlu1 %v6538_v51, %s5773_s15 }
 0x267   : > { %v1671_v7 = vpop.permute.xlu0 %1670  ;;  %v1711_v4 = vpop.permute.xlu2 %1710 }
 0x268   : > { %1762 = vst.msk [vmem:[#allocation3 + $0x50] sm:$0xff] %vm1756_vm7, %v1671_v7  ;;  %v1685_v25 = vpop.permute.xlu1 %1684  ;;  %v1808_v7 = vld [vmem:[#allocation2 + $0xfa] sm:$0xff] }
 0x269   : > { %1782 = vst.msk [vmem:[#allocation3 + $0x190] sm:$0xff] %vm1756_vm7, %v1711_v4 }
 0x26a   : > { %1769 = vst.msk [vmem:[#allocation3 + $0xc0] sm:$0xff] %vm1756_vm7, %v1685_v25 }
 0x26d   : > { %2244 = vrot.lane.b32.xlu0 %v6899_v59, %s5774_s16  ;;  %2252 = vrot.lane.b32.xlu2 %v6941_v14, %s5774_s16 }
 0x26e   : > { %2057 = vrot.lane.b32.xlu1 %v1988_v31, %s5773_s15  ;;  %v1996_v31 = vld [vmem:[#allocation2 + $0xc8] sm:$0xff] }
 0x26f   : > { %v1677_v9 = vpop.permute.xlu0 %1676  ;;  %v1717_v60 = vpop.permute.xlu2 %1716 }
 0x270   : > { %1765 = vst.msk [vmem:[#allocation3 + $0x80] sm:$0xff] %vm1756_vm7, %v1677_v9  ;;  %v1691_v51 = vpop.permute.xlu1 %1690  ;;  %v2187_v9 = vld [vmem:[#allocation2 + $0xb1] sm:$0xff] }
 0x271   : > { %1785 = vst.msk [vmem:[#allocation3 + $0x1c0] sm:$0xff] %vm1756_vm7, %v1717_v60  ;;  %v2502_v60 = vld [vmem:[%s9349_s1 + $0x28] sm:$0xff] }
 0x272   : > { %1772 = vst.msk [vmem:[#allocation3 + $0xf0] sm:$0xff] %vm1756_vm7, %v1691_v51  ;;  %v2500_v51 = vld [vmem:[%s9349_s1 + $0x18] sm:$0xff] }
 0x275   : > { %2246 = vrot.lane.b32.xlu0 %v6930_v36, %s5774_s16  ;;  %1885 = vrot.lane.b32.xlu2 %v1805_v40, %s5775_s17  ;;  %v2501_v40 = vld [vmem:[%s9349_s1 + $0x20] sm:$0xff] }
 0x276   : > { %2059 = vrot.lane.b32.xlu1 %v1989_v23, %s5773_s15  ;;  %v2498_v23 = vld [vmem:[%s9349_s1 + $0x8] sm:$0xff] }
 0x277   : > { %v1683_v59 = vpop.permute.xlu0 %1682  ;;  %v1723_v14 = vpop.permute.xlu2 %1722 }
 0x278   : > { %1768 = vst.msk [vmem:[#allocation3 + $0xb0] sm:$0xff] %vm1756_vm7, %v1683_v59  ;;  %v1697_v38 = vpop.permute.xlu1 %1696 }
 0x279   : > { %1788 = vst.msk [vmem:[#allocation3 + $0x1f0] sm:$0xff] %vm1756_vm7, %v1723_v14 }
 0x27a   : > { %1775 = vst.msk [vmem:[#allocation3 + $0x120] sm:$0xff] %vm1756_vm7, %v1697_v38  ;;  %v1997_v38 = vld [vmem:[#allocation2 + $0xd8] sm:$0xff] }
 0x27d   : > { %1881 = vrot.lane.b32.xlu0 %v1803_v44, %s5775_s17  ;;  %1887 = vrot.lane.b32.xlu2 %v1806_v18, %s5775_s17  ;;  %v2499_v44 = vld [vmem:[%s9349_s1 + $0x10] sm:$0xff] }
 0x27e   : > { %2254 = vrot.lane.b32.xlu1 %v2183_v52, %s5774_s16 }
 0x27f   : > { %v1689_v36 = vpop.permute.xlu0 %1688  ;;  %v1858_v63 = vpop.permute.xlu2 %1857 }
 0x280   : > { %1771 = vst.msk [vmem:[#allocation3 + $0xe0] sm:$0xff] %vm1756_vm7, %v1689_v36  ;;  %v1703_v27 = vpop.permute.xlu1 %1702 }
 0x281   : > { %1952 = vst.msk [vmem:[#allocation3 + $0x20] sm:$0xff] %vm1949_vm8, %v1858_v63  ;;  %v1809_v63 = vld [vmem:[#allocation2 + $0x10a] sm:$0xff] }
 0x282   : > { %1778 = vst.msk [vmem:[#allocation3 + $0x150] sm:$0xff] %vm1756_vm7, %v1703_v27  ;;  %v1998_v27 = vld [vmem:[#allocation2 + $0xe0] sm:$0xff] }
 0x285   : > { %1883 = vrot.lane.b32.xlu0 %v1804_v54, %s5775_s17  ;;  %2067 = vrot.lane.b32.xlu2 %v6576_v55, %s5773_s15 }
 0x286   : > { %2256 = vrot.lane.b32.xlu1 %v2184_v21, %s5774_s16  ;;  %v1810_v21 = vld [vmem:[#allocation2 + $0x112] sm:$0xff] }
 0x287   : > { %v1695_v11 = vpop.permute.xlu0 %1694  ;;  %v1864_v26 = vpop.permute.xlu2 %1863 }
 0x288   : > { %1774 = vst.msk [vmem:[#allocation3 + $0x110] sm:$0xff] %vm1756_vm7, %v1695_v11  ;;  %v1709_v30 = vpop.permute.xlu1 %1708 }
 0x289   : > { %1955 = vst.msk [vmem:[#allocation3 + $0x50] sm:$0xff] %vm1949_vm8, %v1864_v26  ;;  %v1812_v26 = vld [vmem:[#allocation2 + $0x12a] sm:$0xff] }
 0x28a   : > { %1781 = vst.msk [vmem:[#allocation3 + $0x180] sm:$0xff] %vm1756_vm7, %v1709_v30 }
 0x28d   : > { %2061 = vrot.lane.b32.xlu0 %v6567_v0, %s5773_s15  ;;  %2069 = vrot.lane.b32.xlu2 %v1994_v39, %s5773_s15 }
 0x28e   : > { %2258 = vrot.lane.b32.xlu1 %v6952_v42, %s5774_s16  ;;  %v2510_v42 = vld [vmem:[%s9349_s1 + $0x68] sm:$0xff] }
 0x28f   : > { %v1701_v34 = vpop.permute.xlu0 %1700  ;;  %v1870_v55 = vpop.permute.xlu2 %1869  ;;  %2617 = vmatpush.msra.mxu0 %v2510_v42 }
 0x290   : > { %1777 = vst.msk [vmem:[#allocation3 + $0x140] sm:$0xff] %vm1756_vm7, %v1701_v34  ;;  %v1715_v57 = vpop.permute.xlu1 %1714 }
 0x291   : > { %1958 = vst.msk [vmem:[#allocation3 + $0x80] sm:$0xff] %vm1949_vm8, %v1870_v55  ;;  %2618 = vmatpush.msra.mxu0 %v2509_v45 }
 0x292   : > { %1784 = vst.msk [vmem:[#allocation3 + $0x1b0] sm:$0xff] %vm1756_vm7, %v1715_v57  ;;  %v2003_v57 = vld [vmem:[#allocation2 + $0x120] sm:$0xff] }
 0x293   : > { %2619 = vmatpush.msra.mxu0 %v2508_v43  ;;  %v2001_v43 = vld [vmem:[#allocation2 + $0x108] sm:$0xff] }
 0x295   : > { %2063 = vrot.lane.b32.xlu0 %v1991_v53, %s5773_s15  ;;  %2071 = vrot.lane.b32.xlu2 %v1995_v15, %s5773_s15  ;;  %v2002_v53 = vld [vmem:[#allocation2 + $0x110] sm:$0xff]  ;;  %v2193_v15 = vld [vmem:[#allocation2 + $0xf9] sm:$0xff] }
 0x296   : > { %1889 = vrot.lane.b32.xlu1 %v1807_v24, %s5775_s17  ;;  %2620 = vmatpush.msra.mxu0 %v2507_v6  ;;  %v2004_v24 = vld [vmem:[#allocation2 + $0x128] sm:$0xff] }
 0x297   : > { %v1707_v0 = vpop.permute.xlu0 %1706  ;;  %v1876_v20 = vpop.permute.xlu2 %1875 }
 0x298   : > { %1780 = vst.msk [vmem:[#allocation3 + $0x170] sm:$0xff] %vm1756_vm7, %v1707_v0  ;;  %v1721_v29 = vpop.permute.xlu1 %1720  ;;  %2621 = vmatpush.msra.mxu0 %v2506_v22  ;;  %v1999_v0 = vld [vmem:[#allocation2 + $0xf0] sm:$0xff] }
 0x299   : > { %1961 = vst.msk [vmem:[#allocation3 + $0xb0] sm:$0xff] %vm1949_vm8, %v1876_v20 }
 0x29a   : > { %1787 = vst.msk [vmem:[#allocation3 + $0x1e0] sm:$0xff] %vm1756_vm7, %v1721_v29 }
 0x29d   : > { %2065 = vrot.lane.b32.xlu0 %v1992_v56, %s5773_s15  ;;  %2266 = vrot.lane.b32.xlu2 %v6959_v3, %s5774_s16  ;;  %v2505_v3 = vld [vmem:[%s9349_s1 + $0x40] sm:$0xff]  ;;  %v2000_v56 = vld [vmem:[#allocation2 + $0xf8] sm:$0xff] }
 0x29e   : > { %1891 = vrot.lane.b32.xlu1 %v1808_v7, %s5775_s17  ;;  %2622 = vmatpush.msra.mxu0 %v2505_v3  ;;  %v1814_v3 = vld [vmem:[#allocation2 + $0x142] sm:$0xff] }
 0x29f   : > { %v1713_v19 = vpop.permute.xlu0 %1712  ;;  %v2050_v2 = vpop.permute.xlu2 %2049 }
 0x2a0   : > { %1783 = vst.msk [vmem:[#allocation3 + $0x1a0] sm:$0xff] %vm1756_vm7, %v1713_v19  ;;  %v1856_v4 = vpop.permute.xlu1 %1855  ;;  %2623 = vmatpush.msra.mxu0 %v2504_v61  ;;  %v2199_v61 = vld [vmem:[#allocation2 + $0x141] sm:$0xff] }
 0x2a1   : > { %1951 = vst.msk [vmem:[#allocation3 + $0x10] sm:$0xff] %vm1949_vm8, %v1856_v4 }
 0x2a2   : > { %2145 = vst.msk [vmem:[#allocation3 + $0x10] sm:$0xff] %vm2143_vm9, %v2050_v2  ;;  %2624 = vmatpush.msra.mxu0 %v2503_v16  ;;  %v1813_v2 = vld [vmem:[#allocation2 + $0x13a] sm:$0xff] }
 0x2a4   : > { %2625 = vmatpush.msra.mxu0 %v2502_v60 }
 0x2a5   : > { %2260 = vrot.lane.b32.xlu0 %v2186_v41, %s5774_s16  ;;  %2268 = vrot.lane.b32.xlu2 %v2190_v32, %s5774_s16  ;;  %v2196_v32 = vld [vmem:[#allocation2 + $0x121] sm:$0xff] }
 0x2a6   : > { %2073 = vrot.lane.b32.xlu1 %v1996_v31, %s5773_s15  ;;  %2626 = vmatpush.msra.mxu0 %v2501_v40  ;;  %v2006_v40 = vld [vmem:[#allocation2 + $0x140] sm:$0xff] }
 0x2a7   : > { %v1719_v17 = vpop.permute.xlu0 %1718  ;;  %v2052_v25 = vpop.permute.xlu2 %2051 }
 0x2a8   : > { %1786 = vst.msk [vmem:[#allocation3 + $0x1d0] sm:$0xff] %vm1756_vm7, %v1719_v17  ;;  %v1862_v14 = vpop.permute.xlu1 %1861  ;;  %2627 = vmatpush.msra.mxu0 %v2500_v51  ;;  %v1815_v51 = vld [vmem:[#allocation2 + $0x152] sm:$0xff] }
 0x2a9   : > { %2146 = vst.msk [vmem:[#allocation3 + $0x20] sm:$0xff] %vm2143_vm9, %v2052_v25 }
 0x2aa   : > { %1954 = vst.msk [vmem:[#allocation3 + $0x40] sm:$0xff] %vm1949_vm8, %v1862_v14  ;;  %2628 = vmatpush.msra.mxu0 %v2499_v44 }
 0x2ac   : > { %2629 = vmatpush.msra.mxu0 %v2498_v23 }
 0x2ad   : > { %2262 = vrot.lane.b32.xlu0 %v2187_v9, %s5774_s16  ;;  %2270 = vrot.lane.b32.xlu2 %v6978_v46, %s5774_s16  ;;  %v2497_v46 = vld [vmem:[%s9349_s1] sm:$0xff]  ;;  %v2005_v9 = vld [vmem:[#allocation2 + $0x138] sm:$0xff] }
 0x2ae   : > { %2075 = vrot.lane.b32.xlu1 %v1997_v38, %s5773_s15  ;;  %2630 = vmatpush.msra.mxu0 %v2497_v46 }
 0x2af   : > { %v1854_v59 = vpop.permute.xlu0 %1853  ;;  %v2054_v36 = vpop.permute.xlu2 %2053 }
 0x2b0   : > { %1950 = vst.msk [vmem:[#allocation3] sm:$0xff] %vm1949_vm8, %v1854_v59  ;;  %v1868_v54 = vpop.permute.xlu1 %1867 }
 0x2b1   : > { %1957 = vst.msk [vmem:[#allocation3 + $0x70] sm:$0xff] %vm1949_vm8, %v1868_v54  ;;  %v2008_v54 = vld [vmem:[#allocation2 + $0x158] sm:$0xff] }
 0x2b5   : > { %2264 = vrot.lane.b32.xlu0 %v6965_v10, %s5774_s16  ;;  %v1811_v10 = vld [vmem:[#allocation2 + $0x122] sm:$0xff] }
 0x2b6   : > { %1897 = vrot.lane.b32.xlu2 %v1811_v10, %s5775_s17  ;;  %2077 = vrot.lane.b32.xlu1 %v1998_v27, %s5773_s15 }
 0x2b7   : > { %v1860_v18 = vpop.permute.xlu0 %1859  ;;  %v2249_v11 = vpop.permute.xlu2 %2248 }
 0x2b8   : > { %1953 = vst.msk [vmem:[#allocation3 + $0x30] sm:$0xff] %vm1949_vm8, %v1860_v18  ;;  %v1874_v34 = vpop.permute.xlu1 %1873  ;;  %v1816_v18 = vld [vmem:[#allocation2 + $0x15a] sm:$0xff] }
 0x2b9   : > { %2147 = vst.msk [vmem:[#allocation3 + $0x30] sm:$0xff] %vm2143_vm9, %v2054_v36  ;;  %v2007_v36 = vld [vmem:[#allocation2 + $0x150] sm:$0xff] }
 0x2ba   : > { %1960 = vst.msk [vmem:[#allocation3 + $0xa0] sm:$0xff] %vm1949_vm8, %v1874_v34 }
 0x2bd   : > { %1893 = vrot.lane.b32.xlu0 %v1809_v63, %s5775_s17  ;;  %v2969_v63 = vld [vmem:[#allocation2 + $0x1] sm:$0xff] }
 0x2be   : > { %1899 = vrot.lane.b32.xlu2 %v1812_v26, %s5775_s17  ;;  %2272 = vrot.lane.b32.xlu1 %v6972_v13, %s5774_s16 }
 0x2bf   : > { %v1866_v52 = vpop.permute.xlu0 %1865  ;;  %v2251_v39 = vpop.permute.xlu2 %2250 }
 0x2c0   : > { %1956 = vst.msk [vmem:[#allocation3 + $0x60] sm:$0xff] %vm1949_vm8, %v1866_v52  ;;  %v2241_v55 = vpop.permute.xlu1 %2240 }
 0x2c5   : > { %1895 = vrot.lane.b32.xlu0 %v1810_v21, %s5775_s17 }
 0x2c6   : > { %2085 = vrot.lane.b32.xlu2 %v2002_v53, %s5773_s15  ;;  %2274 = vrot.lane.b32.xlu1 %v2193_v15, %s5774_s16 }
 0x2c7   : > { %v1872_v30 = vpop.permute.xlu0 %1871  ;;  %v7199_v58 = vpop.permute.xlu2 %2252 }
 0x2c8   : > { %1959 = vst.msk [vmem:[#allocation3 + $0x90] sm:$0xff] %vm1949_vm8, %v1872_v30  ;;  %v1878_v13 = vpop.permute.xlu1 %1877 }
 0x2c9   : > { %1962 = vst.msk [vmem:[#allocation3 + $0xc0] sm:$0xff] %vm1949_vm8, %v1878_v13 }
 0x2cd   : > { %2079 = vrot.lane.b32.xlu0 %v1999_v0, %s5773_s15 }
 0x2ce   : > { %2087 = vrot.lane.b32.xlu2 %v2003_v57, %s5773_s15  ;;  %2276 = vrot.lane.b32.xlu1 %v6991_v28, %s5774_s16 }
 0x2cf   : > { %v2048_v37 = vpop.permute.xlu0 %2047  ;;  %v1886_v20 = vpop.permute.xlu2 %1885 }
 0x2d0   : > { %2144 = vst.msk [vmem:[#allocation3] sm:$0xff] %vm2143_vm9, %v2048_v37  ;;  %v1880_v45 = vpop.permute.xlu1 %1879 }
 0x2d1   : > { %2337 = vst.msk [vmem:[#allocation3] sm:$0xff] %vm2336_vm10, %v2241_v55 }
 0x2d2   : > { %1966 = vst.msk [vmem:[#allocation3 + $0x100] sm:$0xff] %vm1949_vm8, %v1886_v20 }
 0x2d3   : > { %1963 = vst.msk [vmem:[#allocation3 + $0xd0] sm:$0xff] %vm1949_vm8, %v1880_v45 }
 0x2d5   : > { %2081 = vrot.lane.b32.xlu0 %v2000_v56, %s5773_s15 }
 0x2d6   : > { %2089 = vrot.lane.b32.xlu2 %v2004_v24, %s5773_s15  ;;  %1901 = vrot.lane.b32.xlu1 %v1813_v2, %s5775_s17 }
 0x2d7   : > { %v2243_v42 = vpop.permute.xlu0 %2242  ;;  %v1888_v6 = vpop.permute.xlu2 %1887 }
 0x2d8   : > { %2338 = vst.msk [vmem:[#allocation3 + $0x10] sm:$0xff] %vm2336_vm10, %v2243_v42  ;;  %v2433_v19 = vld [vmem:[#allocation3] sm:$0xff]  ;;  %v2056_v28 = vpop.permute.xlu1 %2055 }
 0x2d9   : > { %2631 = vmatmul.f32.vlgmr.msra.gmra.mxu0 %v2433_v19  ;;  %1967 = vst.msk [vmem:[#allocation3 + $0x110] sm:$0xff] %vm1949_vm8, %v1888_v6 }
 0x2da   : > { %2148 = vst.msk [vmem:[#allocation3 + $0x40] sm:$0xff] %vm2143_vm9, %v2056_v28 }
 0x2db   : > { %2341 = vst.msk [vmem:[#allocation3 + $0x40] sm:$0xff] %vm2336_vm10, %v2249_v11 }
 0x2dd   : > { %2083 = vrot.lane.b32.xlu0 %v2001_v43, %s5773_s15 }
 0x2de   : > { %2284 = vrot.lane.b32.xlu2 %v6998_v1, %s5774_s16  ;;  %1903 = vrot.lane.b32.xlu1 %v1814_v3, %s5775_s17 }
 0x2df   : > { %v2245_v29 = vpop.permute.xlu0 %2244  ;;  %v2435_v41 = vld [vmem:[#allocation3 + $0x10] sm:$0xff]  ;;  %v2068_v22 = vpop.permute.xlu2 %2067 }
 0x2e0   : > { %2339 = vst.msk [vmem:[#allocation3 + $0x20] sm:$0xff] %vm2336_vm10, %v2245_v29  ;;  %v2058_v1 = vpop.permute.xlu1 %2057  ;;  %v3161_v29 = vld [vmem:[#allocation2 + $0x2] sm:$0xff] }
 0x2e1   : > { %2634 = vmatmul.f32.gmra.mxu0 %v2435_v41  ;;  %2154 = vst.msk [vmem:[#allocation3 + $0xa0] sm:$0xff] %vm2143_vm9, %v2068_v22 }
 0x2e2   : > { %2149 = vst.msk [vmem:[#allocation3 + $0x50] sm:$0xff] %vm2143_vm9, %v2058_v1  ;;  %v2441_v31 = vld [vmem:[#allocation3 + $0x40] sm:$0xff]  ;;  %v7284_v1 = vld [vmem:[%s9350_s2] ss:$0 sm:$0xff] }
 0x2e3   : > { %2342 = vst.msk [vmem:[#allocation3 + $0x50] sm:$0xff] %vm2336_vm10, %v2251_v39 }
 0x2e5   : > { %2278 = vrot.lane.b32.xlu0 %v6985_v12, %s5774_s16 }
 0x2e6   : > { %2286 = vrot.lane.b32.xlu2 %v2199_v61, %s5774_s16  ;;  %2091 = vrot.lane.b32.xlu1 %v2005_v9, %s5773_s15 }
 0x2e7   : > { %v2247_v17 = vpop.permute.xlu0 %2246  ;;  %v2437_v7 = vld [vmem:[#allocation3 + $0x20] sm:$0xff]  ;;  %v2070_v12 = vpop.permute.xlu2 %2069 }
 0x2e8   : > { %2340 = vst.msk [vmem:[#allocation3 + $0x30] sm:$0xff] %vm2336_vm10, %v2247_v17  ;;  %v2060_v25 = vpop.permute.xlu1 %2059 }
 0x2e9   : > { %2637 = vmatmul.f32.gmra.mxu0 %v2437_v7  ;;  %2155 = vst.msk [vmem:[#allocation3 + $0xb0] sm:$0xff] %vm2143_vm9, %v2070_v12 }
 0x2ea   : > { %2150 = vst.msk [vmem:[#allocation3 + $0x60] sm:$0xff] %vm2143_vm9, %v2060_v25  ;;  %v2443_v14 = vld [vmem:[#allocation3 + $0x50] sm:$0xff] }
 0x2eb   : > { %2343 = vst.msk [vmem:[#allocation3 + $0x60] sm:$0xff] %vm2336_vm10, %v7199_v58 }
 0x2ed   : > { %2280 = vrot.lane.b32.xlu0 %v2196_v32, %s5774_s16 }
 0x2ee   : > { %2288 = vrot.lane.b32.xlu2 %v7015_v8, %s5774_s16  ;;  %2093 = vrot.lane.b32.xlu1 %v2006_v40, %s5773_s15  ;;  %v2905_v40 = vld [vmem:[#allocation2] sm:$0xff] }
 0x2ef   : > { %v1882_v16 = vpop.permute.xlu0 %1881  ;;  %v2439_v4 = vld [vmem:[#allocation3 + $0x30] sm:$0xff]  ;;  %v2072_v60 = vpop.permute.xlu2 %2071  ;;  %2937 = vst.msk [vmem:[#allocation3] sm:$0xff] %vm333_vm1, %v2905_v40 }
 0x2f0   : > { %1964 = vst.msk [vmem:[#allocation3 + $0xe0] sm:$0xff] %vm1949_vm8, %v1882_v16  ;;  %v2255_v8 = vpop.permute.xlu1 %2254 }
 0x2f1   : > { %2640 = vmatmul.f32.gmra.mxu0 %v2439_v4  ;;  %2156 = vst.msk [vmem:[#allocation3 + $0xc0] sm:$0xff] %vm2143_vm9, %v2072_v60 }
 0x2f2   : > { %v2445_v10 = vld [vmem:[#allocation3 + $0x60] sm:$0xff] }
 0x2f5   : > { %2282 = vrot.lane.b32.xlu0 %v7003_v62, %s5774_s16 }
 0x2f6   : > { %2095 = vrot.lane.b32.xlu1 %v2007_v36, %s5773_s15  ;;  %3225 = vrot.lane.b32.xlu2 %v3161_v29, %s5778_s20 }
 0x2f7   : > { %v1884_v59 = vpop.permute.xlu0 %1883  ;;  %v2267_v44 = vpop.permute.xlu2 %2266 }
 0x2f8   : > { %1965 = vst.msk [vmem:[#allocation3 + $0xf0] sm:$0xff] %vm1949_vm8, %v1884_v59  ;;  %v2257_v23 = vpop.permute.xlu1 %2256 }
 0x2f9   : > { %2643 = vmatmul.f32.gmra.mxu0 %v2441_v31 }
 0x2fd   : > { %1905 = vrot.lane.b32.xlu0 %v1815_v51, %s5775_s17 }
 0x2fe   : > { %2097 = vrot.lane.b32.xlu1 %v2008_v54, %s5773_s15 }
 0x2ff   : > { %v2062_v62 = vpop.permute.xlu0 %2061  ;;  %v2269_v38 = vpop.permute.xlu2 %2268 }
 0x300   : > { %2151 = vst.msk [vmem:[#allocation3 + $0x70] sm:$0xff] %vm2143_vm9, %v2062_v62  ;;  %v2259_v11 = vpop.permute.xlu1 %2258 }
 0x301   : > { %2344 = vst.msk [vmem:[#allocation3 + $0x70] sm:$0xff] %vm2336_vm10, %v2255_v8  ;;  %2646 = vmatmul.f32.gmra.mxu0 %v2443_v14  ;;  %v7296_v14 = vpop.f32.mrf.mxu1 }
 0x305   : > { %1907 = vrot.lane.b32.xlu0 %v1816_v18, %s5775_s17 }
 0x307   : > { %v2064_v46 = vpop.permute.xlu0 %2063  ;;  %v2271_v52 = vpop.permute.xlu2 %2270 }
 0x308   : > { %2152 = vst.msk [vmem:[#allocation3 + $0x80] sm:$0xff] %vm2143_vm9, %v2064_v46  ;;  %v2447_v26 = vld [vmem:[#allocation3 + $0x70] sm:$0xff]  ;;  %v1890_v34 = vpop.permute.xlu1 %1889 }
 0x309   : > { %2345 = vst.msk [vmem:[#allocation3 + $0x80] sm:$0xff] %vm2336_vm10, %v2257_v23  ;;  %2649 = vmatmul.f32.gmra.mxu0 %v2445_v10  ;;  %v4457_v46 = vld [vmem:[%s9351_s3 + $0x80] sm:$0xff] }
 0x30a   : > { %1968 = vst.msk [vmem:[#allocation3 + $0x120] sm:$0xff] %vm1949_vm8, %v1890_v34 }
 0x30d   : > { %3033 = vrot.lane.b32.xlu0 %v2969_v63, %s5779_s21 }
 0x30f   : > { %v2066_v27 = vpop.permute.xlu0 %2065 }
 0x310   : > { %2153 = vst.msk [vmem:[#allocation3 + $0x90] sm:$0xff] %vm2143_vm9, %v2066_v27  ;;  %v1898_v21 = vpop.permute.xlu2 %1897  ;;  %v2449_v30 = vld [vmem:[#allocation3 + $0x80] sm:$0xff]  ;;  %v1892_v53 = vpop.permute.xlu1 %1891 }
 0x311   : > { %2346 = vst.msk [vmem:[#allocation3 + $0x90] sm:$0xff] %vm2336_vm10, %v2259_v11  ;;  %2652 = vmatmul.f32.gmra.mxu0 %v2447_v26 }
 0x312   : > { %1972 = vst.msk [vmem:[#allocation3 + $0x160] sm:$0xff] %vm1949_vm8, %v1898_v21  ;;  %v7316_v21 = vpop.f32.mrf.mxu1 }
 0x313   : > { %1969 = vst.msk [vmem:[#allocation3 + $0x130] sm:$0xff] %vm1949_vm8, %v1892_v53 }
 0x315   : > { %2290 = vrot.lane.b32.xlu0 %v7010_v47, %s5774_s16 }
 0x317   : > { %v2261_v39 = vpop.permute.xlu0 %2260 }
 0x318   : > { %2347 = vst.msk [vmem:[#allocation3 + $0xa0] sm:$0xff] %vm2336_vm10, %v2261_v39  ;;  %v1900_v55 = vpop.permute.xlu2 %1899  ;;  %v2451_v58 = vld [vmem:[#allocation3 + $0x90] sm:$0xff]  ;;  %v2074_v47 = vpop.permute.xlu1 %2073 }
 0x319   : > { %2655 = vmatmul.f32.gmra.mxu0 %v2449_v30  ;;  %1973 = vst.msk [vmem:[#allocation3 + $0x170] sm:$0xff] %vm1949_vm8, %v1900_v55 }
 0x31a   : > { %2157 = vst.msk [vmem:[#allocation3 + $0xd0] sm:$0xff] %vm2143_vm9, %v2074_v47  ;;  %v2970_v47 = vld [vmem:[#allocation2 + $0x9] sm:$0xff] }
 0x31b   : > { %2350 = vst.msk [vmem:[#allocation3 + $0xd0] sm:$0xff] %vm2336_vm10, %v2267_v44 }
 0x31f   : > { %v2263_v0 = vpop.permute.xlu0 %2262  ;;  %v2453_v57 = vld [vmem:[#allocation3 + $0xa0] sm:$0xff] }
 0x320   : > { %2348 = vst.msk [vmem:[#allocation3 + $0xb0] sm:$0xff] %vm2336_vm10, %v2263_v0  ;;  %v2086_v37 = vpop.permute.xlu2 %2085  ;;  %v2076_v13 = vpop.permute.xlu1 %2075 }
 0x321   : > { %2658 = vmatmul.f32.gmra.mxu0 %v2451_v58  ;;  %2163 = vst.msk [vmem:[#allocation3 + $0x130] sm:$0xff] %vm2143_vm9, %v2086_v37 }
 0x322   : > { %2158 = vst.msk [vmem:[#allocation3 + $0xe0] sm:$0xff] %vm2143_vm9, %v2076_v13  ;;  %v2459_v2 = vld [vmem:[#allocation3 + $0xd0] sm:$0xff] }
 0x323   : > { %2351 = vst.msk [vmem:[#allocation3 + $0xe0] sm:$0xff] %vm2336_vm10, %v2269_v38 }
 0x327   : > { %v2265_v15 = vpop.permute.xlu0 %2264  ;;  %v2455_v42 = vld [vmem:[#allocation3 + $0xb0] sm:$0xff] }
 0x328   : > { %2349 = vst.msk [vmem:[#allocation3 + $0xc0] sm:$0xff] %vm2336_vm10, %v2265_v15  ;;  %v2088_v56 = vpop.permute.xlu2 %2087  ;;  %v2078_v19 = vpop.permute.xlu1 %2077 }
 0x329   : > { %2661 = vmatmul.f32.gmra.mxu0 %v2453_v57  ;;  %2159 = vst.msk [vmem:[#allocation3 + $0xf0] sm:$0xff] %vm2143_vm9, %v2078_v19 }
 0x32a   : > { %2352 = vst.msk [vmem:[#allocation3 + $0xf0] sm:$0xff] %vm2336_vm10, %v2271_v52  ;;  %v2461_v17 = vld [vmem:[#allocation3 + $0xe0] sm:$0xff] }
 0x32f   : > { %v1894_v20 = vpop.permute.xlu0 %1893  ;;  %v2457_v43 = vld [vmem:[#allocation3 + $0xc0] sm:$0xff] }
 0x330   : > { %1970 = vst.msk [vmem:[#allocation3 + $0x140] sm:$0xff] %vm1949_vm8, %v1894_v20  ;;  %v2090_v24 = vpop.permute.xlu2 %2089  ;;  %v2273_v6 = vpop.permute.xlu1 %2272 }
 0x331   : > { %2664 = vmatmul.f32.gmra.mxu0 %v2455_v42  ;;  %2164 = vst.msk [vmem:[#allocation3 + $0x140] sm:$0xff] %vm2143_vm9, %v2088_v56  ;;  %v2463_v61 = vld [vmem:[#allocation3 + $0xf0] sm:$0xff]  ;;  %v7338_v20 = vpop.f32.mrf.mxu1 }
 0x337   : > { %v1896_v45 = vpop.permute.xlu0 %1895 }
 0x338   : > { %1971 = vst.msk [vmem:[#allocation3 + $0x150] sm:$0xff] %vm1949_vm8, %v1896_v45  ;;  %v2275_v28 = vpop.permute.xlu1 %2274  ;;  %v2285_v62 = vpop.permute.xlu2 %2284 }
 0x339   : > { %2667 = vmatmul.f32.gmra.mxu0 %v2457_v43  ;;  %2165 = vst.msk [vmem:[#allocation3 + $0x150] sm:$0xff] %vm2143_vm9, %v2090_v24  ;;  %v3162_v43 = vld [vmem:[#allocation2 + $0xa] sm:$0xff] }
 0x33f   : > { %v2080_v41 = vpop.permute.xlu0 %2079 }
 0x340   : > { %2160 = vst.msk [vmem:[#allocation3 + $0x100] sm:$0xff] %vm2143_vm9, %v2080_v41  ;;  %v2277_v7 = vpop.permute.xlu1 %2276  ;;  %v2287_v27 = vpop.permute.xlu2 %2286  ;;  %v2202_v41 = vld [vmem:[#allocation2 + $0x169] sm:$0xff] }
 0x341   : > { %2353 = vst.msk [vmem:[#allocation3 + $0x100] sm:$0xff] %vm2336_vm10, %v2273_v6  ;;  %2670 = vmatmul.f32.gmra.mxu0 %v2459_v2 }
 0x347   : > { %v2082_v22 = vpop.permute.xlu0 %2081 }
 0x348   : > { %2161 = vst.msk [vmem:[#allocation3 + $0x110] sm:$0xff] %vm2143_vm9, %v2082_v22  ;;  %v1902_v32 = vpop.permute.xlu1 %1901  ;;  %v2465_v9 = vld [vmem:[#allocation3 + $0x100] sm:$0xff]  ;;  %v2289_v56 = vpop.permute.xlu2 %2288  ;;  %v2009_v22 = vld [vmem:[#allocation2 + $0x168] sm:$0xff] }
 0x349   : > { %2354 = vst.msk [vmem:[#allocation3 + $0x110] sm:$0xff] %vm2336_vm10, %v2275_v28  ;;  %2673 = vmatmul.f32.gmra.mxu0 %v2461_v17 }
 0x34a   : > { %1974 = vst.msk [vmem:[#allocation3 + $0x180] sm:$0xff] %vm1949_vm8, %v1902_v32 }
 0x34f   : > { %v2084_v3 = vpop.permute.xlu0 %2083 }
 0x350   : > { %2162 = vst.msk [vmem:[#allocation3 + $0x120] sm:$0xff] %vm2143_vm9, %v2084_v3  ;;  %v1904_v59 = vpop.permute.xlu1 %1903  ;;  %v2467_v44 = vld [vmem:[#allocation3 + $0x110] sm:$0xff] }
 0x351   : > { %2355 = vst.msk [vmem:[#allocation3 + $0x120] sm:$0xff] %vm2336_vm10, %v2277_v7  ;;  %2676 = vmatmul.f32.gmra.mxu0 %v2463_v61  ;;  %v7364_v61 = vpop.f32.mrf.mxu1 }
 0x352   : > { %1975 = vst.msk [vmem:[#allocation3 + $0x190] sm:$0xff] %vm1949_vm8, %v1904_v59 }
 0x356   : > { %v2632_v12 = vpop.f32.mrf.mxu0 }
 0x357   : > { %v2279_v16 = vpop.permute.xlu0 %2278  ;;  %v2633_v4 = vadd.f32 %v7284_v1, %v2632_v12 }
 0x358   : > { %2356 = vst.msk [vmem:[#allocation3 + $0x130] sm:$0xff] %vm2336_vm10, %v2279_v16  ;;  %v2092_v23 = vpop.permute.xlu1 %2091  ;;  %v2469_v11 = vld [vmem:[#allocation3 + $0x120] sm:$0xff] }
 0x359   : > { %v2746_v25 = vadd.f32 %v6822_v48, %v2633_v4  ;;  %2679 = vmatmul.f32.gmra.mxu0 %v2465_v9  ;;  %2166 = vst.msk [vmem:[#allocation3 + $0x160] sm:$0xff] %vm2143_vm9, %v2092_v23 }
 0x35a   : > { %2359 = vst.msk [vmem:[#allocation3 + $0x160] sm:$0xff] %vm2336_vm10, %v2285_v62 }
 0x35b   : > { %v2841_v60 = vmax.f32 %v2746_v25, 0.0 }
 0x35d   : > { %2873 = vst.msk [vmem:[#allocation2 + $0x19] sm:$0xff] %vm333_vm1, %v2841_v60 }
 0x35e   : > { %v2635_v31 = vpop.f32.mrf.mxu0 }
 0x35f   : > { %v2281_v8 = vpop.permute.xlu0 %2280  ;;  %v2636_v51 = vadd.f32 %v7284_v1, %v2635_v31  ;;  %v2471_v0 = vld [vmem:[#allocation3 + $0x130] sm:$0xff] }
 0x360   : > { %2357 = vst.msk [vmem:[#allocation3 + $0x140] sm:$0xff] %vm2336_vm10, %v2281_v8  ;;  %v2094_v34 = vpop.permute.xlu1 %2093 }
 0x361   : > { %v2749_v48 = vadd.f32 %v6837_v35, %v2636_v51  ;;  %2682 = vmatmul.f32.gmra.mxu0 %v2467_v44  ;;  %v4458_v35 = vld [vmem:[%s9351_s3 + $0x88] sm:$0xff]  ;;  %2167 = vst.msk [vmem:[#allocation3 + $0x170] sm:$0xff] %vm2143_vm9, %v2094_v34  ;;  %v2477_v40 = vld [vmem:[#allocation3 + $0x160] sm:$0xff]  ;;  %v7388_v51 = vpop.f32.mrf.mxu1 }
 0x362   : > { %4686 = vmatpush.msra.mxu3 %v4458_v35  ;;  %2360 = vst.msk [vmem:[#allocation3 + $0x170] sm:$0xff] %vm2336_vm10, %v2287_v27 }
 0x363   : > { %v2842_v36 = vmax.f32 %v2749_v48, 0.0 }
 0x364   : > { %v7298_v18 = vld [vmem:[#allocation2 + $0x19] sm:$0xff]  ;;  %4687 = vmatpush.msra.mxu3 %v4457_v46 }
 0x365   : > { %v3353_v38 = vld [vmem:[#allocation2 + $0x18] sm:$0xff]  ;;  %2874 = vst.msk [vmem:[#allocation2 + $0x21] sm:$0xff] %vm333_vm1, %v2842_v36  ;;  %3609 = vrot.lane.b32.xlu2 %v7298_v18, %s5776_s18 }
 0x366   : > { %3417 = vrot.lane.b32.xlu1 %v3353_v38, %s5777_s19  ;;  %v2638_v10 = vpop.f32.mrf.mxu0  ;;  %2939 = vst.msk [vmem:[#allocation3 + $0x20] sm:$0xff] %vm333_vm1, %v3353_v38 }
 0x367   : > { %v2283_v54 = vpop.permute.xlu0 %2282  ;;  %v2639_v63 = vadd.f32 %v7284_v1, %v2638_v10  ;;  %v2473_v24 = vld [vmem:[#allocation3 + $0x140] sm:$0xff] }
 0x368   : > { %2358 = vst.msk [vmem:[#allocation3 + $0x150] sm:$0xff] %vm2336_vm10, %v2283_v54  ;;  %v2096_v15 = vpop.permute.xlu1 %2095  ;;  %v2203_v54 = vld [vmem:[#allocation2 + $0x171] sm:$0xff] }
 0x369   : > { %v2752_v52 = vadd.f32 %v6851_v5, %v2639_v63  ;;  %2685 = vmatmul.f32.gmra.mxu0 %v2469_v11  ;;  %2168 = vst.msk [vmem:[#allocation3 + $0x180] sm:$0xff] %vm2143_vm9, %v2096_v15  ;;  %v2479_v35 = vld [vmem:[#allocation3 + $0x170] sm:$0xff]  ;;  %v2778_v10 = vpop.f32.mrf.mxu1  ;;  %v2010_v63 = vld [vmem:[#allocation2 + $0x170] sm:$0xff] }
 0x36a   : > { %2361 = vst.msk [vmem:[#allocation3 + $0x180] sm:$0xff] %vm2336_vm10, %v2289_v56 }
 0x36b   : > { %v2843_v26 = vmax.f32 %v2752_v52, 0.0 }
 0x36c   : > { %v7318_v39 = vld [vmem:[#allocation2 + $0x1a] sm:$0xff]  ;;  %v7370_v4 = vld [vmem:[#allocation2 + $0x22] sm:$0xff] }
 0x36d   : > { %2875 = vst.msk [vmem:[#allocation2 + $0x31] sm:$0xff] %vm333_vm1, %v2843_v26  ;;  %3801 = vrot.lane.b32.xlu0 %v7318_v39, %s5775_s17  ;;  %v3354_v30 = vld [vmem:[#allocation2 + $0x20] sm:$0xff] }
 0x36e   : > { %v2641_v53 = vpop.f32.mrf.mxu0  ;;  %2940 = vst.msk [vmem:[#allocation3 + $0x30] sm:$0xff] %vm333_vm1, %v3354_v30  ;;  %v7372_v9 = vld [vmem:[#allocation2 + $0x21] sm:$0xff] }
 0x36f   : > { %v1906_v5 = vpop.permute.xlu0 %1905  ;;  %v2642_v55 = vadd.f32 %v7284_v1, %v2641_v53  ;;  %v2475_v32 = vld [vmem:[#allocation3 + $0x150] sm:$0xff] }
 0x370   : > { %1976 = vst.msk [vmem:[#allocation3 + $0x1a0] sm:$0xff] %vm1949_vm8, %v1906_v5  ;;  %v2098_v29 = vpop.permute.xlu1 %2097 }
 0x371   : > { %v2755_v58 = vadd.f32 %v6865_v50, %v2642_v55  ;;  %2688 = vmatmul.f32.gmra.mxu0 %v2471_v0  ;;  %2169 = vst.msk [vmem:[#allocation3 + $0x190] sm:$0xff] %vm2143_vm9, %v2098_v29  ;;  %v2481_v26 = vld [vmem:[#allocation3 + $0x180] sm:$0xff]  ;;  %v2781_v5 = vpop.f32.mrf.mxu1 }
 0x373   : > { %v2844_v37 = vmax.f32 %v2755_v58, 0.0  ;;  %v3226_v58 = vpop.permute.xlu2 %3225 }
 0x374   : > { %v7329_v57 = vld [vmem:[#allocation2 + $0x31] sm:$0xff] }
 0x375   : > { %v7331_v13 = vld [vmem:[#allocation2 + $0x30] sm:$0xff]  ;;  %2876 = vst.msk [vmem:[#allocation2 + $0x39] sm:$0xff] %vm333_vm1, %v2844_v37  ;;  %3035 = vrot.lane.b32.xlu0 %v2970_v47, %s5779_s21  ;;  %4185 = vrot.lane.b32.xlu2 %v7329_v57, %s5774_s16 }
 0x376   : > { %3993 = vrot.lane.b32.xlu1 %v7331_v13, %s5773_s15  ;;  %v2644_v50 = vpop.f32.mrf.mxu0  ;;  %2941 = vst.msk [vmem:[#allocation3 + $0x40] sm:$0xff] %vm333_vm1, %v7331_v13 }
 0x377   : > { %v1908_v42 = vpop.permute.xlu0 %1907  ;;  %v2645_v19 = vadd.f32 %v7284_v1, %v2644_v50 }
 0x378   : > { %1977 = vst.msk [vmem:[#allocation3 + $0x1b0] sm:$0xff] %vm1949_vm8, %v1908_v42 }
 0x379   : > { %v2758_v45 = vadd.f32 %v6879_v33, %v2645_v19  ;;  %2691 = vmatmul.f32.gmra.mxu0 %v2473_v24  ;;  %v2784_v19 = vpop.f32.mrf.mxu1 }
 0x37b   : > { %v2845_v6 = vmax.f32 %v2758_v45, 0.0 }
 0x37c   : > { %v7349_v2 = vld [vmem:[#allocation2 + $0x32] sm:$0xff]  ;;  %v7351_v28 = vld [vmem:[#allocation2 + $0x3a] sm:$0xff] }
 0x37d   : > { %2877 = vst.msk [vmem:[#allocation2 + $0x49] sm:$0xff] %vm333_vm1, %v2845_v6  ;;  %2292 = vrot.lane.b32.xlu0 %v2202_v41, %s5774_s16  ;;  %3227 = vrot.lane.b32.xlu2 %v3162_v43, %s5778_s20  ;;  %v7359_v17 = vld [vmem:[#allocation2 + $0x38] sm:$0xff]  ;;  %v2011_v43 = vld [vmem:[#allocation2 + $0x180] sm:$0xff] }
 0x37e   : > { %2099 = vrot.lane.b32.xlu1 %v2009_v22, %s5773_s15  ;;  %v2647_v33 = vpop.f32.mrf.mxu0  ;;  %4345 = vst.msk [vmem:[#allocation3 + $0x8] sm:$0xff] %vm333_vm1, %v7349_v2  ;;  %v7390_v62 = vld [vmem:[#allocation2 + $0x39] sm:$0xff] }
 0x37f   : > { %v3034_v7 = vpop.permute.xlu0 %3033  ;;  %v2648_v3 = vadd.f32 %v7284_v1, %v2647_v33  ;;  %4346 = vst.msk [vmem:[#allocation3 + $0x18] sm:$0xff] %vm333_vm1, %v7351_v28 }
 0x380   : > { %3129 = vst.msk [vmem:[#allocation3] sm:$0xff] %vm1177_vm4, %v3034_v7 }
 0x381   : > { %v2761_v12 = vadd.f32 %v6893_v49, %v2648_v3  ;;  %2694 = vmatmul.f32.gmra.mxu0 %v2475_v32  ;;  %2942 = vst.msk [vmem:[#allocation3 + $0x50] sm:$0xff] %vm333_vm1, %v7359_v17  ;;  %v2787_v3 = vpop.f32.mrf.mxu1  ;;  %v2204_v32 = vld [vmem:[#allocation2 + $0x181] sm:$0xff] }
 0x382   : > { %3321 = vst.msk [vmem:[#allocation3] sm:$0xff] %vm1370_vm5, %v3226_v58 }
 0x383   : > { %v2846_v16 = vmax.f32 %v2761_v12, 0.0 }
 0x384   : > { %v7379_v60 = vld [vmem:[#allocation2 + $0x48] sm:$0xff] }
 0x385   : > { %2878 = vst.msk [vmem:[#allocation2 + $0x51] sm:$0xff] %vm333_vm1, %v2846_v16  ;;  %3803 = vrot.lane.b32.xlu0 %v7370_v4, %s5775_s17  ;;  %3611 = vrot.lane.b32.xlu2 %v7372_v9, %s5776_s18  ;;  %v4378_v25 = vld [vmem:[#allocation3 + $0x8] sm:$0xff]  ;;  %v7437_v56 = vld [vmem:[#allocation2 + $0x49] sm:$0xff] }
 0x386   : > { %3419 = vrot.lane.b32.xlu1 %v3354_v30, %s5777_s19  ;;  %5697 = vmatmul.msk.f32.vlgmr.msra.gmra.mxu3 %vm333_vm1, %v4378_v25  ;;  %v2650_v49 = vpop.f32.mrf.mxu0  ;;  %2943 = vst.msk [vmem:[#allocation3 + $0x60] sm:$0xff] %vm333_vm1, %v7379_v60  ;;  %v4380_v23 = vld [vmem:[#allocation3 + $0x18] sm:$0xff]  ;;  %v4456_v16 = vld [vmem:[%s9351_s3 + $0x78] sm:$0xff] }
 0x387   : > { %v2291_v59 = vpop.permute.xlu0 %2290  ;;  %v2651_v31 = vadd.f32 %v7284_v1, %v2650_v49  ;;  %4559 = vmatpush.msra.mxu2 %v4456_v16 }
 0x388   : > { %2362 = vst.msk [vmem:[#allocation3 + $0x190] sm:$0xff] %vm2336_vm10, %v2291_v59 }
 0x389   : > { %v2764_v8 = vadd.f32 %v7296_v14, %v2651_v31  ;;  %2697 = vmatmul.f32.gmra.mxu0 %v2477_v40  ;;  %v7484_v40 = vpop.f32.mrf.mxu1 }
 0x38b   : > { %v2847_v44 = vmax.f32 %v2764_v8, 0.0 }
 0x38c   : > { %v7392_v48 = vld [vmem:[#allocation2 + $0x4a] sm:$0xff]  ;;  %v7394_v36 = vld [vmem:[#allocation2 + $0x52] sm:$0xff] }
 0x38d   : > { %2879 = vst.msk [vmem:[#allocation2 + $0x61] sm:$0xff] %vm333_vm1, %v2847_v44  ;;  %3037 = vrot.lane.b32.xlu0 %v7298_v18, %s5779_s21  ;;  %4187 = vrot.lane.b32.xlu2 %v7390_v62, %s5774_s16  ;;  %v7482_v31 = vld [vmem:[#allocation2 + $0x51] sm:$0xff] }
 0x38e   : > { %5698 = vmatmul.msk.f32.gmra.mxu3 %vm333_vm1, %v4380_v23  ;;  %3995 = vrot.lane.b32.xlu1 %v7359_v17, %s5773_s15  ;;  %v2653_v14 = vpop.f32.mrf.mxu0  ;;  %4347 = vst.msk [vmem:[#allocation3 + $0x28] sm:$0xff] %vm333_vm1, %v7392_v48  ;;  %v7486_v8 = vld [vmem:[#allocation2 + $0x50] sm:$0xff] }
 0x38f   : > { %v2654_v38 = vadd.f32 %v7284_v1, %v2653_v14  ;;  %4348 = vst.msk [vmem:[#allocation3 + $0x38] sm:$0xff] %vm333_vm1, %v7394_v36  ;;  %v2483_v47 = vld [vmem:[#allocation3 + $0x190] sm:$0xff]  ;;  %v4454_v14 = vld [vmem:[%s9351_s3 + $0x68] sm:$0xff] }
 0x391   : > { %v2767_v18 = vadd.f32 %v7316_v21, %v2654_v38  ;;  %2700 = vmatmul.f32.gmra.mxu0 %v2479_v35  ;;  %v4453_v35 = vld [vmem:[%s9351_s3 + $0x60] sm:$0xff] }
 0x393   : > { %v2848_v46 = vmax.f32 %v2767_v18, 0.0 }
 0x394   : > { %v7477_v25 = vld [vmem:[#allocation2 + $0x60] sm:$0xff] }
 0x395   : > { %2880 = vst.msk [vmem:[#allocation2 + $0x69] sm:$0xff] %vm333_vm1, %v2848_v46  ;;  %2294 = vrot.lane.b32.xlu0 %v2203_v54, %s5774_s16  ;;  %3229 = vrot.lane.b32.xlu2 %v7318_v39, %s5778_s20  ;;  %v4382_v11 = vld [vmem:[#allocation3 + $0x28] sm:$0xff] }
 0x396   : > { %2101 = vrot.lane.b32.xlu1 %v2010_v63, %s5773_s15  ;;  %5699 = vmatmul.msk.f32.gmra.mxu3 %vm333_vm1, %v4382_v11  ;;  %v2656_v52 = vpop.f32.mrf.mxu0  ;;  %v4384_v39 = vld [vmem:[#allocation3 + $0x38] sm:$0xff]  ;;  %2945 = vst.msk [vmem:[#allocation3 + $0x80] sm:$0xff] %vm333_vm1, %v7477_v25  ;;  %v4452_v46 = vld [vmem:[%s9351_s3 + $0x58] sm:$0xff]  ;;  %v4451_v11 = vld [vmem:[%s9351_s3 + $0x50] sm:$0xff] }
 0x397   : > { %v2657_v27 = vadd.f32 %v7284_v1, %v2656_v52  ;;  %v2012_v63 = vld [vmem:[#allocation2 + $0x188] sm:$0xff]  ;;  %v1818_v52 = vld [vmem:[#allocation2 + $0x172] sm:$0xff] }
 0x399   : > { %v2770_v34 = vadd.f32 %v7338_v20, %v2657_v27  ;;  %2703 = vmatmul.f32.gmra.mxu0 %v2481_v26  ;;  %v2793_v26 = vpop.f32.mrf.mxu1 }
 0x39b   : > { %v2849_v21 = vmax.f32 %v2770_v34, 0.0 }
 0x39c   : > { %v7418_v30 = vld [vmem:[#allocation2 + $0x62] sm:$0xff]  ;;  %v7420_v53 = vld [vmem:[#allocation2 + $0x6a] sm:$0xff] }
 0x39d   : > { %2881 = vst.msk [vmem:[#allocation2 + $0x79] sm:$0xff] %vm333_vm1, %v2849_v21  ;;  %3613 = vrot.lane.b32.xlu2 %v7329_v57, %s5776_s18  ;;  %3805 = vrot.lane.b32.xlu0 %v7349_v2, %s5775_s17  ;;  %v4450_v21 = vld [vmem:[%s9351_s3 + $0x48] sm:$0xff] }
 0x39e   : > { %3421 = vrot.lane.b32.xlu1 %v7331_v13, %s5777_s19  ;;  %5700 = vmatmul.msk.f32.gmra.mxu3 %vm333_vm1, %v4384_v39  ;;  %v2659_v55 = vpop.f32.mrf.mxu0  ;;  %4349 = vst.msk [vmem:[#allocation3 + $0x48] sm:$0xff] %vm333_vm1, %v7418_v30  ;;  %v1817_v13 = vld [vmem:[#allocation2 + $0x16a] sm:$0xff] }
 0x39f   : > { %v2660_v0 = vadd.f32 %v7284_v1, %v2659_v55  ;;  %4350 = vst.msk [vmem:[#allocation3 + $0x58] sm:$0xff] %vm333_vm1, %v7420_v53  ;;  %v2912_v55 = vld [vmem:[#allocation2 + $0x50] sm:$0xff] }
 0x3a0   : > { %2944 = vst.msk [vmem:[#allocation3 + $0x70] sm:$0xff] %vm333_vm1, %v2912_v55 }
 0x3a1   : > { %v2773_v37 = vadd.f32 %v7364_v61, %v2660_v0  ;;  %2706 = vmatmul.f32.gmra.mxu0 %v2483_v47  ;;  %v2205_v47 = vld [vmem:[#allocation2 + $0x189] sm:$0xff] }
 0x3a3   : > { %v2850_v15 = vmax.f32 %v2773_v37, 0.0 }
 0x3a5   : > { %2882 = vst.msk [vmem:[#allocation2 + $0x81] sm:$0xff] %vm333_vm1, %v2850_v15  ;;  %1909 = vrot.lane.b32.xlu0 %v1817_v13, %s5775_s17  ;;  %4189 = vrot.lane.b32.xlu2 %v7437_v56, %s5774_s16  ;;  %v4386_v20 = vld [vmem:[#allocation3 + $0x48] sm:$0xff] }
 0x3a6   : > { %3997 = vrot.lane.b32.xlu1 %v7379_v60, %s5773_s15  ;;  %5701 = vmatmul.msk.f32.gmra.mxu3 %vm333_vm1, %v4386_v20  ;;  %v2662_v50 = vpop.f32.mrf.mxu0  ;;  %v4388_v41 = vld [vmem:[#allocation3 + $0x58] sm:$0xff]  ;;  %v4448_v13 = vld [vmem:[%s9351_s3 + $0x38] sm:$0xff] }
 0x3a7   : > { %v2663_v42 = vadd.f32 %v7284_v1, %v2662_v50  ;;  %v2906_v50 = vld [vmem:[#allocation2 + $0x8] sm:$0xff] }
 0x3a8   : > { %2938 = vst.msk [vmem:[#allocation3 + $0x10] sm:$0xff] %vm333_vm1, %v2906_v50 }
 0x3a9   : > { %v2776_v24 = vadd.f32 %v7388_v51, %v2663_v42 }
 0x3ab   : > { %v2851_v45 = vmax.f32 %v2776_v24, 0.0 }
 0x3ac   : > { %v7448_v6 = vld [vmem:[#allocation2 + $0x7a] sm:$0xff]  ;;  %v7450_v29 = vld [vmem:[#allocation2 + $0x82] sm:$0xff] }
 0x3ad   : > { %2883 = vst.msk [vmem:[#allocation2 + $0x91] sm:$0xff] %vm333_vm1, %v2851_v45  ;;  %3231 = vrot.lane.b32.xlu0 %v7370_v4, %s5778_s20  ;;  %2103 = vrot.lane.b32.xlu2 %v2011_v43, %s5773_s15  ;;  %v2796_v45 = vpop.f32.mrf.mxu1 }
 0x3ae   : > { %3039 = vrot.lane.b32.xlu1 %v7372_v9, %s5779_s21  ;;  %5702 = vmatmul.msk.f32.gmra.mxu3 %vm333_vm1, %v4388_v41  ;;  %v2665_v22 = vpop.f32.mrf.mxu0  ;;  %4351 = vst.msk [vmem:[#allocation3 + $0x68] sm:$0xff] %vm333_vm1, %v7448_v6  ;;  %v4455_v9 = vld [vmem:[%s9351_s3 + $0x70] sm:$0xff] }
 0x3af   : > { %v2666_v33 = vadd.f32 %v7284_v1, %v2665_v22  ;;  %4352 = vst.msk [vmem:[#allocation3 + $0x78] sm:$0xff] %vm333_vm1, %v7450_v29  ;;  %4560 = vmatpush.msra.mxu2 %v4455_v9  ;;  %v4445_v22 = vld [vmem:[%s9351_s3 + $0x20] sm:$0xff] }
 0x3b1   : > { %v2779_v7 = vadd.f32 %v2778_v10, %v2666_v33  ;;  %4561 = vmatpush.msra.mxu2 %v4454_v14  ;;  %v4442_v14 = vld [vmem:[%s9351_s3 + $0x8] sm:$0xff] }
 0x3b3   : > { %v2852_v61 = vmax.f32 %v2779_v7, 0.0  ;;  %4562 = vmatpush.msra.mxu2 %v4453_v35 }
 0x3b5   : > { %2884 = vst.msk [vmem:[#allocation2 + $0x99] sm:$0xff] %vm333_vm1, %v2852_v61  ;;  %3615 = vrot.lane.b32.xlu0 %v7390_v62, %s5776_s18  ;;  %3423 = vrot.lane.b32.xlu2 %v7359_v17, %s5777_s19  ;;  %v4390_v12 = vld [vmem:[#allocation3 + $0x68] sm:$0xff]  ;;  %v7574_v61 = vld [vmem:[#allocation2 + $0x68] sm:$0xff] }
 0x3b6   : > { %2296 = vrot.lane.b32.xlu1 %v2204_v32, %s5774_s16  ;;  %5703 = vmatmul.msk.f32.gmra.mxu3 %vm333_vm1, %v4390_v12  ;;  %v2668_v4 = vpop.f32.mrf.mxu0  ;;  %v4392_v23 = vld [vmem:[#allocation3 + $0x78] sm:$0xff]  ;;  %2946 = vst.msk [vmem:[#allocation3 + $0x90] sm:$0xff] %vm333_vm1, %v7574_v61 }
 0x3b7   : > { %v2669_v49 = vadd.f32 %v7284_v1, %v2668_v4  ;;  %4563 = vmatpush.msra.mxu2 %v4452_v46  ;;  %v4443_v4 = vld [vmem:[%s9351_s3 + $0x10] sm:$0xff]  ;;  %v4441_v46 = vld [vmem:[%s9351_s3] sm:$0xff] }
 0x3b9   : > { %v2782_v17 = vadd.f32 %v2781_v5, %v2669_v49  ;;  %4564 = vmatpush.msra.mxu2 %v4451_v11  ;;  %v2799_v49 = vpop.f32.mrf.mxu1 }
 0x3bb   : > { %v2853_v59 = vmax.f32 %v2782_v17, 0.0  ;;  %4565 = vmatpush.msra.mxu2 %v4450_v21 }
 0x3bc   : > { %v7488_v51 = vld [vmem:[#allocation2 + $0x92] sm:$0xff]  ;;  %v7490_v44 = vld [vmem:[#allocation2 + $0x9a] sm:$0xff] }
 0x3bd   : > { %2885 = vst.msk [vmem:[#allocation2 + $0xa9] sm:$0xff] %vm333_vm1, %v2853_v59  ;;  %4191 = vrot.lane.b32.xlu0 %v7482_v31, %s5774_s16  ;;  %3999 = vrot.lane.b32.xlu2 %v7486_v8, %s5773_s15  ;;  %v1819_v59 = vld [vmem:[#allocation2 + $0x182] sm:$0xff] }
 0x3be   : > { %3807 = vrot.lane.b32.xlu1 %v7351_v28, %s5775_s17  ;;  %5704 = vmatmul.msk.f32.gmra.mxu3 %vm333_vm1, %v4392_v23  ;;  %v2671_v38 = vpop.f32.mrf.mxu0  ;;  %4353 = vst.msk [vmem:[#allocation3 + $0x88] sm:$0xff] %vm333_vm1, %v7488_v51 }
 0x3bf   : > { %v2672_v18 = vadd.f32 %v7284_v1, %v2671_v38  ;;  %4354 = vst.msk [vmem:[#allocation3 + $0x98] sm:$0xff] %vm333_vm1, %v7490_v44  ;;  %v3610_v39 = vpop.permute.xlu2 %3609  ;;  %v7593_v38 = vld [vmem:[#allocation2 + $0x61] sm:$0xff] }
 0x3c1   : > { %v2785_v10 = vadd.f32 %v2784_v19, %v2672_v18  ;;  %v4447_v19 = vld [vmem:[%s9351_s3 + $0x30] sm:$0xff] }
 0x3c3   : > { %v2854_v54 = vmax.f32 %v2785_v10, 0.0  ;;  %v7605_v10 = vld [vmem:[#allocation2 + $0x78] sm:$0xff] }
 0x3c4   : > { %2947 = vst.msk [vmem:[#allocation3 + $0xa0] sm:$0xff] %vm333_vm1, %v7605_v10 }
 0x3c5   : > { %2886 = vst.msk [vmem:[#allocation2 + $0xb1] sm:$0xff] %vm333_vm1, %v2854_v54  ;;  %2105 = vrot.lane.b32.xlu0 %v2012_v63, %s5773_s15  ;;  %3041 = vrot.lane.b32.xlu2 %v7329_v57, %s5779_s21  ;;  %v4394_v27 = vld [vmem:[#allocation3 + $0x88] sm:$0xff]  ;;  %v4449_v57 = vld [vmem:[%s9351_s3 + $0x40] sm:$0xff] }
 0x3c6   : > { %1911 = vrot.lane.b32.xlu1 %v1818_v52, %s5775_s17  ;;  %5705 = vmatmul.msk.f32.gmra.mxu3 %vm333_vm1, %v4394_v27  ;;  %v2674_v34 = vpop.f32.mrf.mxu0  ;;  %v4396_v20 = vld [vmem:[#allocation3 + $0x98] sm:$0xff]  ;;  %v2206_v52 = vld [vmem:[#allocation2 + $0x199] sm:$0xff] }
 0x3c7   : > { %v2675_v5 = vadd.f32 %v7284_v1, %v2674_v34  ;;  %4566 = vmatpush.msra.mxu2 %v4449_v57  ;;  %v2802_v34 = vpop.f32.mrf.mxu1 }
 0x3c9   : > { %v2788_v0 = vadd.f32 %v2787_v3, %v2675_v5  ;;  %4567 = vmatpush.msra.mxu2 %v4448_v13  ;;  %v4444_v3 = vld [vmem:[%s9351_s3 + $0x18] sm:$0xff] }
 0x3cb   : > { %v2855_v58 = vmax.f32 %v2788_v0, 0.0  ;;  %4568 = vmatpush.msra.mxu2 %v4447_v19 }
 0x3cc   : > { %v7531_v37 = vld [vmem:[#allocation2 + $0xaa] sm:$0xff]  ;;  %v7533_v15 = vld [vmem:[#allocation2 + $0xb2] sm:$0xff] }
 0x3cd   : > { %2887 = vst.msk [vmem:[#allocation2 + $0xc1] sm:$0xff] %vm333_vm1, %v2855_v58  ;;  %3425 = vrot.lane.b32.xlu0 %v7379_v60, %s5777_s19  ;;  %2298 = vrot.lane.b32.xlu2 %v2205_v47, %s5774_s16 }
 0x3ce   : > { %3233 = vrot.lane.b32.xlu1 %v7349_v2, %s5778_s20  ;;  %5706 = vmatmul.msk.f32.gmra.mxu3 %vm333_vm1, %v4396_v20  ;;  %v2677_v42 = vpop.f32.mrf.mxu0  ;;  %4355 = vst.msk [vmem:[#allocation3 + $0xa8] sm:$0xff] %vm333_vm1, %v7531_v37  ;;  %v4446_v2 = vld [vmem:[%s9351_s3 + $0x28] sm:$0xff] }
 0x3cf   : > { %v2678_v24 = vadd.f32 %v7284_v1, %v2677_v42  ;;  %v7551_v60 = vpop.permute.xlu2 %4185  ;;  %4356 = vst.msk [vmem:[#allocation3 + $0xb8] sm:$0xff] %vm333_vm1, %v7533_v15  ;;  %4569 = vmatpush.msra.mxu2 %v4446_v2  ;;  %v7640_v42 = vld [vmem:[#allocation2 + $0x90] sm:$0xff]  ;;  %v2805_v19 = vpop.f32.mrf.mxu1 }
 0x3d0   : > { %2949 = vst.msk [vmem:[#allocation3 + $0xc0] sm:$0xff] %vm333_vm1, %v7640_v42 }
 0x3d1   : > { %v2791_v43 = vadd.f32 %v7484_v40, %v2678_v24  ;;  %4570 = vmatpush.msra.mxu2 %v4445_v22 }
 0x3d3   : > { %v2856_v41 = vmax.f32 %v2791_v43, 0.0  ;;  %4571 = vmatpush.msra.mxu2 %v4444_v3 }
 0x3d5   : > { %2888 = vst.msk [vmem:[#allocation2 + $0xc9] sm:$0xff] %vm333_vm1, %v2856_v41  ;;  %3809 = vrot.lane.b32.xlu2 %v7392_v48, %s5775_s17  ;;  %4001 = vrot.lane.b32.xlu0 %v7477_v25, %s5773_s15  ;;  %v4398_v33 = vld [vmem:[#allocation3 + $0xa8] sm:$0xff] }
 0x3d6   : > { %3617 = vrot.lane.b32.xlu1 %v7437_v56, %s5776_s18  ;;  %5707 = vmatmul.msk.f32.gmra.mxu3 %vm333_vm1, %v4398_v33  ;;  %v2680_v7 = vpop.f32.mrf.mxu0  ;;  %v4400_v35 = vld [vmem:[#allocation3 + $0xb8] sm:$0xff] }
 0x3d7   : > { %v2681_v32 = vadd.f32 %v7284_v1, %v2680_v7  ;;  %v3228_v16 = vpop.permute.xlu2 %3227  ;;  %4572 = vmatpush.msra.mxu2 %v4443_v4  ;;  %v7653_v33 = vld [vmem:[#allocation2 + $0x69] sm:$0xff] }
 0x3d8   : > { %v3418_v12 = vpop.permute.xlu1 %3417  ;;  %v1820_v7 = vld [vmem:[#allocation2 + $0x18a] sm:$0xff] }
 0x3d9   : > { %3513 = vst.msk [vmem:[#allocation3] sm:$0xff] %vm1563_vm6, %v3418_v12  ;;  %v2794_v9 = vadd.f32 %v2793_v26, %v2681_v32  ;;  %4573 = vmatpush.msra.mxu2 %v4442_v14  ;;  %v2013_v26 = vld [vmem:[#allocation2 + $0x198] sm:$0xff] }
 0x3da   : > { %3705 = vst.msk [vmem:[#allocation3] sm:$0xff] %vm1756_vm7, %v3610_v39  ;;  %v7619_v39 = vld [vmem:[#allocation2 + $0x80] sm:$0xff]  ;;  %v7659_v32 = vld [vmem:[#allocation2 + $0x98] sm:$0xff] }
 0x3db   : > { %v2857_v17 = vmax.f32 %v2794_v9, 0.0  ;;  %4574 = vmatpush.msra.mxu2 %v4441_v46  ;;  %2948 = vst.msk [vmem:[#allocation3 + $0xb0] sm:$0xff] %vm333_vm1, %v7619_v39 }
 0x3dc   : > { %v7584_v40 = vld [vmem:[#allocation2 + $0xc2] sm:$0xff]  ;;  %v7586_v23 = vld [vmem:[#allocation2 + $0xca] sm:$0xff]  ;;  %2950 = vst.msk [vmem:[#allocation3 + $0xd0] sm:$0xff] %vm333_vm1, %v7659_v32 }
 0x3dd   : > { %2889 = vst.msk [vmem:[#allocation2 + $0xd9] sm:$0xff] %vm333_vm1, %v2857_v17  ;;  %1913 = vrot.lane.b32.xlu2 %v1819_v59, %s5775_s17  ;;  %3043 = vrot.lane.b32.xlu0 %v7390_v62, %s5779_s21 }
 0x3de   : > { %4193 = vrot.lane.b32.xlu1 %v7593_v38, %s5774_s16  ;;  %5708 = vmatmul.msk.f32.gmra.mxu3 %vm333_vm1, %v4400_v35  ;;  %v2683_v18 = vpop.f32.mrf.mxu0  ;;  %4357 = vst.msk [vmem:[#allocation3 + $0xc8] sm:$0xff] %vm333_vm1, %v7584_v40  ;;  %v2014_v35 = vld [vmem:[#allocation2 + $0x1a0] sm:$0xff] }
 0x3df   : > { %v2684_v54 = vadd.f32 %v7284_v1, %v2683_v18  ;;  %v3802_v63 = vpop.permute.xlu0 %3801  ;;  %v7608_v62 = vpop.permute.xlu2 %3611  ;;  %4358 = vst.msk [vmem:[#allocation3 + $0xd8] sm:$0xff] %vm333_vm1, %v7586_v23 }
 0x3e0   : > { %3897 = vst.msk [vmem:[#allocation3] sm:$0xff] %vm1949_vm8, %v3802_v63 }
 0x3e1   : > { %v2797_v11 = vadd.f32 %v2796_v45, %v2684_v54 }
 0x3e3   : > { %v2858_v27 = vmax.f32 %v2797_v11, 0.0 }
 0x3e5   : > { %2890 = vst.msk [vmem:[#allocation2 + $0xe1] sm:$0xff] %vm333_vm1, %v2858_v27  ;;  %3235 = vrot.lane.b32.xlu2 %v7351_v28, %s5778_s20  ;;  %2300 = vrot.lane.b32.xlu0 %v2206_v52, %s5774_s16  ;;  %v4402_v21 = vld [vmem:[#allocation3 + $0xc8] sm:$0xff] }
 0x3e6   : > { %2107 = vrot.lane.b32.xlu1 %v2013_v26, %s5773_s15  ;;  %5709 = vmatmul.msk.f32.gmra.mxu3 %vm333_vm1, %v4402_v21  ;;  %v2686_v5 = vpop.f32.mrf.mxu0  ;;  %v4404_v50 = vld [vmem:[#allocation3 + $0xd8] sm:$0xff] }
 0x3e7   : > { %v2687_v55 = vadd.f32 %v7284_v1, %v2686_v5  ;;  %v3036_v57 = vpop.permute.xlu0 %3035  ;;  %v7626_v0 = vpop.permute.xlu2 %4187  ;;  %v2207_v5 = vld [vmem:[#allocation2 + $0x1a1] sm:$0xff] }
 0x3e8   : > { %3130 = vst.msk [vmem:[#allocation3 + $0x10] sm:$0xff] %vm1177_vm4, %v3036_v57  ;;  %v3994_v28 = vpop.permute.xlu1 %3993  ;;  %v7699_v57 = vld [vmem:[#allocation2 + $0xb0] sm:$0xff] }
 0x3e9   : > { %v2800_v58 = vadd.f32 %v2799_v49, %v2687_v55  ;;  %3322 = vst.msk [vmem:[#allocation3 + $0x10] sm:$0xff] %vm1370_vm5, %v3228_v16  ;;  %v2808_v49 = vpop.f32.mrf.mxu1 }
 0x3ea   : > { %4089 = vst.msk [vmem:[#allocation3] sm:$0xff] %vm2143_vm9, %v3994_v28 }
 0x3eb   : > { %v2859_v47 = vmax.f32 %v2800_v58, 0.0  ;;  %4281 = vst.msk [vmem:[#allocation3] sm:$0xff] %vm2336_vm10, %v7551_v60 }
 0x3ec   : > { %v7633_v13 = vld [vmem:[#allocation2 + $0xda] sm:$0xff]  ;;  %v4328_v20 = vld [vmem:[#allocation2 + $0xe2] sm:$0xff]  ;;  %2952 = vst.msk [vmem:[#allocation3 + $0xf0] sm:$0xff] %vm333_vm1, %v7699_v57 }
 0x3ed   : > { %2891 = vst.msk [vmem:[#allocation2 + $0xf1] sm:$0xff] %vm333_vm1, %v2859_v47  ;;  %3619 = vrot.lane.b32.xlu2 %v7482_v31, %s5776_s18  ;;  %3811 = vrot.lane.b32.xlu0 %v7394_v36, %s5775_s17 }
 0x3ee   : > { %3427 = vrot.lane.b32.xlu1 %v7486_v8, %s5777_s19  ;;  %5710 = vmatmul.msk.f32.gmra.mxu3 %vm333_vm1, %v4404_v50  ;;  %v2689_v24 = vpop.f32.mrf.mxu0  ;;  %4359 = vst.msk [vmem:[#allocation3 + $0xe8] sm:$0xff] %vm333_vm1, %v7633_v13 }
 0x3ef   : > { %v2690_v60 = vadd.f32 %v7284_v1, %v2689_v24  ;;  %v2293_v45 = vpop.permute.xlu0 %2292  ;;  %v3230_v2 = vpop.permute.xlu2 %3229  ;;  %4360 = vst.msk [vmem:[#allocation3 + $0xf8] sm:$0xff] %vm333_vm1, %v4328_v20 }
 0x3f0   : > { %v2100_v43 = vpop.permute.xlu1 %2099 }
 0x3f1   : > { %v2803_v41 = vadd.f32 %v2802_v34, %v2690_v60  ;;  %2170 = vst.msk [vmem:[#allocation3 + $0x1a0] sm:$0xff] %vm2143_vm9, %v2100_v43  ;;  %v7687_v34 = vld [vmem:[#allocation2 + $0xa8] sm:$0xff]  ;;  %v7708_v60 = vld [vmem:[#allocation2 + $0x79] sm:$0xff] }
 0x3f2   : > { %2363 = vst.msk [vmem:[#allocation3 + $0x1a0] sm:$0xff] %vm2336_vm10, %v2293_v45  ;;  %v4377_v8 = vld [vmem:[#allocation3] sm:$0xff] }
 0x3f3   : > { %v2860_v22 = vmax.f32 %v2803_v41, 0.0  ;;  %4575 = vmatmul.f32.vlgmr.msra.gmra.mxu2 %v4377_v8  ;;  %2951 = vst.msk [vmem:[#allocation3 + $0xe0] sm:$0xff] %vm333_vm1, %v7687_v34  ;;  %v7715_v41 = vld [vmem:[#allocation2 + $0xc0] sm:$0xff] }
 0x3f4   : > { %2953 = vst.msk [vmem:[#allocation3 + $0x100] sm:$0xff] %vm333_vm1, %v7715_v41 }
 0x3f5   : > { %2892 = vst.msk [vmem:[#allocation2 + $0xf9] sm:$0xff] %vm333_vm1, %v2860_v22  ;;  %4195 = vrot.lane.b32.xlu2 %v7653_v33, %s5774_s16  ;;  %1915 = vrot.lane.b32.xlu0 %v1820_v7, %s5775_s17  ;;  %v4406_v3 = vld [vmem:[#allocation3 + $0xe8] sm:$0xff] }
 0x3f6   : > { %4003 = vrot.lane.b32.xlu1 %v7574_v61, %s5773_s15  ;;  %5711 = vmatmul.msk.f32.gmra.mxu3 %vm333_vm1, %v4406_v3  ;;  %v2692_v12 = vpop.f32.mrf.mxu0  ;;  %v4408_v63 = vld [vmem:[#allocation3 + $0xf8] sm:$0xff] }
 0x3f7   : > { %v2693_v16 = vadd.f32 %v7284_v1, %v2692_v12  ;;  %v3804_v4 = vpop.permute.xlu0 %3803  ;;  %v7667_v9 = vpop.permute.xlu2 %3613 }
 0x3f8   : > { %v3420_v17 = vpop.permute.xlu1 %3419 }
 0x3f9   : > { %v2806_v59 = vadd.f32 %v2805_v19, %v2693_v16  ;;  %3514 = vst.msk [vmem:[#allocation3 + $0x10] sm:$0xff] %vm1563_vm6, %v3420_v17  ;;  %v2485_v14 = vld [vmem:[#allocation3 + $0x1a0] sm:$0xff] }
 0x3fa   : > { %3706 = vst.msk [vmem:[#allocation3 + $0x10] sm:$0xff] %vm1756_vm7, %v7608_v62  ;;  %2709 = vmatmul.f32.gmra.mxu0 %v2485_v14 }
 0x3fb   : > { %v2861_v18 = vmax.f32 %v2806_v59, 0.0  ;;  %3898 = vst.msk [vmem:[#allocation3 + $0x10] sm:$0xff] %vm1949_vm8, %v3804_v4  ;;  %v7734_v59 = vld [vmem:[#allocation2 + $0xc8] sm:$0xff] }
 0x3fc   : > { %v4329_v46 = vld [vmem:[#allocation2 + $0xf2] sm:$0xff]  ;;  %v4330_v54 = vld [vmem:[#allocation2 + $0xfa] sm:$0xff]  ;;  %2954 = vst.msk [vmem:[#allocation3 + $0x110] sm:$0xff] %vm333_vm1, %v7734_v59 }
 0x3fd   : > { %2893 = vst.msk [vmem:[#allocation2 + $0x109] sm:$0xff] %vm333_vm1, %v2861_v18  ;;  %2109 = vrot.lane.b32.xlu2 %v2014_v35, %s5773_s15  ;;  %3237 = vrot.lane.b32.xlu0 %v7392_v48, %s5778_s20 }
 0x3fe   : > { %3045 = vrot.lane.b32.xlu1 %v7437_v56, %s5779_s21  ;;  %5712 = vmatmul.msk.f32.gmra.mxu3 %vm333_vm1, %v4408_v63  ;;  %v2695_v62 = vpop.f32.mrf.mxu0  ;;  %4361 = vst.msk [vmem:[#allocation3 + $0x108] sm:$0xff] %vm333_vm1, %v4329_v46  ;;  %v2811_v56 = vpop.f32.mrf.mxu1 }
 0x3ff   : > { %v2696_v11 = vadd.f32 %v7284_v1, %v2695_v62  ;;  %v3038_v52 = vpop.permute.xlu0 %3037  ;;  %v7682_v27 = vpop.permute.xlu2 %4189  ;;  %4362 = vst.msk [vmem:[#allocation3 + $0x118] sm:$0xff] %vm333_vm1, %v4330_v54 }
 0x400   : > { %3131 = vst.msk [vmem:[#allocation3 + $0x20] sm:$0xff] %vm1177_vm4, %v3038_v52  ;;  %v3996_v26 = vpop.permute.xlu1 %3995 }
 0x401   : > { %v2809_v48 = vadd.f32 %v2808_v49, %v2696_v11  ;;  %3323 = vst.msk [vmem:[#allocation3 + $0x20] sm:$0xff] %vm1370_vm5, %v3230_v2  ;;  %v7761_v11 = vld [vmem:[%s9350_s2] ss:$0 sm:$0xff] }
 0x402   : > { %4090 = vst.msk [vmem:[#allocation3 + $0x10] sm:$0xff] %vm2143_vm9, %v3996_v26 }
 0x403   : > { %v2862_v21 = vmax.f32 %v2809_v48, 0.0  ;;  %4282 = vst.msk [vmem:[#allocation3 + $0x10] sm:$0xff] %vm2336_vm10, %v7626_v0 }
 0x405   : > { %2894 = vst.msk [vmem:[#allocation2 + $0x111] sm:$0xff] %vm333_vm1, %v2862_v21  ;;  %3621 = vrot.lane.b32.xlu0 %v7593_v38, %s5776_s18  ;;  %3429 = vrot.lane.b32.xlu2 %v7477_v25, %s5777_s19  ;;  %v4410_v55 = vld [vmem:[#allocation3 + $0x108] sm:$0xff] }
 0x406   : > { %2302 = vrot.lane.b32.xlu1 %v2207_v5, %s5774_s16  ;;  %5713 = vmatmul.msk.f32.gmra.mxu3 %vm333_vm1, %v4410_v55  ;;  %v2698_v0 = vpop.f32.mrf.mxu0  ;;  %v2814_v24 = vpop.f32.mrf.mxu1  ;;  %v4412_v43 = vld [vmem:[#allocation3 + $0x118] sm:$0xff]  ;;  %v7767_v5 = vld [vmem:[#allocation2 + $0xd8] sm:$0xff] }
 0x407   : > { %v2699_v28 = vadd.f32 %v7284_v1, %v2698_v0  ;;  %v2295_v58 = vpop.permute.xlu0 %2294  ;;  %v2104_v47 = vpop.permute.xlu2 %2103  ;;  %2955 = vst.msk [vmem:[#allocation3 + $0x120] sm:$0xff] %vm333_vm1, %v7767_v5 }
 0x408   : > { %v2102_v20 = vpop.permute.xlu1 %2101 }
 0x409   : > { %v2812_v50 = vadd.f32 %v2811_v56, %v2699_v28  ;;  %2171 = vst.msk [vmem:[#allocation3 + $0x1b0] sm:$0xff] %vm2143_vm9, %v2102_v20  ;;  %v7774_v28 = vld [vmem:[#allocation2 + $0x81] sm:$0xff] }
 0x40a   : > { %2364 = vst.msk [vmem:[#allocation3 + $0x1b0] sm:$0xff] %vm2336_vm10, %v2295_v58  ;;  %v4379_v25 = vld [vmem:[#allocation3 + $0x10] sm:$0xff] }
 0x40b   : > { %v2863_v19 = vmax.f32 %v2812_v50, 0.0  ;;  %4578 = vmatmul.f32.gmra.mxu2 %v4379_v25 }
 0x40c   : > { %v4331_v45 = vld [vmem:[#allocation2 + $0x10a] sm:$0xff]  ;;  %v4332_v2 = vld [vmem:[#allocation2 + $0x112] sm:$0xff] }
 0x40d   : > { %2895 = vst.msk [vmem:[#allocation2 + $0x121] sm:$0xff] %vm333_vm1, %v2863_v19  ;;  %4197 = vrot.lane.b32.xlu0 %v7708_v60, %s5774_s16  ;;  %4005 = vrot.lane.b32.xlu2 %v7605_v10, %s5773_s15 }
 0x40e   : > { %3813 = vrot.lane.b32.xlu1 %v7418_v30, %s5775_s17  ;;  %5714 = vmatmul.msk.f32.gmra.mxu3 %vm333_vm1, %v4412_v43  ;;  %v2701_v8 = vpop.f32.mrf.mxu0  ;;  %4363 = vst.msk [vmem:[#allocation3 + $0x128] sm:$0xff] %vm333_vm1, %v4331_v45  ;;  %v2817_v14 = vpop.f32.mrf.mxu1 }
 0x40f   : > { %v2702_v22 = vadd.f32 %v7284_v1, %v2701_v8  ;;  %v3806_v7 = vpop.permute.xlu0 %3805  ;;  %v3424_v3 = vpop.permute.xlu2 %3423  ;;  %4364 = vst.msk [vmem:[#allocation3 + $0x138] sm:$0xff] %vm333_vm1, %v4332_v2 }
 0x410   : > { %v3422_v12 = vpop.permute.xlu1 %3421 }
 0x411   : > { %v2815_v16 = vadd.f32 %v2814_v24, %v2702_v22  ;;  %3515 = vst.msk [vmem:[#allocation3 + $0x20] sm:$0xff] %vm1563_vm6, %v3422_v12  ;;  %v2487_v4 = vld [vmem:[#allocation3 + $0x1b0] sm:$0xff]  ;;  %v7794_v24 = vld [vmem:[#allocation2 + $0xf0] sm:$0xff] }
 0x412   : > { %3707 = vst.msk [vmem:[#allocation3 + $0x20] sm:$0xff] %vm1756_vm7, %v7667_v9  ;;  %2712 = vmatmul.f32.gmra.mxu0 %v2487_v4  ;;  %v7806_v22 = vld [vmem:[#allocation2 + $0x91] sm:$0xff] }
 0x413   : > { %v2864_v49 = vmax.f32 %v2815_v16, 0.0  ;;  %3899 = vst.msk [vmem:[#allocation3 + $0x20] sm:$0xff] %vm1949_vm8, %v3806_v7  ;;  %v7812_v7 = vld [vmem:[#allocation2 + $0xf8] sm:$0xff] }
 0x414   : > { %2957 = vst.msk [vmem:[#allocation3 + $0x140] sm:$0xff] %vm333_vm1, %v7794_v24 }
 0x415   : > { %2896 = vst.msk [vmem:[#allocation2 + $0x129] sm:$0xff] %vm333_vm1, %v2864_v49  ;;  %3431 = vrot.lane.b32.xlu0 %v7574_v61, %s5777_s19  ;;  %3239 = vrot.lane.b32.xlu2 %v7394_v36, %s5778_s20  ;;  %v4414_v17 = vld [vmem:[#allocation3 + $0x128] sm:$0xff]  ;;  %v7827_v49 = vld [vmem:[#allocation2 + $0x108] sm:$0xff] }
 0x416   : > { %3047 = vrot.lane.b32.xlu1 %v7482_v31, %s5779_s21  ;;  %5715 = vmatmul.msk.f32.gmra.mxu3 %vm333_vm1, %v4414_v17  ;;  %v2704_v9 = vpop.f32.mrf.mxu0  ;;  %v2820_v48 = vpop.f32.mrf.mxu1  ;;  %2958 = vst.msk [vmem:[#allocation3 + $0x150] sm:$0xff] %vm333_vm1, %v7812_v7 }
 0x417   : > { %v2705_v35 = vadd.f32 %v7284_v1, %v2704_v9  ;;  %v1910_v18 = vpop.permute.xlu0 %1909  ;;  %v7742_v61 = vpop.permute.xlu2 %3999  ;;  %v4416_v1 = vld [vmem:[#allocation3 + $0x138] sm:$0xff]  ;;  %2959 = vst.msk [vmem:[#allocation3 + $0x160] sm:$0xff] %vm333_vm1, %v7827_v49 }
 0x418   : > { %1978 = vst.msk [vmem:[#allocation3 + $0x1c0] sm:$0xff] %vm1949_vm8, %v1910_v18  ;;  %v3998_v36 = vpop.permute.xlu1 %3997 }
 0x419   : > { %v2818_v46 = vadd.f32 %v2817_v14, %v2705_v35  ;;  %2172 = vst.msk [vmem:[#allocation3 + $0x1c0] sm:$0xff] %vm2143_vm9, %v2104_v47  ;;  %v7780_v47 = vld [vmem:[#allocation2 + $0xe0] sm:$0xff] }
 0x41a   : > { %4091 = vst.msk [vmem:[#allocation3 + $0x20] sm:$0xff] %vm2143_vm9, %v3998_v36 }
 0x41b   : > { %v2865_v31 = vmax.f32 %v2818_v46, 0.0  ;;  %4283 = vst.msk [vmem:[#allocation3 + $0x20] sm:$0xff] %vm2336_vm10, %v7682_v27  ;;  %v2399_v46 = vld [vmem:[#allocation2 + $0x19a] sm:$0xff] }
 0x41c   : > { %v4333_v54 = vld [vmem:[#allocation2 + $0x122] sm:$0xff]  ;;  %v4334_v63 = vld [vmem:[#allocation2 + $0x12a] sm:$0xff]  ;;  %2956 = vst.msk [vmem:[#allocation3 + $0x130] sm:$0xff] %vm333_vm1, %v7780_v47 }
 0x41d   : > { %2897 = vst.msk [vmem:[#allocation2 + $0x139] sm:$0xff] %vm333_vm1, %v2865_v31  ;;  %4007 = vrot.lane.b32.xlu0 %v7619_v39, %s5773_s15  ;;  %3815 = vrot.lane.b32.xlu2 %v7420_v53, %s5775_s17  ;;  %v7856_v31 = vld [vmem:[#allocation2 + $0x120] sm:$0xff] }
 0x41e   : > { %3623 = vrot.lane.b32.xlu1 %v7653_v33, %s5776_s18  ;;  %5716 = vmatmul.msk.f32.gmra.mxu3 %vm333_vm1, %v4416_v1  ;;  %v2707_v62 = vpop.f32.mrf.mxu0  ;;  %4365 = vst.msk [vmem:[#allocation3 + $0x148] sm:$0xff] %vm333_vm1, %v4333_v54 }
 0x41f   : > { %v2708_v52 = vadd.f32 %v7761_v11, %v2707_v62  ;;  %v3232_v27 = vpop.permute.xlu0 %3231  ;;  %v3042_v26 = vpop.permute.xlu2 %3041  ;;  %4366 = vst.msk [vmem:[#allocation3 + $0x158] sm:$0xff] %vm333_vm1, %v4334_v63 }
 0x420   : > { %v3040_v56 = vpop.permute.xlu1 %3039  ;;  %3133 = vst.msk [vmem:[#allocation3 + $0x40] sm:$0xff] %vm1177_vm4, %v3042_v26  ;;  %v7881_v26 = vld [vmem:[#allocation2 + $0xa9] sm:$0xff] }
 0x421   : > { %v2821_v21 = vadd.f32 %v2820_v48, %v2708_v52  ;;  %3132 = vst.msk [vmem:[#allocation3 + $0x30] sm:$0xff] %vm1177_vm4, %v3040_v56 }
 0x422   : > { %3324 = vst.msk [vmem:[#allocation3 + $0x30] sm:$0xff] %vm1370_vm5, %v3232_v27  ;;  %v4381_v55 = vld [vmem:[#allocation3 + $0x20] sm:$0xff] }
 0x423   : > { %v2866_v0 = vmax.f32 %v2821_v21, 0.0  ;;  %3516 = vst.msk [vmem:[#allocation3 + $0x30] sm:$0xff] %vm1563_vm6, %v3424_v3  ;;  %4581 = vmatmul.f32.gmra.mxu2 %v4381_v55 }
 0x424   : > { %2431 = vst.msk [vmem:[#allocation3 + $0x1e8] sm:$0xff] %vm333_vm1, %v2399_v46  ;;  %v7885_v48 = vld [vmem:[#allocation2 + $0x138] sm:$0xff] }
 0x425   : > { %2898 = vst.msk [vmem:[#allocation2 + $0x141] sm:$0xff] %vm333_vm1, %v2866_v0  ;;  %3241 = vrot.lane.b32.xlu0 %v7418_v30, %s5778_s20  ;;  %3049 = vrot.lane.b32.xlu2 %v7593_v38, %s5779_s21  ;;  %v4418_v58 = vld [vmem:[#allocation3 + $0x148] sm:$0xff] }
 0x426   : > { %4199 = vrot.lane.b32.xlu1 %v7774_v28, %s5774_s16  ;;  %5717 = vmatmul.msk.f32.gmra.mxu3 %vm333_vm1, %v4418_v58  ;;  %v4420_v19 = vld [vmem:[#allocation3 + $0x158] sm:$0xff]  ;;  %2961 = vst.msk [vmem:[#allocation3 + $0x180] sm:$0xff] %vm333_vm1, %v7856_v31 }
 0x427   : > { %v3616_v20 = vpop.permute.xlu0 %3615  ;;  %v2299_v50 = vpop.permute.xlu2 %2298  ;;  %2963 = vst.msk [vmem:[#allocation3 + $0x1a0] sm:$0xff] %vm333_vm1, %v7885_v48 }
 0x428   : > { %3708 = vst.msk [vmem:[#allocation3 + $0x30] sm:$0xff] %vm1756_vm7, %v3616_v20  ;;  %v2297_v25 = vpop.permute.xlu1 %2296 }
 0x429   : > { %2365 = vst.msk [vmem:[#allocation3 + $0x1c0] sm:$0xff] %vm2336_vm10, %v2297_v25  ;;  %v7909_v25 = vld [vmem:[#allocation2 + $0xb1] sm:$0xff] }
 0x42c   : > { %v4335_v30 = vld [vmem:[#allocation2 + $0x13a] sm:$0xff]  ;;  %v4336_v38 = vld [vmem:[#allocation2 + $0x142] sm:$0xff] }
 0x42d   : > { %3817 = vrot.lane.b32.xlu0 %v7448_v6, %s5775_s17  ;;  %3625 = vrot.lane.b32.xlu2 %v7708_v60, %s5776_s18  ;;  %4367 = vst.msk [vmem:[#allocation3 + $0x168] sm:$0xff] %vm333_vm1, %v4335_v30 }
 0x42e   : > { %3433 = vrot.lane.b32.xlu1 %v7605_v10, %s5777_s19  ;;  %5718 = vmatmul.msk.f32.gmra.mxu3 %vm333_vm1, %v4420_v19  ;;  %4368 = vst.msk [vmem:[#allocation3 + $0x178] sm:$0xff] %vm333_vm1, %v4336_v38 }
 0x42f   : > { %v4192_v45 = vpop.permute.xlu0 %4191  ;;  %v3810_v2 = vpop.permute.xlu2 %3809 }
 0x430   : > { %v3808_v43 = vpop.permute.xlu1 %3807  ;;  %v2489_v8 = vld [vmem:[#allocation3 + $0x1c0] sm:$0xff] }
 0x431   : > { %3900 = vst.msk [vmem:[#allocation3 + $0x30] sm:$0xff] %vm1949_vm8, %v3808_v43  ;;  %2715 = vmatmul.f32.gmra.mxu0 %v2489_v8 }
 0x432   : > { %4092 = vst.msk [vmem:[#allocation3 + $0x30] sm:$0xff] %vm2143_vm9, %v7742_v61 }
 0x433   : > { %4284 = vst.msk [vmem:[#allocation3 + $0x30] sm:$0xff] %vm2336_vm10, %v4192_v45 }
 0x434   : > { %v4422_v10 = vld [vmem:[#allocation3 + $0x168] sm:$0xff] }
 0x435   : > { %3051 = vrot.lane.b32.xlu0 %v7653_v33, %s5779_s21  ;;  %4201 = vrot.lane.b32.xlu2 %v7806_v22, %s5774_s16  ;;  %v4424_v4 = vld [vmem:[#allocation3 + $0x178] sm:$0xff] }
 0x436   : > { %5719 = vmatmul.msk.f32.gmra.mxu3 %vm333_vm1, %v4422_v10  ;;  %4009 = vrot.lane.b32.xlu1 %v7640_v42, %s5773_s15 }
 0x437   : > { %v2106_v3 = vpop.permute.xlu0 %2105  ;;  %v1914_v12 = vpop.permute.xlu2 %1913 }
 0x438   : > { %v1912_v16 = vpop.permute.xlu1 %1911  ;;  %1980 = vst.msk [vmem:[#allocation3 + $0x1e0] sm:$0xff] %vm1949_vm8, %v1914_v12 }
 0x439   : > { %1979 = vst.msk [vmem:[#allocation3 + $0x1d0] sm:$0xff] %vm1949_vm8, %v1912_v16 }
 0x43a   : > { %2173 = vst.msk [vmem:[#allocation3 + $0x1d0] sm:$0xff] %vm2143_vm9, %v2106_v3  ;;  %v4383_v33 = vld [vmem:[#allocation3 + $0x30] sm:$0xff]  ;;  %v2823_v3 = vpop.f32.mrf.mxu1 }
 0x43b   : > { %2366 = vst.msk [vmem:[#allocation3 + $0x1d0] sm:$0xff] %vm2336_vm10, %v2299_v50  ;;  %4584 = vmatmul.f32.gmra.mxu2 %v4383_v33 }
 0x43d   : > { %3627 = vrot.lane.b32.xlu0 %v7774_v28, %s5776_s18  ;;  %3435 = vrot.lane.b32.xlu2 %v7619_v39, %s5777_s19  ;;  %v7836_v39 = vld [vmem:[#allocation2 + $0x99] sm:$0xff] }
 0x43e   : > { %5720 = vmatmul.msk.f32.gmra.mxu3 %vm333_vm1, %v4424_v4  ;;  %3243 = vrot.lane.b32.xlu1 %v7420_v53, %s5778_s20  ;;  %v7842_v53 = vld [vmem:[#allocation2 + $0x110] sm:$0xff] }
 0x43f   : > { %v3426_v17 = vpop.permute.xlu0 %3425  ;;  %v3236_v14 = vpop.permute.xlu2 %3235  ;;  %2960 = vst.msk [vmem:[#allocation3 + $0x170] sm:$0xff] %vm333_vm1, %v7842_v53 }
 0x440   : > { %v3234_v9 = vpop.permute.xlu1 %3233 }
 0x441   : > { %3325 = vst.msk [vmem:[#allocation3 + $0x40] sm:$0xff] %vm1370_vm5, %v3234_v9 }
 0x442   : > { %3517 = vst.msk [vmem:[#allocation3 + $0x40] sm:$0xff] %vm1563_vm6, %v3426_v17  ;;  %v2491_v35 = vld [vmem:[#allocation3 + $0x1d0] sm:$0xff] }
 0x443   : > { %2718 = vmatmul.f32.gmra.mxu0 %v2491_v35 }
 0x445   : > { %4203 = vrot.lane.b32.xlu0 %v7836_v39, %s5774_s16  ;;  %4011 = vrot.lane.b32.xlu2 %v7659_v32, %s5773_s15 }
 0x446   : > { %3819 = vrot.lane.b32.xlu1 %v7450_v29, %s5775_s17 }
 0x447   : > { %v4002_v18 = vpop.permute.xlu0 %4001  ;;  %v3620_v61 = vpop.permute.xlu2 %3619 }
 0x448   : > { %v3618_v36 = vpop.permute.xlu1 %3617 }
 0x449   : > { %3709 = vst.msk [vmem:[#allocation3 + $0x40] sm:$0xff] %vm1756_vm7, %v3618_v36 }
 0x44a   : > { %3901 = vst.msk [vmem:[#allocation3 + $0x40] sm:$0xff] %vm1949_vm8, %v3810_v2 }
 0x44b   : > { %4093 = vst.msk [vmem:[#allocation3 + $0x40] sm:$0xff] %vm2143_vm9, %v4002_v18 }
 0x44d   : > { %3245 = vrot.lane.b32.xlu2 %v7448_v6, %s5778_s20  ;;  %3437 = vrot.lane.b32.xlu0 %v7640_v42, %s5777_s19  ;;  %v2494_v6 = vld [vmem:[#allocation3 + $0x1e8] sm:$0xff]  ;;  %v7871_v42 = vld [vmem:[#allocation2 + $0x128] sm:$0xff] }
 0x44e   : > { %3053 = vrot.lane.b32.xlu1 %v7708_v60, %s5779_s21  ;;  %5695 = vmatmul.msk.f32.gmra.mxu1 %vm333_vm1, %v2494_v6  ;;  %4375 = vst.msk [vmem:[#allocation3 + $0x1e8] sm:$0xff] %vm333_vm1, %v2399_v46  ;;  %v2826_v46 = vpop.f32.mrf.mxu1 }
 0x44f   : > { %v3044_v54 = vpop.permute.xlu0 %3043  ;;  %v4196_v63 = vpop.permute.xlu2 %4195  ;;  %2962 = vst.msk [vmem:[#allocation3 + $0x190] sm:$0xff] %vm333_vm1, %v7871_v42 }
 0x450   : > { %v4194_v1 = vpop.permute.xlu1 %4193  ;;  %3134 = vst.msk [vmem:[#allocation3 + $0x50] sm:$0xff] %vm1177_vm4, %v3044_v54 }
 0x451   : > { %4285 = vst.msk [vmem:[#allocation3 + $0x40] sm:$0xff] %vm2336_vm10, %v4194_v1 }
 0x452   : > { %3326 = vst.msk [vmem:[#allocation3 + $0x50] sm:$0xff] %vm1370_vm5, %v3236_v14 }
 0x455   : > { %3821 = vrot.lane.b32.xlu2 %v7488_v51, %s5775_s17  ;;  %4013 = vrot.lane.b32.xlu0 %v7687_v34, %s5773_s15 }
 0x456   : > { %3629 = vrot.lane.b32.xlu1 %v7806_v22, %s5776_s18 }
 0x457   : > { %v2301_v60 = vpop.permute.xlu0 %2300  ;;  %v2110_v62 = vpop.permute.xlu2 %2109 }
 0x458   : > { %v2108_v52 = vpop.permute.xlu1 %2107  ;;  %v4385_v27 = vld [vmem:[#allocation3 + $0x40] sm:$0xff] }
 0x459   : > { %2174 = vst.msk [vmem:[#allocation3 + $0x1e0] sm:$0xff] %vm2143_vm9, %v2108_v52  ;;  %4587 = vmatmul.f32.gmra.mxu2 %v4385_v27 }
 0x45a   : > { %2367 = vst.msk [vmem:[#allocation3 + $0x1e0] sm:$0xff] %vm2336_vm10, %v2301_v60 }
 0x45d   : > { %3055 = vrot.lane.b32.xlu2 %v7774_v28, %s5779_s21  ;;  %3247 = vrot.lane.b32.xlu0 %v7450_v29, %s5778_s20  ;;  %v2400_v29 = vld [vmem:[#allocation2 + $0x1a2] sm:$0xff] }
 0x45e   : > { %4205 = vrot.lane.b32.xlu1 %v7881_v26, %s5774_s16  ;;  %2432 = vst.msk [vmem:[#allocation3 + $0x1f8] sm:$0xff] %vm333_vm1, %v2400_v29  ;;  %v7899_v28 = vld [vmem:[#allocation2 + $0x140] sm:$0xff] }
 0x45f   : > { %v3812_v56 = vpop.permute.xlu0 %3811  ;;  %v3430_v21 = vpop.permute.xlu2 %3429  ;;  %2964 = vst.msk [vmem:[#allocation3 + $0x1b0] sm:$0xff] %vm333_vm1, %v7899_v28 }
 0x460   : > { %v3428_v55 = vpop.permute.xlu1 %3427 }
 0x461   : > { %3518 = vst.msk [vmem:[#allocation3 + $0x50] sm:$0xff] %vm1563_vm6, %v3428_v55  ;;  %v2493_v0 = vld [vmem:[#allocation3 + $0x1e0] sm:$0xff] }
 0x462   : > { %3710 = vst.msk [vmem:[#allocation3 + $0x50] sm:$0xff] %vm1756_vm7, %v3620_v61  ;;  %2721 = vmatmul.f32.gmra.mxu0 %v2493_v0 }
 0x463   : > { %3902 = vst.msk [vmem:[#allocation3 + $0x50] sm:$0xff] %vm1949_vm8, %v3812_v56 }
 0x465   : > { %3631 = vrot.lane.b32.xlu2 %v7836_v39, %s5776_s18  ;;  %3823 = vrot.lane.b32.xlu0 %v7490_v44, %s5775_s17  ;;  %v2496_v30 = vld [vmem:[#allocation3 + $0x1f8] sm:$0xff] }
 0x466   : > { %3439 = vrot.lane.b32.xlu1 %v7659_v32, %s5777_s19  ;;  %4376 = vst.msk [vmem:[#allocation3 + $0x1f8] sm:$0xff] %vm333_vm1, %v2400_v29  ;;  %5696 = vmatmul.msk.f32.gmra.mxu1 %vm333_vm1, %v2496_v30  ;;  %v2829_v30 = vpop.f32.mrf.mxu1 }
 0x467   : > { %v1916_v58 = vpop.permute.xlu0 %1915  ;;  %v4006_v20 = vpop.permute.xlu2 %4005 }
 0x468   : > { %v4004_v50 = vpop.permute.xlu1 %4003  ;;  %1981 = vst.msk [vmem:[#allocation3 + $0x1f0] sm:$0xff] %vm1949_vm8, %v1916_v58 }
 0x469   : > { %4094 = vst.msk [vmem:[#allocation3 + $0x50] sm:$0xff] %vm2143_vm9, %v4004_v50 }
 0x46a   : > { %4286 = vst.msk [vmem:[#allocation3 + $0x50] sm:$0xff] %vm2336_vm10, %v4196_v63  ;;  %v7965_v63 = vld [vmem:[#allocation2 + $0xc9] sm:$0xff] }
 0x46b   : > { %2175 = vst.msk [vmem:[#allocation3 + $0x1f0] sm:$0xff] %vm2143_vm9, %v2110_v62 }
 0x46d   : > { %4207 = vrot.lane.b32.xlu2 %v7909_v25, %s5774_s16  ;;  %3057 = vrot.lane.b32.xlu0 %v7806_v22, %s5779_s21 }
 0x46e   : > { %4015 = vrot.lane.b32.xlu1 %v7699_v57, %s5773_s15 }
 0x46f   : > { %v3238_v32 = vpop.permute.xlu0 %3237  ;;  %v3240_v38 = vpop.permute.xlu2 %3239 }
 0x470   : > { %v3046_v19 = vpop.permute.xlu1 %3045 }
 0x471   : > { %3135 = vst.msk [vmem:[#allocation3 + $0x60] sm:$0xff] %vm1177_vm4, %v3046_v19  ;;  %v4387_v45 = vld [vmem:[#allocation3 + $0x50] sm:$0xff] }
 0x472   : > { %3327 = vst.msk [vmem:[#allocation3 + $0x60] sm:$0xff] %vm1370_vm5, %v3238_v32  ;;  %4590 = vmatmul.f32.gmra.mxu2 %v4387_v45 }
 0x473   : > { %3519 = vst.msk [vmem:[#allocation3 + $0x60] sm:$0xff] %vm1563_vm6, %v3430_v21 }
 0x475   : > { %3441 = vrot.lane.b32.xlu2 %v7687_v34, %s5777_s19  ;;  %3633 = vrot.lane.b32.xlu0 %v7881_v26, %s5776_s18  ;;  %v7931_v34 = vld [vmem:[#allocation2 + $0xc1] sm:$0xff] }
 0x476   : > { %3249 = vrot.lane.b32.xlu1 %v7488_v51, %s5778_s20 }
 0x477   : > { %v2710_v2 = vpop.f32.mrf.mxu0  ;;  %v3622_v43 = vpop.permute.xlu0 %3621 }
 0x478   : > { %v2711_v8 = vadd.f32 %v7761_v11, %v2710_v2  ;;  %v2303_v10 = vpop.permute.xlu1 %2302  ;;  %3711 = vst.msk [vmem:[#allocation3 + $0x60] sm:$0xff] %vm1756_vm7, %v3622_v43  ;;  %v3816_v22 = vpop.permute.xlu2 %3815 }
 0x479   : > { %2368 = vst.msk [vmem:[#allocation3 + $0x1f0] sm:$0xff] %vm2336_vm10, %v2303_v10 }
 0x47a   : > { %v2824_v12 = vadd.f32 %v2823_v3, %v2711_v8  ;;  %v8017_v8 = vld [vmem:[#allocation2 + $0xe1] sm:$0xff] }
 0x47c   : > { %v2867_v16 = vmax.f32 %v2824_v12, 0.0  ;;  %v3177_v12 = vld [vmem:[#allocation2 + $0xc2] sm:$0xff] }
 0x47d   : > { %4017 = vrot.lane.b32.xlu2 %v7715_v41, %s5773_s15  ;;  %4209 = vrot.lane.b32.xlu0 %v7931_v34, %s5774_s16 }
 0x47e   : > { %2899 = vst.msk [vmem:[#allocation2 + $0x151] sm:$0xff] %vm333_vm1, %v2867_v16  ;;  %3825 = vrot.lane.b32.xlu1 %v7531_v37, %s5775_s17 }
 0x47f   : > { %v4198_v51 = vpop.permute.xlu0 %4197 }
 0x480   : > { %v3814_v33 = vpop.permute.xlu1 %3813  ;;  %v3050_v4 = vpop.permute.xlu2 %3049  ;;  %v2495_v17 = vld [vmem:[#allocation3 + $0x1f0] sm:$0xff] }
 0x481   : > { %3903 = vst.msk [vmem:[#allocation3 + $0x60] sm:$0xff] %vm1949_vm8, %v3814_v33  ;;  %2724 = vmatmul.f32.gmra.mxu0 %v2495_v17 }
 0x482   : > { %4095 = vst.msk [vmem:[#allocation3 + $0x60] sm:$0xff] %vm2143_vm9, %v4006_v20  ;;  %v3176_v20 = vld [vmem:[#allocation2 + $0xb2] sm:$0xff] }
 0x483   : > { %4287 = vst.msk [vmem:[#allocation3 + $0x60] sm:$0xff] %vm2336_vm10, %v4198_v51 }
 0x484   : > { %3137 = vst.msk [vmem:[#allocation3 + $0x80] sm:$0xff] %vm1177_vm4, %v3050_v4 }
 0x485   : > { %3251 = vrot.lane.b32.xlu2 %v7490_v44, %s5778_s20  ;;  %3443 = vrot.lane.b32.xlu0 %v7699_v57, %s5777_s19  ;;  %v8033_v16 = vld [vmem:[#allocation2 + $0x150] sm:$0xff] }
 0x486   : > { %3059 = vrot.lane.b32.xlu1 %v7836_v39, %s5779_s21  ;;  %2965 = vst.msk [vmem:[#allocation3 + $0x1c0] sm:$0xff] %vm333_vm1, %v8033_v16 }
 0x487   : > { %v3432_v14 = vpop.permute.xlu0 %3431 }
 0x488   : > { %v3048_v9 = vpop.permute.xlu1 %3047  ;;  %v3626_v35 = vpop.permute.xlu2 %3625 }
 0x489   : > { %3136 = vst.msk [vmem:[#allocation3 + $0x70] sm:$0xff] %vm1177_vm4, %v3048_v9 }
 0x48a   : > { %3328 = vst.msk [vmem:[#allocation3 + $0x70] sm:$0xff] %vm1370_vm5, %v3240_v38  ;;  %v4389_v18 = vld [vmem:[#allocation3 + $0x60] sm:$0xff] }
 0x48b   : > { %3520 = vst.msk [vmem:[#allocation3 + $0x70] sm:$0xff] %vm1563_vm6, %v3432_v14  ;;  %4593 = vmatmul.f32.gmra.mxu2 %v4389_v18  ;;  %v2832_v14 = vpop.f32.mrf.mxu1 }
 0x48d   : > { %3827 = vrot.lane.b32.xlu2 %v7533_v15, %s5775_s17  ;;  %4019 = vrot.lane.b32.xlu0 %v7734_v59, %s5773_s15 }
 0x48e   : > { %3635 = vrot.lane.b32.xlu1 %v7909_v25, %s5776_s18 }
 0x48f   : > { %v2713_v44 = vpop.f32.mrf.mxu0  ;;  %v4008_v57 = vpop.permute.xlu0 %4007 }
 0x490   : > { %v2714_v39 = vadd.f32 %v7761_v11, %v2713_v44  ;;  %v3624_v61 = vpop.permute.xlu1 %3623  ;;  %v4202_v36 = vpop.permute.xlu2 %4201 }
 0x491   : > { %3712 = vst.msk [vmem:[#allocation3 + $0x70] sm:$0xff] %vm1756_vm7, %v3624_v61 }
 0x492   : > { %v2827_v54 = vadd.f32 %v2826_v46, %v2714_v39  ;;  %3904 = vst.msk [vmem:[#allocation3 + $0x70] sm:$0xff] %vm1949_vm8, %v3816_v22 }
 0x493   : > { %4096 = vst.msk [vmem:[#allocation3 + $0x70] sm:$0xff] %vm2143_vm9, %v4008_v57  ;;  %v3178_v57 = vld [vmem:[#allocation2 + $0xca] sm:$0xff] }
 0x494   : > { %v2868_v15 = vmax.f32 %v2827_v54, 0.0 }
 0x495   : > { %3061 = vrot.lane.b32.xlu2 %v7881_v26, %s5779_s21  ;;  %3253 = vrot.lane.b32.xlu0 %v7531_v37, %s5778_s20 }
 0x496   : > { %2900 = vst.msk [vmem:[#allocation2 + $0x159] sm:$0xff] %vm333_vm1, %v2868_v15  ;;  %4211 = vrot.lane.b32.xlu1 %v7965_v63, %s5774_s16 }
 0x497   : > { %v3242_v1 = vpop.permute.xlu0 %3241 }
 0x498   : > { %v4200_v6 = vpop.permute.xlu1 %4199  ;;  %3329 = vst.msk [vmem:[#allocation3 + $0x80] sm:$0xff] %vm1370_vm5, %v3242_v1  ;;  %v3436_v60 = vpop.permute.xlu2 %3435 }
 0x499   : > { %4288 = vst.msk [vmem:[#allocation3 + $0x70] sm:$0xff] %vm2336_vm10, %v4200_v6 }
 0x49d   : > { %3637 = vrot.lane.b32.xlu2 %v7931_v34, %s5776_s18  ;;  %3829 = vrot.lane.b32.xlu0 %v7584_v40, %s5775_s17  ;;  %v7978_v62 = vld [vmem:[#allocation2 + $0x152] sm:$0xff]  ;;  %v7980_v37 = vld [vmem:[#allocation2 + $0x15a] sm:$0xff]  ;;  %v7991_v40 = vpop.f32.mrf.mxu3 }
 0x49e   : > { %3445 = vrot.lane.b32.xlu1 %v7715_v41, %s5777_s19  ;;  %4369 = vst.msk [vmem:[#allocation3 + $0x188] sm:$0xff] %vm333_vm1, %v7978_v62  ;;  %v7993_v41 = vld [vmem:[#allocation2 + $0xd9] sm:$0xff] }
 0x49f   : > { %v3818_v52 = vpop.permute.xlu0 %3817  ;;  %4370 = vst.msk [vmem:[#allocation3 + $0x198] sm:$0xff] %vm333_vm1, %v7980_v37  ;;  %v8075_v1 = vld [vmem:[#allocation2 + $0x158] sm:$0xff] }
 0x4a0   : > { %v3434_v27 = vpop.permute.xlu1 %3433  ;;  %v4012_v26 = vpop.permute.xlu2 %4011  ;;  %v4391_v56 = vld [vmem:[#allocation3 + $0x70] sm:$0xff]  ;;  %2966 = vst.msk [vmem:[#allocation3 + $0x1d0] sm:$0xff] %vm333_vm1, %v8075_v1 }
 0x4a1   : > { %3521 = vst.msk [vmem:[#allocation3 + $0x80] sm:$0xff] %vm1563_vm6, %v3434_v27  ;;  %4596 = vmatmul.f32.gmra.mxu2 %v4391_v56  ;;  %v8085_v56 = vld [vmem:[#allocation2 + $0xf9] sm:$0xff] }
 0x4a2   : > { %3713 = vst.msk [vmem:[#allocation3 + $0x80] sm:$0xff] %vm1756_vm7, %v3626_v35 }
 0x4a3   : > { %3905 = vst.msk [vmem:[#allocation3 + $0x80] sm:$0xff] %vm1949_vm8, %v3818_v52 }
 0x4a5   : > { %v4426_v21 = vld [vmem:[#allocation3 + $0x188] sm:$0xff]  ;;  %4213 = vrot.lane.b32.xlu2 %v7993_v41, %s5774_s16  ;;  %3063 = vrot.lane.b32.xlu0 %v7909_v25, %s5779_s21  ;;  %v8009_v50 = vpop.f32.mrf.mxu3 }
 0x4a6   : > { %5721 = vmatmul.msk.f32.gmra.mxu3 %vm333_vm1, %v4426_v21  ;;  %4021 = vrot.lane.b32.xlu1 %v7767_v5, %s5773_s15  ;;  %v4428_v58 = vld [vmem:[#allocation3 + $0x198] sm:$0xff] }
 0x4a7   : > { %v3052_v55 = vpop.permute.xlu0 %3051 }
 0x4a8   : > { %3138 = vst.msk [vmem:[#allocation3 + $0x90] sm:$0xff] %vm1177_vm4, %v3052_v55  ;;  %v3246_v0 = vpop.permute.xlu2 %3245  ;;  %v4010_v29 = vpop.permute.xlu1 %4009 }
 0x4a9   : > { %4097 = vst.msk [vmem:[#allocation3 + $0x80] sm:$0xff] %vm2143_vm9, %v4010_v29 }
 0x4aa   : > { %4289 = vst.msk [vmem:[#allocation3 + $0x80] sm:$0xff] %vm2336_vm10, %v4202_v36 }
 0x4ad   : > { %3447 = vrot.lane.b32.xlu2 %v7734_v59, %s5777_s19  ;;  %3639 = vrot.lane.b32.xlu0 %v7965_v63, %s5776_s18  ;;  %v8070_v15 = vpop.f32.mrf.mxu3 }
 0x4ae   : > { %v2716_v25 = vpop.f32.mrf.mxu0  ;;  %5722 = vmatmul.msk.f32.gmra.mxu3 %vm333_vm1, %v4428_v58  ;;  %3255 = vrot.lane.b32.xlu1 %v3176_v20, %s5778_s20 }
 0x4af   : > { %v2717_v32 = vadd.f32 %v7761_v11, %v2716_v25  ;;  %v3628_v38 = vpop.permute.xlu0 %3627 }
 0x4b0   : > { %v3244_v19 = vpop.permute.xlu1 %3243  ;;  %v3822_v45 = vpop.permute.xlu2 %3821 }
 0x4b1   : > { %v2830_v2 = vadd.f32 %v2829_v30, %v2717_v32  ;;  %3330 = vst.msk [vmem:[#allocation3 + $0x90] sm:$0xff] %vm1370_vm5, %v3244_v19  ;;  %v4393_v59 = vld [vmem:[#allocation3 + $0x80] sm:$0xff]  ;;  %v3179_v32 = vld [vmem:[#allocation2 + $0xda] sm:$0xff] }
 0x4b2   : > { %3522 = vst.msk [vmem:[#allocation3 + $0x90] sm:$0xff] %vm1563_vm6, %v3436_v60  ;;  %4599 = vmatmul.f32.gmra.mxu2 %v4393_v59  ;;  %v3755_v59 = vld [vmem:[#allocation2 + $0xf2] sm:$0xff] }
 0x4b3   : > { %v2869_v43 = vmax.f32 %v2830_v2, 0.0  ;;  %3714 = vst.msk [vmem:[#allocation3 + $0x90] sm:$0xff] %vm1756_vm7, %v3628_v38 }
 0x4b5   : > { %2901 = vst.msk [vmem:[#allocation2 + $0x169] sm:$0xff] %vm333_vm1, %v2869_v43  ;;  %4023 = vrot.lane.b32.xlu2 %v7780_v47, %s5773_s15  ;;  %4215 = vrot.lane.b32.xlu0 %v8017_v8, %s5774_s16 }
 0x4b6   : > { %3831 = vrot.lane.b32.xlu1 %v7586_v23, %s5775_s17 }
 0x4b7   : > { %v4204_v10 = vpop.permute.xlu0 %4203 }
 0x4b8   : > { %v3820_v22 = vpop.permute.xlu1 %3819  ;;  %v3056_v3 = vpop.permute.xlu2 %3055 }
 0x4b9   : > { %3906 = vst.msk [vmem:[#allocation3 + $0x90] sm:$0xff] %vm1949_vm8, %v3820_v22 }
 0x4ba   : > { %4098 = vst.msk [vmem:[#allocation3 + $0x90] sm:$0xff] %vm2143_vm9, %v4012_v26 }
 0x4bb   : > { %4290 = vst.msk [vmem:[#allocation3 + $0x90] sm:$0xff] %vm2336_vm10, %v4204_v10 }
 0x4bc   : > { %3140 = vst.msk [vmem:[#allocation3 + $0xb0] sm:$0xff] %vm1177_vm4, %v3056_v3  ;;  %v8120_v3 = vld [vmem:[#allocation2 + $0x168] sm:$0xff] }
 0x4bd   : > { %3257 = vrot.lane.b32.xlu2 %v3177_v12, %s5778_s20  ;;  %3449 = vrot.lane.b32.xlu0 %v7767_v5, %s5777_s19  ;;  %2967 = vst.msk [vmem:[#allocation3 + $0x1e0] sm:$0xff] %vm333_vm1, %v8120_v3 }
 0x4be   : > { %3065 = vrot.lane.b32.xlu1 %v7931_v34, %s5779_s21 }
 0x4bf   : > { %v3438_v23 = vpop.permute.xlu0 %3437 }
 0x4c0   : > { %v2719_v51 = vpop.f32.mrf.mxu0  ;;  %v3054_v33 = vpop.permute.xlu1 %3053 }
 0x4c1   : > { %v2720_v4 = vadd.f32 %v7761_v11, %v2719_v51  ;;  %3139 = vst.msk [vmem:[#allocation3 + $0xa0] sm:$0xff] %vm1177_vm4, %v3054_v33  ;;  %v3632_v17 = vpop.permute.xlu2 %3631 }
 0x4c2   : > { %3331 = vst.msk [vmem:[#allocation3 + $0xa0] sm:$0xff] %vm1370_vm5, %v3246_v0  ;;  %v4395_v5 = vld [vmem:[#allocation3 + $0x90] sm:$0xff] }
 0x4c3   : > { %v2833_v9 = vadd.f32 %v2832_v14, %v2720_v4  ;;  %3523 = vst.msk [vmem:[#allocation3 + $0xa0] sm:$0xff] %vm1563_vm6, %v3438_v23  ;;  %4602 = vmatmul.f32.gmra.mxu2 %v4395_v5  ;;  %v3756_v4 = vld [vmem:[#allocation2 + $0xfa] sm:$0xff] }
 0x4c5   : > { %v2870_v34 = vmax.f32 %v2833_v9, 0.0  ;;  %3833 = vrot.lane.b32.xlu2 %v7633_v13, %s5775_s17  ;;  %4025 = vrot.lane.b32.xlu0 %v7794_v24, %s5773_s15  ;;  %v8055_v13 = vld [vmem:[#allocation2 + $0xf1] sm:$0xff] }
 0x4c6   : > { %3641 = vrot.lane.b32.xlu1 %v7993_v41, %s5776_s18 }
 0x4c7   : > { %2902 = vst.msk [vmem:[#allocation2 + $0x171] sm:$0xff] %vm333_vm1, %v2870_v34  ;;  %v4014_v35 = vpop.permute.xlu0 %4013 }
 0x4c8   : > { %v3630_v18 = vpop.permute.xlu1 %3629 }
 0x4c9   : > { %v4208_v44 = vpop.permute.xlu2 %4207  ;;  %3715 = vst.msk [vmem:[#allocation3 + $0xa0] sm:$0xff] %vm1756_vm7, %v3630_v18  ;;  %v8144_v18 = vld [vmem:[#allocation2 + $0x111] sm:$0xff] }
 0x4ca   : > { %3907 = vst.msk [vmem:[#allocation3 + $0xa0] sm:$0xff] %vm1949_vm8, %v3822_v45 }
 0x4cb   : > { %4099 = vst.msk [vmem:[#allocation3 + $0xa0] sm:$0xff] %vm2143_vm9, %v4014_v35  ;;  %v2835_v55 = vpop.f32.mrf.mxu1 }
 0x4cd   : > { %3067 = vrot.lane.b32.xlu2 %v7965_v63, %s5779_s21  ;;  %3259 = vrot.lane.b32.xlu0 %v3178_v57, %s5778_s20  ;;  %v3754_v63 = vld [vmem:[#allocation2 + $0xe2] sm:$0xff] }
 0x4ce   : > { %4217 = vrot.lane.b32.xlu1 %v8055_v13, %s5774_s16  ;;  %v8060_v39 = vld [vmem:[#allocation2 + $0x16a] sm:$0xff]  ;;  %v8064_v36 = vld [vmem:[#allocation2 + $0x172] sm:$0xff] }
 0x4cf   : > { %v3248_v61 = vpop.permute.xlu0 %3247  ;;  %4371 = vst.msk [vmem:[#allocation3 + $0x1a8] sm:$0xff] %vm333_vm1, %v8060_v39 }
 0x4d0   : > { %v4206_v46 = vpop.permute.xlu1 %4205  ;;  %3332 = vst.msk [vmem:[#allocation3 + $0xb0] sm:$0xff] %vm1370_vm5, %v3248_v61 }
 0x4d1   : > { %v3442_v54 = vpop.permute.xlu2 %3441  ;;  %4291 = vst.msk [vmem:[#allocation3 + $0xa0] sm:$0xff] %vm2336_vm10, %v4206_v46 }
 0x4d2   : > { %4372 = vst.msk [vmem:[#allocation3 + $0x1b8] sm:$0xff] %vm333_vm1, %v8064_v36 }
 0x4d5   : > { %3643 = vrot.lane.b32.xlu2 %v8017_v8, %s5776_s18  ;;  %3835 = vrot.lane.b32.xlu0 %v3754_v63, %s5775_s17 }
 0x4d6   : > { %3451 = vrot.lane.b32.xlu1 %v7780_v47, %s5777_s19  ;;  %v4430_v6 = vld [vmem:[#allocation3 + $0x1a8] sm:$0xff]  ;;  %v8091_v47 = vpop.f32.mrf.mxu3 }
 0x4d7   : > { %5723 = vmatmul.msk.f32.gmra.mxu3 %vm333_vm1, %v4430_v6  ;;  %v3824_v60 = vpop.permute.xlu0 %3823 }
 0x4d8   : > { %v3440_v52 = vpop.permute.xlu1 %3439  ;;  %v4397_v27 = vld [vmem:[#allocation3 + $0xa0] sm:$0xff] }
 0x4d9   : > { %v4018_v26 = vpop.permute.xlu2 %4017  ;;  %3524 = vst.msk [vmem:[#allocation3 + $0xb0] sm:$0xff] %vm1563_vm6, %v3440_v52  ;;  %4605 = vmatmul.f32.gmra.mxu2 %v4397_v27  ;;  %v4432_v21 = vld [vmem:[#allocation3 + $0x1b8] sm:$0xff] }
 0x4da   : > { %3716 = vst.msk [vmem:[#allocation3 + $0xb0] sm:$0xff] %vm1756_vm7, %v3632_v17 }
 0x4db   : > { %3908 = vst.msk [vmem:[#allocation3 + $0xb0] sm:$0xff] %vm1949_vm8, %v3824_v60 }
 0x4dd   : > { %4219 = vrot.lane.b32.xlu2 %v8085_v56, %s5774_s16  ;;  %3069 = vrot.lane.b32.xlu0 %v7993_v41, %s5779_s21 }
 0x4de   : > { %4027 = vrot.lane.b32.xlu1 %v7812_v7, %s5773_s15  ;;  %v8170_v27 = vpop.f32.mrf.mxu3 }
 0x4df   : > { %5724 = vmatmul.msk.f32.gmra.mxu3 %vm333_vm1, %v4432_v21  ;;  %v3058_v0 = vpop.permute.xlu0 %3057  ;;  %v2722_v29 = vpop.f32.mrf.mxu0  ;;  %v8173_v21 = vld [vmem:[#allocation2 + $0x121] sm:$0xff] }
 0x4e0   : > { %v4016_v58 = vpop.permute.xlu1 %4015  ;;  %3141 = vst.msk [vmem:[#allocation3 + $0xc0] sm:$0xff] %vm1177_vm4, %v3058_v0  ;;  %v2723_v20 = vadd.f32 %v7761_v11, %v2722_v29 }
 0x4e1   : > { %v3252_v25 = vpop.permute.xlu2 %3251  ;;  %4100 = vst.msk [vmem:[#allocation3 + $0xb0] sm:$0xff] %vm2143_vm9, %v4016_v58 }
 0x4e2   : > { %4292 = vst.msk [vmem:[#allocation3 + $0xb0] sm:$0xff] %vm2336_vm10, %v4208_v44  ;;  %v2836_v41 = vadd.f32 %v2835_v55, %v2723_v20 }
 0x4e4   : > { %v2871_v30 = vmax.f32 %v2836_v41, 0.0 }
 0x4e5   : > { %3453 = vrot.lane.b32.xlu2 %v7794_v24, %s5777_s19  ;;  %3645 = vrot.lane.b32.xlu0 %v8055_v13, %s5776_s18  ;;  %v8109_v24 = vld [vmem:[#allocation2 + $0x109] sm:$0xff] }
 0x4e6   : > { %3261 = vrot.lane.b32.xlu1 %v3179_v32, %s5778_s20  ;;  %2903 = vst.msk [vmem:[#allocation2 + $0x181] sm:$0xff] %vm333_vm1, %v2871_v30  ;;  %v8185_v58 = vpop.f32.mrf.mxu3  ;;  %v8198_v30 = vld [vmem:[#allocation2 + $0x129] sm:$0xff] }
 0x4e7   : > { %v3634_v38 = vpop.permute.xlu0 %3633 }
 0x4e8   : > { %v3250_v19 = vpop.permute.xlu1 %3249 }
 0x4e9   : > { %v3828_v45 = vpop.permute.xlu2 %3827  ;;  %3333 = vst.msk [vmem:[#allocation3 + $0xc0] sm:$0xff] %vm1370_vm5, %v3250_v19  ;;  %v4399_v2 = vld [vmem:[#allocation3 + $0xb0] sm:$0xff] }
 0x4ea   : > { %3525 = vst.msk [vmem:[#allocation3 + $0xc0] sm:$0xff] %vm1563_vm6, %v3442_v54  ;;  %4608 = vmatmul.f32.gmra.mxu2 %v4399_v2 }
 0x4eb   : > { %3717 = vst.msk [vmem:[#allocation3 + $0xc0] sm:$0xff] %vm1756_vm7, %v3634_v38 }
 0x4ed   : > { %4029 = vrot.lane.b32.xlu2 %v7827_v49, %s5773_s15  ;;  %4221 = vrot.lane.b32.xlu0 %v8109_v24, %s5774_s16 }
 0x4ee   : > { %3837 = vrot.lane.b32.xlu1 %v3755_v59, %s5775_s17 }
 0x4ef   : > { %v4210_v43 = vpop.permute.xlu0 %4209 }
 0x4f0   : > { %v3826_v10 = vpop.permute.xlu1 %3825 }
 0x4f1   : > { %v3062_v22 = vpop.permute.xlu2 %3061  ;;  %3909 = vst.msk [vmem:[#allocation3 + $0xc0] sm:$0xff] %vm1949_vm8, %v3826_v10  ;;  %v3759_v10 = vld [vmem:[#allocation2 + $0x122] sm:$0xff] }
 0x4f2   : > { %3143 = vst.msk [vmem:[#allocation3 + $0xe0] sm:$0xff] %vm1177_vm4, %v3062_v22 }
 0x4f3   : > { %4101 = vst.msk [vmem:[#allocation3 + $0xc0] sm:$0xff] %vm2143_vm9, %v4018_v26 }
 0x4f4   : > { %4293 = vst.msk [vmem:[#allocation3 + $0xc0] sm:$0xff] %vm2336_vm10, %v4210_v43 }
 0x4f5   : > { %3263 = vrot.lane.b32.xlu2 %v3754_v63, %s5778_s20  ;;  %3455 = vrot.lane.b32.xlu0 %v7812_v7, %s5777_s19 }
 0x4f6   : > { %3071 = vrot.lane.b32.xlu1 %v8017_v8, %s5779_s21  ;;  %v2838_v8 = vpop.f32.mrf.mxu1 }
 0x4f7   : > { %v3444_v12 = vpop.permute.xlu0 %3443 }
 0x4f8   : > { %v3060_v23 = vpop.permute.xlu1 %3059 }
 0x4f9   : > { %v3638_v51 = vpop.permute.xlu2 %3637  ;;  %3142 = vst.msk [vmem:[#allocation3 + $0xd0] sm:$0xff] %vm1177_vm4, %v3060_v23 }
 0x4fa   : > { %3334 = vst.msk [vmem:[#allocation3 + $0xd0] sm:$0xff] %vm1370_vm5, %v3252_v25 }
 0x4fb   : > { %3526 = vst.msk [vmem:[#allocation3 + $0xd0] sm:$0xff] %vm1563_vm6, %v3444_v12  ;;  %v4401_v33 = vld [vmem:[#allocation3 + $0xc0] sm:$0xff]  ;;  %v8225_v12 = vld [vmem:[#allocation2 + $0x139] sm:$0xff] }
 0x4fc   : > { %4611 = vmatmul.f32.gmra.mxu2 %v4401_v33 }
 0x4fd   : > { %3839 = vrot.lane.b32.xlu2 %v3756_v4, %s5775_s17  ;;  %4031 = vrot.lane.b32.xlu0 %v7842_v53, %s5773_s15 }
 0x4fe   : > { %v2725_v7 = vpop.f32.mrf.mxu0  ;;  %3647 = vrot.lane.b32.xlu1 %v8085_v56, %s5776_s18 }
 0x4ff   : > { %v2726_v17 = vadd.f32 %v7761_v11, %v2725_v7  ;;  %v4020_v14 = vpop.permute.xlu0 %4019  ;;  %v8149_v11 = vld [vmem:[#allocation2 + $0x170] sm:$0xff] }
 0x500   : > { %v3636_v5 = vpop.permute.xlu1 %3635  ;;  %2968 = vst.msk [vmem:[#allocation3 + $0x1f0] sm:$0xff] %vm333_vm1, %v8149_v11 }
 0x501   : > { %v2839_v9 = vadd.f32 %v2838_v8, %v2726_v17  ;;  %v4214_v34 = vpop.permute.xlu2 %4213  ;;  %3718 = vst.msk [vmem:[#allocation3 + $0xd0] sm:$0xff] %vm1756_vm7, %v3636_v5  ;;  %v8240_v5 = vld [vmem:[#allocation2 + $0x141] sm:$0xff] }
 0x502   : > { %3910 = vst.msk [vmem:[#allocation3 + $0xd0] sm:$0xff] %vm1949_vm8, %v3828_v45 }
 0x503   : > { %v2872_v35 = vmax.f32 %v2839_v9, 0.0  ;;  %4102 = vst.msk [vmem:[#allocation3 + $0xd0] sm:$0xff] %vm2143_vm9, %v4020_v14 }
 0x505   : > { %2904 = vst.msk [vmem:[#allocation2 + $0x189] sm:$0xff] %vm333_vm1, %v2872_v35  ;;  %3073 = vrot.lane.b32.xlu2 %v8055_v13, %s5779_s21  ;;  %3265 = vrot.lane.b32.xlu0 %v3755_v59, %s5778_s20  ;;  %v3757_v13 = vld [vmem:[#allocation2 + $0x10a] sm:$0xff] }
 0x506   : > { %4223 = vrot.lane.b32.xlu1 %v8144_v18, %s5774_s16 }
 0x507   : > { %v3254_v44 = vpop.permute.xlu0 %3253 }
 0x508   : > { %v4212_v57 = vpop.permute.xlu1 %4211  ;;  %3335 = vst.msk [vmem:[#allocation3 + $0xe0] sm:$0xff] %vm1370_vm5, %v3254_v44 }
 0x509   : > { %v3448_v61 = vpop.permute.xlu2 %3447  ;;  %4294 = vst.msk [vmem:[#allocation3 + $0xd0] sm:$0xff] %vm2336_vm10, %v4212_v57 }
 0x50c   : > { %v8155_v46 = vld [vmem:[#allocation2 + $0x182] sm:$0xff]  ;;  %v8157_v54 = vld [vmem:[#allocation2 + $0x18a] sm:$0xff] }
 0x50d   : > { %3649 = vrot.lane.b32.xlu2 %v8109_v24, %s5776_s18  ;;  %3841 = vrot.lane.b32.xlu0 %v3757_v13, %s5775_s17  ;;  %4373 = vst.msk [vmem:[#allocation3 + $0x1c8] sm:$0xff] %vm333_vm1, %v8155_v46 }
 0x50e   : > { %3457 = vrot.lane.b32.xlu1 %v7827_v49, %s5777_s19  ;;  %4374 = vst.msk [vmem:[#allocation3 + $0x1d8] sm:$0xff] %vm333_vm1, %v8157_v54 }
 0x50f   : > { %v3830_v63 = vpop.permute.xlu0 %3829 }
 0x510   : > { %v3446_v6 = vpop.permute.xlu1 %3445  ;;  %v4403_v60 = vld [vmem:[#allocation3 + $0xd0] sm:$0xff] }
 0x511   : > { %v4024_v52 = vpop.permute.xlu2 %4023  ;;  %3527 = vst.msk [vmem:[#allocation3 + $0xe0] sm:$0xff] %vm1563_vm6, %v3446_v6  ;;  %4614 = vmatmul.f32.gmra.mxu2 %v4403_v60 }
 0x512   : > { %3719 = vst.msk [vmem:[#allocation3 + $0xe0] sm:$0xff] %vm1756_vm7, %v3638_v51 }
 0x513   : > { %3911 = vst.msk [vmem:[#allocation3 + $0xe0] sm:$0xff] %vm1949_vm8, %v3830_v63 }
 0x514   : > { %v4434_v26 = vld [vmem:[#allocation3 + $0x1c8] sm:$0xff] }
 0x515   : > { %5725 = vmatmul.msk.f32.gmra.mxu3 %vm333_vm1, %v4434_v26  ;;  %4225 = vrot.lane.b32.xlu2 %v8173_v21, %s5774_s16  ;;  %v4436_v29 = vld [vmem:[#allocation3 + $0x1d8] sm:$0xff] }
 0x516   : > { %4033 = vrot.lane.b32.xlu1 %v7856_v31, %s5773_s15  ;;  %3075 = vrot.lane.b32.xlu0 %v8085_v56, %s5779_s21 }
 0x517   : > { %v3064_v49 = vpop.permute.xlu0 %3063 }
 0x518   : > { %v4022_v55 = vpop.permute.xlu1 %4021  ;;  %3144 = vst.msk [vmem:[#allocation3 + $0xf0] sm:$0xff] %vm1177_vm4, %v3064_v49  ;;  %v3762_v49 = vld [vmem:[#allocation2 + $0x142] sm:$0xff] }
 0x519   : > { %v3258_v0 = vpop.permute.xlu2 %3257  ;;  %4103 = vst.msk [vmem:[#allocation3 + $0xe0] sm:$0xff] %vm2143_vm9, %v4022_v55 }
 0x51a   : > { %4295 = vst.msk [vmem:[#allocation3 + $0xe0] sm:$0xff] %vm2336_vm10, %v4214_v34 }
 0x51d   : > { %5726 = vmatmul.msk.f32.gmra.mxu3 %vm333_vm1, %v4436_v29  ;;  %3459 = vrot.lane.b32.xlu2 %v7842_v53, %s5777_s19  ;;  %v3758_v53 = vld [vmem:[#allocation2 + $0x112] sm:$0xff]  ;;  %v8286_v29 = vpop.f32.mrf.mxu2 }
 0x51e   : > { %3267 = vrot.lane.b32.xlu1 %v3756_v4, %s5778_s20  ;;  %3651 = vrot.lane.b32.xlu0 %v8144_v18, %s5776_s18  ;;  %v3760_v4 = vld [vmem:[#allocation2 + $0x12a] sm:$0xff] }
 0x51f   : > { %v3640_v56 = vpop.permute.xlu0 %3639 }
 0x520   : > { %v3256_v20 = vpop.permute.xlu1 %3255 }
 0x521   : > { %v3834_v25 = vpop.permute.xlu2 %3833  ;;  %3336 = vst.msk [vmem:[#allocation3 + $0xf0] sm:$0xff] %vm1370_vm5, %v3256_v20  ;;  %v4405_v41 = vld [vmem:[#allocation3 + $0xe0] sm:$0xff] }
 0x522   : > { %3528 = vst.msk [vmem:[#allocation3 + $0xf0] sm:$0xff] %vm1563_vm6, %v3448_v61  ;;  %4617 = vmatmul.f32.gmra.mxu2 %v4405_v41  ;;  %v8261_v61 = vld [vmem:[#allocation2 + $0x151] sm:$0xff] }
 0x523   : > { %3720 = vst.msk [vmem:[#allocation3 + $0xf0] sm:$0xff] %vm1756_vm7, %v3640_v56  ;;  %v8290_v56 = vld [vmem:[#allocation2 + $0x159] sm:$0xff] }
 0x525   : > { %4035 = vrot.lane.b32.xlu2 %v7871_v42, %s5773_s15 }
 0x526   : > { %3843 = vrot.lane.b32.xlu1 %v3758_v53, %s5775_s17  ;;  %4227 = vrot.lane.b32.xlu0 %v8198_v30, %s5774_s16 }
 0x527   : > { %v4216_v32 = vpop.permute.xlu0 %4215 }
 0x528   : > { %v3832_v38 = vpop.permute.xlu1 %3831 }
 0x529   : > { %v3068_v19 = vpop.permute.xlu2 %3067  ;;  %3912 = vst.msk [vmem:[#allocation3 + $0xf0] sm:$0xff] %vm1949_vm8, %v3832_v38 }
 0x52a   : > { %3146 = vst.msk [vmem:[#allocation3 + $0x110] sm:$0xff] %vm1177_vm4, %v3068_v19 }
 0x52b   : > { %4104 = vst.msk [vmem:[#allocation3 + $0xf0] sm:$0xff] %vm2143_vm9, %v4024_v52 }
 0x52c   : > { %4296 = vst.msk [vmem:[#allocation3 + $0xf0] sm:$0xff] %vm2336_vm10, %v4216_v32 }
 0x52d   : > { %3269 = vrot.lane.b32.xlu2 %v3757_v13, %s5778_s20 }
 0x52e   : > { %3077 = vrot.lane.b32.xlu1 %v8109_v24, %s5779_s21  ;;  %3461 = vrot.lane.b32.xlu0 %v7856_v31, %s5777_s19 }
 0x52f   : > { %v3450_v45 = vpop.permute.xlu0 %3449 }
 0x530   : > { %v3066_v2 = vpop.permute.xlu1 %3065 }
 0x531   : > { %v3644_v59 = vpop.permute.xlu2 %3643  ;;  %3145 = vst.msk [vmem:[#allocation3 + $0x100] sm:$0xff] %vm1177_vm4, %v3066_v2 }
 0x532   : > { %3337 = vst.msk [vmem:[#allocation3 + $0x100] sm:$0xff] %vm1370_vm5, %v3258_v0 }
 0x533   : > { %3529 = vst.msk [vmem:[#allocation3 + $0x100] sm:$0xff] %vm1563_vm6, %v3450_v45  ;;  %v4407_v43 = vld [vmem:[#allocation3 + $0xf0] sm:$0xff]  ;;  %v8308_v45 = vld [vmem:[#allocation2 + $0x169] sm:$0xff] }
 0x534   : > { %4620 = vmatmul.f32.gmra.mxu2 %v4407_v43  ;;  %v8319_v43 = vpop.f32.mrf.mxu3 }
 0x535   : > { %3845 = vrot.lane.b32.xlu2 %v3759_v10, %s5775_s17 }
 0x536   : > { %3653 = vrot.lane.b32.xlu1 %v8173_v21, %s5776_s18  ;;  %4037 = vrot.lane.b32.xlu0 %v7885_v48, %s5773_s15 }
 0x537   : > { %v4026_v31 = vpop.permute.xlu0 %4025 }
 0x538   : > { %v3642_v24 = vpop.permute.xlu1 %3641 }
 0x539   : > { %v4220_v22 = vpop.permute.xlu2 %4219  ;;  %3721 = vst.msk [vmem:[#allocation3 + $0x100] sm:$0xff] %vm1756_vm7, %v3642_v24 }
 0x53a   : > { %3913 = vst.msk [vmem:[#allocation3 + $0x100] sm:$0xff] %vm1949_vm8, %v3834_v25 }
 0x53b   : > { %4105 = vst.msk [vmem:[#allocation3 + $0x100] sm:$0xff] %vm2143_vm9, %v4026_v31 }
 0x53d   : > { %3079 = vrot.lane.b32.xlu2 %v8144_v18, %s5779_s21 }
 0x53e   : > { %4229 = vrot.lane.b32.xlu1 %v8225_v12, %s5774_s16  ;;  %3271 = vrot.lane.b32.xlu0 %v3758_v53, %s5778_s20  ;;  %v8297_v53 = vpop.f32.mrf.mxu2 }
 0x53f   : > { %v3260_v23 = vpop.permute.xlu0 %3259 }
 0x540   : > { %v4218_v51 = vpop.permute.xlu1 %4217  ;;  %3338 = vst.msk [vmem:[#allocation3 + $0x110] sm:$0xff] %vm1370_vm5, %v3260_v23  ;;  %v8333_v23 = vpop.f32.mrf.mxu3 }
 0x541   : > { %v3454_v33 = vpop.permute.xlu2 %3453  ;;  %4297 = vst.msk [vmem:[#allocation3 + $0x100] sm:$0xff] %vm2336_vm10, %v4218_v51 }
 0x545   : > { %3655 = vrot.lane.b32.xlu2 %v8198_v30, %s5776_s18 }
 0x546   : > { %3463 = vrot.lane.b32.xlu1 %v7871_v42, %s5777_s19  ;;  %3847 = vrot.lane.b32.xlu0 %v3760_v4, %s5775_s17  ;;  %v8310_v2 = vpop.f32.mrf.mxu2 }
 0x547   : > { %v3836_v7 = vpop.permute.xlu0 %3835 }
 0x548   : > { %v3452_v8 = vpop.permute.xlu1 %3451  ;;  %v4409_v17 = vld [vmem:[#allocation3 + $0x100] sm:$0xff] }
 0x549   : > { %v4030_v14 = vpop.permute.xlu2 %4029  ;;  %3530 = vst.msk [vmem:[#allocation3 + $0x110] sm:$0xff] %vm1563_vm6, %v3452_v8  ;;  %4623 = vmatmul.f32.gmra.mxu2 %v4409_v17  ;;  %v3189_v8 = vld [vmem:[#allocation2 + $0x152] sm:$0xff] }
 0x54a   : > { %3722 = vst.msk [vmem:[#allocation3 + $0x110] sm:$0xff] %vm1756_vm7, %v3644_v59 }
 0x54b   : > { %3914 = vst.msk [vmem:[#allocation3 + $0x110] sm:$0xff] %vm1949_vm8, %v3836_v7 }
 0x54d   : > { %4231 = vrot.lane.b32.xlu2 %v8240_v5, %s5774_s16 }
 0x54e   : > { %4039 = vrot.lane.b32.xlu1 %v7899_v28, %s5773_s15  ;;  %3081 = vrot.lane.b32.xlu0 %v8173_v21, %s5779_s21 }
 0x54f   : > { %v3070_v42 = vpop.permute.xlu0 %3069 }
 0x550   : > { %v4028_v9 = vpop.permute.xlu1 %4027  ;;  %3147 = vst.msk [vmem:[#allocation3 + $0x120] sm:$0xff] %vm1177_vm4, %v3070_v42 }
 0x551   : > { %v3264_v34 = vpop.permute.xlu2 %3263  ;;  %4106 = vst.msk [vmem:[#allocation3 + $0x110] sm:$0xff] %vm2143_vm9, %v4028_v9 }
 0x552   : > { %4298 = vst.msk [vmem:[#allocation3 + $0x110] sm:$0xff] %vm2336_vm10, %v4220_v22 }
 0x555   : > { %3465 = vrot.lane.b32.xlu2 %v7885_v48, %s5777_s19  ;;  %v3761_v48 = vld [vmem:[#allocation2 + $0x13a] sm:$0xff] }
 0x556   : > { %3273 = vrot.lane.b32.xlu1 %v3759_v10, %s5778_s20  ;;  %3657 = vrot.lane.b32.xlu0 %v8225_v12, %s5776_s18  ;;  %v8323_v10 = vpop.f32.mrf.mxu2 }
 0x557   : > { %v3646_v35 = vpop.permute.xlu0 %3645 }
 0x558   : > { %v3262_v18 = vpop.permute.xlu1 %3261 }
 0x559   : > { %v3840_v44 = vpop.permute.xlu2 %3839  ;;  %3339 = vst.msk [vmem:[#allocation3 + $0x120] sm:$0xff] %vm1370_vm5, %v3262_v18  ;;  %v4411_v57 = vld [vmem:[#allocation3 + $0x110] sm:$0xff] }
 0x55a   : > { %3531 = vst.msk [vmem:[#allocation3 + $0x120] sm:$0xff] %vm1563_vm6, %v3454_v33  ;;  %4626 = vmatmul.f32.gmra.mxu2 %v4411_v57 }
 0x55b   : > { %3723 = vst.msk [vmem:[#allocation3 + $0x120] sm:$0xff] %vm1756_vm7, %v3646_v35  ;;  %v3957_v35 = vld [vmem:[#allocation2 + $0x180] sm:$0xff] }
 0x55d   : > { %4041 = vrot.lane.b32.xlu2 %v8033_v16, %s5773_s15 }
 0x55e   : > { %3849 = vrot.lane.b32.xlu1 %v3761_v48, %s5775_s17  ;;  %4233 = vrot.lane.b32.xlu0 %v8261_v61, %s5774_s16  ;;  %v8335_v51 = vpop.f32.mrf.mxu2 }
 0x55f   : > { %v4222_v13 = vpop.permute.xlu0 %4221 }
 0x560   : > { %v3838_v63 = vpop.permute.xlu1 %3837 }
 0x561   : > { %v3074_v6 = vpop.permute.xlu2 %3073  ;;  %3915 = vst.msk [vmem:[#allocation3 + $0x120] sm:$0xff] %vm1949_vm8, %v3838_v63 }
 0x562   : > { %3149 = vst.msk [vmem:[#allocation3 + $0x140] sm:$0xff] %vm1177_vm4, %v3074_v6 }
 0x563   : > { %4107 = vst.msk [vmem:[#allocation3 + $0x120] sm:$0xff] %vm2143_vm9, %v4030_v14 }
 0x564   : > { %4299 = vst.msk [vmem:[#allocation3 + $0x120] sm:$0xff] %vm2336_vm10, %v4222_v13  ;;  %v3190_v13 = vld [vmem:[#allocation2 + $0x15a] sm:$0xff] }
 0x565   : > { %3275 = vrot.lane.b32.xlu2 %v3760_v4, %s5778_s20 }
 0x566   : > { %3083 = vrot.lane.b32.xlu1 %v8198_v30, %s5779_s21  ;;  %3467 = vrot.lane.b32.xlu0 %v7899_v28, %s5777_s19  ;;  %v8349_v17 = vpop.f32.mrf.mxu2 }
 0x567   : > { %v3456_v60 = vpop.permute.xlu0 %3455 }
 0x568   : > { %v3072_v52 = vpop.permute.xlu1 %3071 }
 0x569   : > { %v3650_v26 = vpop.permute.xlu2 %3649  ;;  %3148 = vst.msk [vmem:[#allocation3 + $0x130] sm:$0xff] %vm1177_vm4, %v3072_v52 }
 0x56a   : > { %3340 = vst.msk [vmem:[#allocation3 + $0x130] sm:$0xff] %vm1370_vm5, %v3264_v34 }
 0x56b   : > { %3532 = vst.msk [vmem:[#allocation3 + $0x130] sm:$0xff] %vm1563_vm6, %v3456_v60  ;;  %v4413_v21 = vld [vmem:[#allocation3 + $0x120] sm:$0xff] }
 0x56c   : > { %4629 = vmatmul.f32.gmra.mxu2 %v4413_v21 }
 0x56d   : > { %3851 = vrot.lane.b32.xlu2 %v3762_v49, %s5775_s17 }
 0x56e   : > { %3659 = vrot.lane.b32.xlu1 %v8240_v5, %s5776_s18  ;;  %4043 = vrot.lane.b32.xlu0 %v8075_v1, %s5773_s15  ;;  %v8361_v34 = vpop.f32.mrf.mxu2 }
 0x56f   : > { %v4032_v28 = vpop.permute.xlu0 %4031 }
 0x570   : > { %v3648_v55 = vpop.permute.xlu1 %3647 }
 0x571   : > { %v4226_v0 = vpop.permute.xlu2 %4225  ;;  %3724 = vst.msk [vmem:[#allocation3 + $0x130] sm:$0xff] %vm1756_vm7, %v3648_v55 }
 0x572   : > { %3916 = vst.msk [vmem:[#allocation3 + $0x130] sm:$0xff] %vm1949_vm8, %v3840_v44 }
 0x573   : > { %4108 = vst.msk [vmem:[#allocation3 + $0x130] sm:$0xff] %vm2143_vm9, %v4032_v28 }
 0x575   : > { %3085 = vrot.lane.b32.xlu2 %v8225_v12, %s5779_s21 }
 0x576   : > { %4235 = vrot.lane.b32.xlu1 %v8290_v56, %s5774_s16  ;;  %3277 = vrot.lane.b32.xlu0 %v3761_v48, %s5778_s20  ;;  %v8373_v48 = vpop.f32.mrf.mxu2 }
 0x577   : > { %v3266_v20 = vpop.permute.xlu0 %3265 }
 0x578   : > { %v4224_v25 = vpop.permute.xlu1 %4223  ;;  %3341 = vst.msk [vmem:[#allocation3 + $0x140] sm:$0xff] %vm1370_vm5, %v3266_v20 }
 0x579   : > { %v3460_v41 = vpop.permute.xlu2 %3459  ;;  %4300 = vst.msk [vmem:[#allocation3 + $0x130] sm:$0xff] %vm2336_vm10, %v4224_v25 }
 0x57d   : > { %3661 = vrot.lane.b32.xlu2 %v8261_v61, %s5776_s18 }
 0x57e   : > { %3469 = vrot.lane.b32.xlu1 %v8033_v16, %s5777_s19  ;;  %3853 = vrot.lane.b32.xlu0 %v7978_v62, %s5775_s17 }
 0x57f   : > { %v3842_v30 = vpop.permute.xlu0 %3841 }
 0x580   : > { %v3458_v32 = vpop.permute.xlu1 %3457  ;;  %v4415_v38 = vld [vmem:[#allocation3 + $0x130] sm:$0xff] }
 0x581   : > { %v4036_v19 = vpop.permute.xlu2 %4035  ;;  %3533 = vst.msk [vmem:[#allocation3 + $0x140] sm:$0xff] %vm1563_vm6, %v3458_v32  ;;  %4632 = vmatmul.f32.gmra.mxu2 %v4415_v38 }
 0x582   : > { %3725 = vst.msk [vmem:[#allocation3 + $0x140] sm:$0xff] %vm1756_vm7, %v3650_v26  ;;  %v8383_v26 = vpop.f32.mrf.mxu2 }
 0x583   : > { %3917 = vst.msk [vmem:[#allocation3 + $0x140] sm:$0xff] %vm1949_vm8, %v3842_v30 }
 0x585   : > { %4237 = vrot.lane.b32.xlu2 %v8308_v45, %s5774_s16 }
 0x586   : > { %4045 = vrot.lane.b32.xlu1 %v8120_v3, %s5773_s15  ;;  %3087 = vrot.lane.b32.xlu0 %v8240_v5, %s5779_s21 }
 0x588   : > { %v4034_v62 = vpop.permute.xlu1 %4033  ;;  %v3076_v16 = vpop.permute.xlu0 %3075 }
 0x589   : > { %v3270_v59 = vpop.permute.xlu2 %3269  ;;  %4109 = vst.msk [vmem:[#allocation3 + $0x140] sm:$0xff] %vm2143_vm9, %v4034_v62 }
 0x58a   : > { %4301 = vst.msk [vmem:[#allocation3 + $0x140] sm:$0xff] %vm2336_vm10, %v4226_v0  ;;  %v8396_v20 = vpop.f32.mrf.mxu2 }
 0x58b   : > { %3150 = vst.msk [vmem:[#allocation3 + $0x150] sm:$0xff] %vm1177_vm4, %v3076_v16 }
 0x58d   : > { %3471 = vrot.lane.b32.xlu2 %v8075_v1, %s5777_s19  ;;  %v8339_v1 = vld [vmem:[#allocation2 + $0x171] sm:$0xff] }
 0x58e   : > { %3279 = vrot.lane.b32.xlu1 %v3762_v49, %s5778_s20  ;;  %3663 = vrot.lane.b32.xlu0 %v8290_v56, %s5776_s18 }
 0x590   : > { %v3268_v31 = vpop.permute.xlu1 %3267  ;;  %v3652_v24 = vpop.permute.xlu0 %3651 }
 0x591   : > { %v3846_v22 = vpop.permute.xlu2 %3845  ;;  %3342 = vst.msk [vmem:[#allocation3 + $0x150] sm:$0xff] %vm1370_vm5, %v3268_v31  ;;  %v4417_v12 = vld [vmem:[#allocation3 + $0x140] sm:$0xff]  ;;  %v4151_v31 = vld [vmem:[#allocation2 + $0x199] sm:$0xff] }
 0x592   : > { %3534 = vst.msk [vmem:[#allocation3 + $0x150] sm:$0xff] %vm1563_vm6, %v3460_v41  ;;  %4635 = vmatmul.f32.gmra.mxu2 %v4417_v12  ;;  %v8405_v32 = vpop.f32.mrf.mxu2 }
 0x593   : > { %3726 = vst.msk [vmem:[#allocation3 + $0x150] sm:$0xff] %vm1756_vm7, %v3652_v24 }
 0x595   : > { %4047 = vrot.lane.b32.xlu2 %v8149_v11, %s5773_s15 }
 0x596   : > { %3855 = vrot.lane.b32.xlu1 %v7980_v37, %s5775_s17  ;;  %4239 = vrot.lane.b32.xlu0 %v8339_v1, %s5774_s16  ;;  %v8352_v37 = vpop.f32.mrf.mxu3 }
 0x598   : > { %v3844_v33 = vpop.permute.xlu1 %3843  ;;  %v4228_v7 = vpop.permute.xlu0 %4227 }
 0x599   : > { %v3080_v4 = vpop.permute.xlu2 %3079  ;;  %3918 = vst.msk [vmem:[#allocation3 + $0x150] sm:$0xff] %vm1949_vm8, %v3844_v33 }
 0x59a   : > { %3152 = vst.msk [vmem:[#allocation3 + $0x170] sm:$0xff] %vm1177_vm4, %v3080_v4  ;;  %v8416_v24 = vpop.f32.mrf.mxu2 }
 0x59b   : > { %4110 = vst.msk [vmem:[#allocation3 + $0x150] sm:$0xff] %vm2143_vm9, %v4036_v19 }
 0x59c   : > { %4302 = vst.msk [vmem:[#allocation3 + $0x150] sm:$0xff] %vm2336_vm10, %v4228_v7 }
 0x59d   : > { %3281 = vrot.lane.b32.xlu2 %v3189_v8, %s5778_s20 }
 0x59e   : > { %3089 = vrot.lane.b32.xlu1 %v8261_v61, %s5779_s21  ;;  %3473 = vrot.lane.b32.xlu0 %v8120_v3, %s5777_s19  ;;  %v8368_v3 = vpop.f32.mrf.mxu3  ;;  %v4149_v61 = vld [vmem:[#allocation2 + $0x181] sm:$0xff] }
 0x5a0   : > { %v3078_v14 = vpop.permute.xlu1 %3077  ;;  %v3462_v42 = vpop.permute.xlu0 %3461 }
 0x5a1   : > { %v3656_v5 = vpop.permute.xlu2 %3655  ;;  %3151 = vst.msk [vmem:[#allocation3 + $0x160] sm:$0xff] %vm1177_vm4, %v3078_v14 }
 0x5a2   : > { %3343 = vst.msk [vmem:[#allocation3 + $0x160] sm:$0xff] %vm1370_vm5, %v3270_v59  ;;  %v3959_v59 = vld [vmem:[#allocation2 + $0x198] sm:$0xff]  ;;  %v8428_v4 = vpop.f32.mrf.mxu2 }
 0x5a3   : > { %3535 = vst.msk [vmem:[#allocation3 + $0x160] sm:$0xff] %vm1563_vm6, %v3462_v42  ;;  %v4419_v9 = vld [vmem:[#allocation3 + $0x150] sm:$0xff] }
 0x5a4   : > { %4638 = vmatmul.f32.gmra.mxu2 %v4419_v9  ;;  %v3960_v42 = vld [vmem:[#allocation2 + $0x1a0] sm:$0xff] }
 0x5a5   : > { %3857 = vrot.lane.b32.xlu2 %v8060_v39, %s5775_s17 }
 0x5a6   : > { %3665 = vrot.lane.b32.xlu1 %v8308_v45, %s5776_s18  ;;  %4049 = vrot.lane.b32.xlu0 %v3957_v35, %s5773_s15  ;;  %v8380_v52 = vpop.f32.mrf.mxu3 }
 0x5a8   : > { %v3654_v18 = vpop.permute.xlu1 %3653  ;;  %v4038_v57 = vpop.permute.xlu0 %4037 }
 0x5a9   : > { %v4232_v44 = vpop.permute.xlu2 %4231  ;;  %3727 = vst.msk [vmem:[#allocation3 + $0x160] sm:$0xff] %vm1756_vm7, %v3654_v18 }
 0x5aa   : > { %3919 = vst.msk [vmem:[#allocation3 + $0x160] sm:$0xff] %vm1949_vm8, %v3846_v22 }
 0x5ab   : > { %4111 = vst.msk [vmem:[#allocation3 + $0x160] sm:$0xff] %vm2143_vm9, %v4038_v57 }
 0x5ad   : > { %3091 = vrot.lane.b32.xlu2 %v8290_v56, %s5779_s21  ;;  %v4150_v56 = vld [vmem:[#allocation2 + $0x189] sm:$0xff] }
 0x5ae   : > { %4241 = vrot.lane.b32.xlu1 %v4149_v61, %s5774_s16  ;;  %3283 = vrot.lane.b32.xlu0 %v3190_v13, %s5778_s20  ;;  %v8394_v0 = vpop.f32.mrf.mxu3 }
 0x5b0   : > { %v4230_v63 = vpop.permute.xlu1 %4229  ;;  %v3272_v60 = vpop.permute.xlu0 %3271 }
 0x5b1   : > { %v3466_v6 = vpop.permute.xlu2 %3465  ;;  %4303 = vst.msk [vmem:[#allocation3 + $0x160] sm:$0xff] %vm2336_vm10, %v4230_v63 }
 0x5b2   : > { %3344 = vst.msk [vmem:[#allocation3 + $0x170] sm:$0xff] %vm1370_vm5, %v3272_v60 }
 0x5b5   : > { %3667 = vrot.lane.b32.xlu2 %v8339_v1, %s5776_s18 }
 0x5b6   : > { %3475 = vrot.lane.b32.xlu1 %v8149_v11, %s5777_s19  ;;  %3859 = vrot.lane.b32.xlu0 %v8064_v36, %s5775_s17  ;;  %v3958_v11 = vld [vmem:[#allocation2 + $0x188] sm:$0xff]  ;;  %v8408_v38 = vpop.f32.mrf.mxu3 }
 0x5b8   : > { %v3464_v21 = vpop.permute.xlu1 %3463  ;;  %v4421_v49 = vld [vmem:[#allocation3 + $0x160] sm:$0xff]  ;;  %v3848_v55 = vpop.permute.xlu0 %3847 }
 0x5b9   : > { %v4042_v28 = vpop.permute.xlu2 %4041  ;;  %3536 = vst.msk [vmem:[#allocation3 + $0x170] sm:$0xff] %vm1563_vm6, %v3464_v21  ;;  %4641 = vmatmul.f32.gmra.mxu2 %v4421_v49 }
 0x5ba   : > { %3728 = vst.msk [vmem:[#allocation3 + $0x170] sm:$0xff] %vm1756_vm7, %v3656_v5 }
 0x5bb   : > { %3920 = vst.msk [vmem:[#allocation3 + $0x170] sm:$0xff] %vm1949_vm8, %v3848_v55 }
 0x5bd   : > { %4243 = vrot.lane.b32.xlu2 %v4150_v56, %s5774_s16 }
 0x5be   : > { %4051 = vrot.lane.b32.xlu1 %v3958_v11, %s5773_s15  ;;  %3093 = vrot.lane.b32.xlu0 %v8308_v45, %s5779_s21 }
 0x5c0   : > { %v4040_v25 = vpop.permute.xlu1 %4039  ;;  %v3082_v30 = vpop.permute.xlu0 %3081 }
 0x5c1   : > { %v3276_v41 = vpop.permute.xlu2 %3275  ;;  %4112 = vst.msk [vmem:[#allocation3 + $0x170] sm:$0xff] %vm2143_vm9, %v4040_v25 }
 0x5c2   : > { %4304 = vst.msk [vmem:[#allocation3 + $0x170] sm:$0xff] %vm2336_vm10, %v4232_v44  ;;  %v4152_v44 = vld [vmem:[#allocation2 + $0x1a1] sm:$0xff] }
 0x5c3   : > { %3153 = vst.msk [vmem:[#allocation3 + $0x180] sm:$0xff] %vm1177_vm4, %v3082_v30 }
 0x5c5   : > { %3477 = vrot.lane.b32.xlu2 %v3957_v35, %s5777_s19 }
 0x5c6   : > { %3285 = vrot.lane.b32.xlu1 %v8060_v39, %s5778_s20  ;;  %3669 = vrot.lane.b32.xlu0 %v4149_v61, %s5776_s18  ;;  %v8422_v39 = vpop.f32.mrf.mxu3 }
 0x5c8   : > { %v3274_v19 = vpop.permute.xlu1 %3273  ;;  %v3658_v62 = vpop.permute.xlu0 %3657 }
 0x5c9   : > { %v3852_v45 = vpop.permute.xlu2 %3851  ;;  %3345 = vst.msk [vmem:[#allocation3 + $0x180] sm:$0xff] %vm1370_vm5, %v3274_v19  ;;  %v4423_v16 = vld [vmem:[#allocation3 + $0x170] sm:$0xff] }
 0x5ca   : > { %3537 = vst.msk [vmem:[#allocation3 + $0x180] sm:$0xff] %vm1563_vm6, %v3466_v6  ;;  %4644 = vmatmul.f32.gmra.mxu2 %v4423_v16 }
 0x5cb   : > { %3729 = vst.msk [vmem:[#allocation3 + $0x180] sm:$0xff] %vm1756_vm7, %v3658_v62 }
 0x5cd   : > { %4053 = vrot.lane.b32.xlu2 %v3959_v59, %s5773_s15 }
 0x5ce   : > { %3861 = vrot.lane.b32.xlu1 %v8155_v46, %s5775_s17  ;;  %4245 = vrot.lane.b32.xlu0 %v4151_v31, %s5774_s16  ;;  %v8436_v14 = vpop.f32.mrf.mxu3 }
 0x5d0   : > { %v3850_v22 = vpop.permute.xlu1 %3849  ;;  %v4234_v33 = vpop.permute.xlu0 %4233 }
 0x5d1   : > { %v3086_v12 = vpop.permute.xlu2 %3085  ;;  %3921 = vst.msk [vmem:[#allocation3 + $0x180] sm:$0xff] %vm1949_vm8, %v3850_v22 }
 0x5d2   : > { %3155 = vst.msk [vmem:[#allocation3 + $0x1a0] sm:$0xff] %vm1177_vm4, %v3086_v12 }
 0x5d3   : > { %4113 = vst.msk [vmem:[#allocation3 + $0x180] sm:$0xff] %vm2143_vm9, %v4042_v28 }
 0x5d4   : > { %4305 = vst.msk [vmem:[#allocation3 + $0x180] sm:$0xff] %vm2336_vm10, %v4234_v33 }
 0x5d5   : > { %3287 = vrot.lane.b32.xlu2 %v8064_v36, %s5778_s20  ;;  %v4863_v36 = vld [vmem:[%s9353_s5 + $0x8] sm:$0xff] }
 0x5d6   : > { %3095 = vrot.lane.b32.xlu1 %v8339_v1, %s5779_s21  ;;  %3479 = vrot.lane.b32.xlu0 %v3958_v11, %s5777_s19  ;;  %v8443_v1 = vpop.f32.mrf.mxu2  ;;  %v8452_v57 = vpop.f32.mrf.mxu3 }
 0x5d7   : > { %4882 = vmatpush.msrb.mxu1 %v4863_v36 }
 0x5d8   : > { %v3084_v46 = vpop.permute.xlu1 %3083  ;;  %v3468_v8 = vpop.permute.xlu0 %3467 }
 0x5d9   : > { %v3662_v7 = vpop.permute.xlu2 %3661  ;;  %3154 = vst.msk [vmem:[#allocation3 + $0x190] sm:$0xff] %vm1177_vm4, %v3084_v46 }
 0x5da   : > { %3346 = vst.msk [vmem:[#allocation3 + $0x190] sm:$0xff] %vm1370_vm5, %v3276_v41 }
 0x5db   : > { %3538 = vst.msk [vmem:[#allocation3 + $0x190] sm:$0xff] %vm1563_vm6, %v3468_v8  ;;  %v4425_v5 = vld [vmem:[#allocation3 + $0x180] sm:$0xff] }
 0x5dc   : > { %4647 = vmatmul.f32.gmra.mxu2 %v4425_v5 }
 0x5dd   : > { %3863 = vrot.lane.b32.xlu2 %v8157_v54, %s5775_s17 }
 0x5de   : > { %3671 = vrot.lane.b32.xlu1 %v4150_v56, %s5776_s18  ;;  %4055 = vrot.lane.b32.xlu0 %v3960_v42, %s5773_s15  ;;  %v8454_v61 = vpop.f32.mrf.mxu2  ;;  %v8461_v60 = vpop.f32.mrf.mxu3 }
 0x5e0   : > { %v3660_v9 = vpop.permute.xlu1 %3659  ;;  %v4044_v18 = vpop.permute.xlu0 %4043 }
 0x5e1   : > { %v4238_v35 = vpop.permute.xlu2 %4237  ;;  %3730 = vst.msk [vmem:[#allocation3 + $0x190] sm:$0xff] %vm1756_vm7, %v3660_v9  ;;  %v8496_v9 = vld [vmem:[%s9352_s4] ss:$0 sm:$0xff] }
 0x5e2   : > { %3922 = vst.msk [vmem:[#allocation3 + $0x190] sm:$0xff] %vm1949_vm8, %v3852_v45 }
 0x5e3   : > { %4114 = vst.msk [vmem:[#allocation3 + $0x190] sm:$0xff] %vm2143_vm9, %v4044_v18 }
 0x5e6   : > { %4247 = vrot.lane.b32.xlu1 %v4152_v44, %s5774_s16  ;;  %v8459_v6 = vpop.f32.mrf.mxu2  ;;  %v8468_v11 = vpop.f32.mrf.mxu3 }
 0x5e8   : > { %v4236_v54 = vpop.permute.xlu1 %4235  ;;  %v3278_v63 = vpop.permute.xlu0 %3277 }
 0x5e9   : > { %v3472_v13 = vpop.permute.xlu2 %3471  ;;  %4306 = vst.msk [vmem:[#allocation3 + $0x190] sm:$0xff] %vm2336_vm10, %v4236_v54 }
 0x5ea   : > { %3347 = vst.msk [vmem:[#allocation3 + $0x1a0] sm:$0xff] %vm1370_vm5, %v3278_v63 }
 0x5ee   : > { %v8466_v56 = vpop.f32.mrf.mxu2  ;;  %v8477_v31 = vpop.f32.mrf.mxu3 }
 0x5f0   : > { %v3470_v21 = vpop.permute.xlu1 %3469  ;;  %v4427_v49 = vld [vmem:[#allocation3 + $0x190] sm:$0xff]  ;;  %v3854_v55 = vpop.permute.xlu0 %3853 }
 0x5f1   : > { %v4048_v28 = vpop.permute.xlu2 %4047  ;;  %3539 = vst.msk [vmem:[#allocation3 + $0x1a0] sm:$0xff] %vm1563_vm6, %v3470_v21  ;;  %4650 = vmatmul.f32.gmra.mxu2 %v4427_v49 }
 0x5f2   : > { %3731 = vst.msk [vmem:[#allocation3 + $0x1a0] sm:$0xff] %vm1756_vm7, %v3662_v7 }
 0x5f3   : > { %3923 = vst.msk [vmem:[#allocation3 + $0x1a0] sm:$0xff] %vm1949_vm8, %v3854_v55 }
 0x5f6   : > { %v8473_v19 = vpop.f32.mrf.mxu2  ;;  %v8486_v7 = vpop.f32.mrf.mxu3 }
 0x5f8   : > { %v4046_v25 = vpop.permute.xlu1 %4045  ;;  %v3088_v30 = vpop.permute.xlu0 %3087 }
 0x5f9   : > { %v3282_v41 = vpop.permute.xlu2 %3281  ;;  %4115 = vst.msk [vmem:[#allocation3 + $0x1a0] sm:$0xff] %vm2143_vm9, %v4046_v25 }
 0x5fa   : > { %4307 = vst.msk [vmem:[#allocation3 + $0x1a0] sm:$0xff] %vm2336_vm10, %v4238_v35 }
 0x5fb   : > { %3156 = vst.msk [vmem:[#allocation3 + $0x1b0] sm:$0xff] %vm1177_vm4, %v3088_v30 }
 0x5fe   : > { %v8480_v22 = vpop.f32.mrf.mxu2  ;;  %v4749_v44 = vpop.f32.mrf.mxu3 }
 0x600   : > { %v3280_v45 = vpop.permute.xlu1 %3279  ;;  %v3664_v16 = vpop.permute.xlu0 %3663 }
 0x601   : > { %v3858_v62 = vpop.permute.xlu2 %3857  ;;  %3348 = vst.msk [vmem:[#allocation3 + $0x1b0] sm:$0xff] %vm1370_vm5, %v3280_v45  ;;  %v4429_v59 = vld [vmem:[#allocation3 + $0x1a0] sm:$0xff] }
 0x602   : > { %3540 = vst.msk [vmem:[#allocation3 + $0x1b0] sm:$0xff] %vm1563_vm6, %v3472_v13  ;;  %4653 = vmatmul.f32.gmra.mxu2 %v4429_v59  ;;  %v4438_v59 = vld [vmem:[#allocation3 + $0x1e8] sm:$0xff] }
 0x603   : > { %3732 = vst.msk [vmem:[#allocation3 + $0x1b0] sm:$0xff] %vm1756_vm7, %v3664_v16  ;;  %5727 = vmatmul.msk.f32.gmra.mxu3 %vm333_vm1, %v4438_v59 }
 0x606   : > { %v8488_v8 = vpop.f32.mrf.mxu2 }
 0x608   : > { %v3856_v12 = vpop.permute.xlu1 %3855  ;;  %v4240_v46 = vpop.permute.xlu0 %4239 }
 0x609   : > { %v3092_v33 = vpop.permute.xlu2 %3091  ;;  %3924 = vst.msk [vmem:[#allocation3 + $0x1b0] sm:$0xff] %vm1949_vm8, %v3856_v12 }
 0x60a   : > { %3158 = vst.msk [vmem:[#allocation3 + $0x1d0] sm:$0xff] %vm1177_vm4, %v3092_v33 }
 0x60b   : > { %4116 = vst.msk [vmem:[#allocation3 + $0x1b0] sm:$0xff] %vm2143_vm9, %v4048_v28 }
 0x60c   : > { %4308 = vst.msk [vmem:[#allocation3 + $0x1b0] sm:$0xff] %vm2336_vm10, %v4240_v46 }
 0x610   : > { %v3090_v5 = vpop.permute.xlu1 %3089  ;;  %v3474_v42 = vpop.permute.xlu0 %3473 }
 0x611   : > { %3157 = vst.msk [vmem:[#allocation3 + $0x1c0] sm:$0xff] %vm1177_vm4, %v3090_v5  ;;  %v3668_v21 = vpop.permute.xlu2 %3667 }
 0x612   : > { %3349 = vst.msk [vmem:[#allocation3 + $0x1c0] sm:$0xff] %vm1370_vm5, %v3282_v41 }
 0x613   : > { %3541 = vst.msk [vmem:[#allocation3 + $0x1c0] sm:$0xff] %vm1563_vm6, %v3474_v42  ;;  %v4431_v36 = vld [vmem:[#allocation3 + $0x1b0] sm:$0xff] }
 0x614   : > { %4656 = vmatmul.f32.gmra.mxu2 %v4431_v36 }
 0x615   : > { %v4636_v35 = vpop.f32.mrf.mxu2 }
 0x616   : > { %v4637_v18 = vadd.f32 %v8496_v9, %v4636_v35  ;;  %v4440_v35 = vld [vmem:[#allocation3 + $0x1f8] sm:$0xff] }
 0x617   : > { %5728 = vmatmul.msk.f32.gmra.mxu3 %vm333_vm1, %v4440_v35 }
 0x618   : > { %v8499_v54 = vadd.f32 %v4749_v44, %v4637_v18  ;;  %v3666_v13 = vpop.permute.xlu1 %3665  ;;  %v4050_v63 = vpop.permute.xlu0 %4049 }
 0x619   : > { %3733 = vst.msk [vmem:[#allocation3 + $0x1c0] sm:$0xff] %vm1756_vm7, %v3666_v13  ;;  %v4244_v41 = vpop.permute.xlu2 %4243 }
 0x61a   : > { %3925 = vst.msk [vmem:[#allocation3 + $0x1c0] sm:$0xff] %vm1949_vm8, %v3858_v62 }
 0x61b   : > { %4117 = vst.msk [vmem:[#allocation3 + $0x1c0] sm:$0xff] %vm2143_vm9, %v4050_v63 }
 0x620   : > { %v4242_v49 = vpop.permute.xlu1 %4241  ;;  %v3284_v28 = vpop.permute.xlu0 %3283 }
 0x621   : > { %4309 = vst.msk [vmem:[#allocation3 + $0x1c0] sm:$0xff] %vm2336_vm10, %v4242_v49  ;;  %v3478_v16 = vpop.permute.xlu2 %3477 }
 0x622   : > { %3350 = vst.msk [vmem:[#allocation3 + $0x1d0] sm:$0xff] %vm1370_vm5, %v3284_v28 }
 0x628   : > { %v3476_v55 = vpop.permute.xlu1 %3475  ;;  %v4433_v25 = vld [vmem:[#allocation3 + $0x1c0] sm:$0xff]  ;;  %v3860_v30 = vpop.permute.xlu0 %3859 }
 0x629   : > { %3542 = vst.msk [vmem:[#allocation3 + $0x1d0] sm:$0xff] %vm1563_vm6, %v3476_v55  ;;  %4659 = vmatmul.f32.gmra.mxu2 %v4433_v25  ;;  %v4054_v5 = vpop.permute.xlu2 %4053  ;;  %v4862_v25 = vld [vmem:[%s9353_s5] sm:$0xff] }
 0x62a   : > { %3734 = vst.msk [vmem:[#allocation3 + $0x1d0] sm:$0xff] %vm1756_vm7, %v3668_v21  ;;  %4883 = vmatpush.msrb.mxu1 %v4862_v25 }
 0x62b   : > { %3926 = vst.msk [vmem:[#allocation3 + $0x1d0] sm:$0xff] %vm1949_vm8, %v3860_v30 }
 0x630   : > { %v4052_v45 = vpop.permute.xlu1 %4051  ;;  %v3094_v62 = vpop.permute.xlu0 %3093 }
 0x631   : > { %4118 = vst.msk [vmem:[#allocation3 + $0x1d0] sm:$0xff] %vm2143_vm9, %v4052_v45  ;;  %v3288_v18 = vpop.permute.xlu2 %3287  ;;  %v8533_v45 = vpop.f32.mrf.mxu3 }
 0x632   : > { %4310 = vst.msk [vmem:[#allocation3 + $0x1d0] sm:$0xff] %vm2336_vm10, %v4244_v41  ;;  %v4889_v41 = vld [vmem:[%s9355_s7] sm:$0xf] }
 0x633   : > { %3159 = vst.msk [vmem:[#allocation3 + $0x1e0] sm:$0xff] %vm1177_vm4, %v3094_v62  ;;  %5730 = vmatpush.msk.msrb.mxu3 %vm4895_vm11, %v4889_v41  ;;  %v8535_v62 = vpop.f32.mrf.mxu2 }
 0x638   : > { %v3286_v12 = vpop.permute.xlu1 %3285  ;;  %v3670_v33 = vpop.permute.xlu0 %3669 }
 0x639   : > { %3351 = vst.msk [vmem:[#allocation3 + $0x1e0] sm:$0xff] %vm1370_vm5, %v3286_v12  ;;  %v4435_v46 = vld [vmem:[#allocation3 + $0x1d0] sm:$0xff]  ;;  %v3864_v49 = vpop.permute.xlu2 %3863 }
 0x63a   : > { %3543 = vst.msk [vmem:[#allocation3 + $0x1e0] sm:$0xff] %vm1563_vm6, %v3478_v16  ;;  %4662 = vmatmul.f32.gmra.mxu2 %v4435_v46  ;;  %v8537_v16 = vpop.f32.mrf.mxu3  ;;  %v4580_v46 = vadd.f32 %v8496_v9, %v8297_v53 }
 0x63b   : > { %3735 = vst.msk [vmem:[#allocation3 + $0x1e0] sm:$0xff] %vm1756_vm7, %v3670_v33 }
 0x63c   : > { %v8539_v59 = vpop.f32.mrf.mxu2  ;;  %v8554_v35 = vadd.f32 %v8009_v50, %v4580_v46  ;;  %v4604_v46 = vadd.f32 %v8496_v9, %v8396_v20  ;;  %v4610_v20 = vadd.f32 %v8496_v9, %v8416_v24  ;;  %v4616_v24 = vadd.f32 %v8496_v9, %v8443_v1 }
 0x63d   : > { %v4622_v1 = vadd.f32 %v8496_v9, %v8459_v6  ;;  %v4628_v6 = vadd.f32 %v8496_v9, %v8473_v19  ;;  %v4634_v19 = vadd.f32 %v8496_v9, %v8488_v8 }
 0x640   : > { %v3862_v42 = vpop.permute.xlu1 %3861  ;;  %v4246_v36 = vpop.permute.xlu0 %4245 }
 0x641   : > { %3927 = vst.msk [vmem:[#allocation3 + $0x1e0] sm:$0xff] %vm1949_vm8, %v3862_v42  ;;  %v4583_v42 = vadd.f32 %v8496_v9, %v8310_v2  ;;  %v4786_v2 = vsel %vm333_vm1, %v8554_v35, 0.0 }
 0x642   : > { %4119 = vst.msk [vmem:[#allocation3 + $0x1e0] sm:$0xff] %vm2143_vm9, %v4054_v5  ;;  %v8541_v12 = vpop.f32.mrf.mxu3  ;;  %v4577_v5 = vadd.f32 %v8496_v9, %v8286_v29  ;;  %v4589_v29 = vadd.f32 %v8496_v9, %v8335_v51  ;;  %v4595_v51 = vadd.f32 %v8496_v9, %v8361_v34  ;;  %v4601_v34 = vadd.f32 %v8496_v9, %v8383_v26 }
 0x643   : > { %4311 = vst.msk [vmem:[#allocation3 + $0x1e0] sm:$0xff] %vm2336_vm10, %v4246_v36  ;;  %v4607_v26 = vadd.f32 %v8496_v9, %v8405_v32  ;;  %v4613_v32 = vadd.f32 %v8496_v9, %v8428_v4  ;;  %v4619_v4 = vadd.f32 %v8496_v9, %v8454_v61  ;;  %v4625_v61 = vadd.f32 %v8496_v9, %v8466_v56 }
 0x644   : > { %v8596_v25 = vadd.f32 %v8319_v43, %v4595_v51  ;;  %v4631_v56 = vadd.f32 %v8496_v9, %v8480_v22 }
 0x646   : > { %v4796_v43 = vsel %vm333_vm1, %v8596_v25, 0.0 }
 0x648   : > { %v3096_v44 = vpop.permute.xlu1 %3095  ;;  %v3480_v13 = vpop.permute.xlu0 %3479 }
 0x649   : > { %3160 = vst.msk [vmem:[#allocation3 + $0x1f0] sm:$0xff] %vm1177_vm4, %v3096_v44  ;;  %v8559_v44 = vadd.f32 %v7991_v40, %v4577_v5  ;;  %vm5565_vm4 = vcmask 261120  }
 0x64a   : > { %3352 = vst.msk [vmem:[#allocation3 + $0x1f0] sm:$0xff] %vm1370_vm5, %v3288_v18  ;;  %v4437_v63 = vld [vmem:[#allocation3 + $0x1e0] sm:$0xff]  ;;  %v8551_v36 = vpop.f32.mrf.mxu3  ;;  %v4586_v18 = vadd.f32 %v8496_v9, %v8323_v10  ;;  %v4592_v10 = vadd.f32 %v8496_v9, %v8349_v17  ;;  %v4598_v17 = vadd.f32 %v8496_v9, %v8373_v48  ;;  %vm5571_vm5 = vcmask 523264  }
 0x64b   : > { %3544 = vst.msk [vmem:[#allocation3 + $0x1f0] sm:$0xff] %vm1563_vm6, %v3480_v13  ;;  %4665 = vmatmul.f32.gmra.mxu2 %v4437_v63  ;;  %v8562_v13 = vadd.f32 %v8070_v15, %v4583_v42  ;;  %v4785_v40 = vsel %vm333_vm1, %v8559_v44, 0.0  ;;  %v8580_v63 = vadd.f32 %v8170_v27, %v4589_v29  ;;  %v8612_v42 = vadd.f32 %v8352_v37, %v4601_v34 }
 0x64c   : > { %v8571_v50 = vadd.f32 %v8091_v47, %v4586_v18  ;;  %v8605_v48 = vadd.f32 %v8333_v23, %v4598_v17  ;;  %v8619_v23 = vadd.f32 %v8368_v3, %v4604_v46  ;;  %vm5574_vm6 = vcmask 654336  }
 0x64d   : > { %v8543_v33 = vpop.f32.mrf.mxu2  ;;  %v4788_v15 = vsel %vm333_vm1, %v8562_v13, 0.0  ;;  %v4792_v27 = vsel %vm333_vm1, %v8580_v63, 0.0  ;;  %v4800_v37 = vsel %vm333_vm1, %v8612_v42, 0.0 }
 0x64e   : > { %v4790_v47 = vsel %vm333_vm1, %v8571_v50, 0.0  ;;  %v4798_v29 = vsel %vm333_vm1, %v8605_v48, 0.0  ;;  %v4802_v3 = vsel %vm333_vm1, %v8619_v23, 0.0 }
 0x650   : > { %v3672_v21 = vpop.permute.xlu1 %3671  ;;  %v4056_v28 = vpop.permute.xlu0 %4055 }
 0x651   : > { %3736 = vst.msk [vmem:[#allocation3 + $0x1f0] sm:$0xff] %vm1756_vm7, %v3672_v21  ;;  %v4787_v21 = vadd.f32 %v4786_v2, %v4785_v40  ;;  %v8628_v40 = vadd.f32 %v8380_v52, %v4607_v26  ;;  %v8642_v52 = vadd.f32 %v8408_v38, %v4613_v32  ;;  %v8656_v38 = vadd.f32 %v8436_v14, %v4619_v4 }
 0x652   : > { %3928 = vst.msk [vmem:[#allocation3 + $0x1f0] sm:$0xff] %vm1949_vm8, %v3864_v49  ;;  %v8587_v49 = vadd.f32 %v8185_v58, %v4592_v10  ;;  %vm5577_vm7 = vcmask 785408   ;;  %vm5580_vm8 = vcmask 916480  }
 0x653   : > { %4120 = vst.msk [vmem:[#allocation3 + $0x1f0] sm:$0xff] %vm2143_vm9, %v4056_v28  ;;  %v4789_v28 = vadd.f32 %v4788_v15, %v4787_v21  ;;  %v8635_v21 = vadd.f32 %v8394_v0, %v4610_v20  ;;  %v4804_v17 = vsel %vm333_vm1, %v8628_v40, 0.0  ;;  %v8649_v0 = vadd.f32 %v8422_v39, %v4616_v24 }
 0x654   : > { %v4794_v58 = vsel %vm333_vm1, %v8587_v49, 0.0  ;;  %v4812_v14 = vsel %vm333_vm1, %v8656_v38, 0.0  ;;  %v8689_v24 = vadd.f32 %v8486_v7, %v4634_v19  ;;  %v4646_v7 = vadd.f32 %v8496_v9, %v8543_v33 }
 0x655   : > { %v4791_v41 = vadd.f32 %v4790_v47, %v4789_v28  ;;  %v4810_v39 = vsel %vm333_vm1, %v8649_v0, 0.0 }
 0x656   : > { %v4822_v4 = vsel %vm333_vm1, %v8689_v24, 0.0 }
 0x657   : > { %v4793_v5 = vadd.f32 %v4792_v27, %v4791_v41  ;;  %v4806_v27 = vsel %vm333_vm1, %v8635_v21, 0.0  ;;  %v4808_v41 = vsel %vm333_vm1, %v8642_v52, 0.0 }
 0x658   : > { %v4248_v55 = vpop.permute.xlu1 %4247 }
 0x659   : > { %4312 = vst.msk [vmem:[#allocation3 + $0x1f0] sm:$0xff] %vm2336_vm10, %v4248_v55  ;;  %v8591_v55 = vpop.f32.mrf.mxu3  ;;  %v4795_v18 = vadd.f32 %v4794_v58, %v4793_v5 }
 0x65b   : > { %v4797_v2 = vadd.f32 %v4796_v43, %v4795_v18  ;;  %v8663_v43 = vadd.f32 %v8452_v57, %v4622_v1  ;;  %v8670_v18 = vadd.f32 %v8461_v60, %v4625_v61  ;;  %v8677_v57 = vadd.f32 %v8468_v11, %v4628_v6 }
 0x65c   : > { %v8684_v60 = vadd.f32 %v8477_v31, %v4631_v56  ;;  %v4640_v11 = vadd.f32 %v8496_v9, %v8535_v62  ;;  %v4643_v31 = vadd.f32 %v8496_v9, %v8539_v59  ;;  %v4824_v62 = vsel %vm333_vm1, %v8499_v54, 0.0 }
 0x65d   : > { %v4799_v15 = vadd.f32 %v4798_v29, %v4797_v2  ;;  %v4814_v20 = vsel %vm333_vm1, %v8663_v43, 0.0 }
 0x65e   : > { %v8707_v1 = vadd.f32 %v8537_v16, %v4643_v31 }
 0x65f   : > { %v8566_v53 = vpop.f32.mrf.mxu2  ;;  %v4801_v47 = vadd.f32 %v4800_v37, %v4799_v15  ;;  %v4816_v37 = vsel %vm333_vm1, %v8670_v18, 0.0 }
 0x660   : > { %v4439_v30 = vld [vmem:[#allocation3 + $0x1f0] sm:$0xff]  ;;  %v4649_v59 = vadd.f32 %v8496_v9, %v8566_v53  ;;  %v4828_v16 = vsel %vm333_vm1, %v8707_v1, 0.0 }
 0x661   : > { %4668 = vmatmul.f32.gmra.mxu2 %v4439_v30  ;;  %v8623_v10 = vpop.f32.mrf.mxu3  ;;  %v4803_v28 = vadd.f32 %v4802_v3, %v4801_v47  ;;  %v4818_v3 = vsel %vm333_vm1, %v8677_v57, 0.0  ;;  %v4820_v47 = vsel %vm333_vm1, %v8684_v60, 0.0 }
 0x662   : > { %v8721_v6 = vadd.f32 %v8551_v36, %v4649_v59 }
 0x663   : > { %v4805_v34 = vadd.f32 %v4804_v17, %v4803_v28  ;;  %v8700_v28 = vadd.f32 %v8533_v45, %v4640_v11  ;;  %v8714_v45 = vadd.f32 %v8541_v12, %v4646_v7 }
 0x665   : > { %v4807_v46 = vadd.f32 %v4806_v27, %v4805_v34  ;;  %v4826_v61 = vsel %vm333_vm1, %v8700_v28, 0.0 }
 0x667   : > { %v4809_v26 = vadd.f32 %v4808_v41, %v4807_v46 }
 0x669   : > { %v4770_v58 = vpop.f32.mrf.mxu3  ;;  %v4811_v29 = vadd.f32 %v4810_v39, %v4809_v26 }
 0x66b   : > { %v4813_v2 = vadd.f32 %v4812_v14, %v4811_v29  ;;  %v4830_v14 = vsel %vm333_vm1, %v8714_v45, 0.0  ;;  %v4832_v29 = vsel %vm333_vm1, %v8721_v6, 0.0 }
 0x66d   : > { %v4815_v15 = vadd.f32 %v4814_v20, %v4813_v2 }
 0x66f   : > { %v4817_v8 = vadd.f32 %v4816_v37, %v4815_v15 }
 0x671   : > { %v4773_v32 = vpop.f32.mrf.mxu3  ;;  %v4819_v17 = vadd.f32 %v4818_v3, %v4817_v8  ;;  %v5783_v3 = vmov 256.0  }
 0x672   : > { %5758 = vrcp.f32 %v5783_v3 }
 0x673   : > { %v4821_v27 = vadd.f32 %v4820_v47, %v4819_v17 }
 0x674   : > { %v8600_v30 = vpop.f32.mrf.mxu2 }
 0x675   : > { %v4823_v34 = vadd.f32 %v4822_v4, %v4821_v27  ;;  %v4652_v33 = vadd.f32 %v8496_v9, %v8600_v30 }
 0x677   : > { %v4825_v39 = vadd.f32 %v4824_v62, %v4823_v34  ;;  %v8727_v12 = vadd.f32 %v8591_v55, %v4652_v33 }
 0x678   : > { %v5759_v7 = vpop.eup %5758 }
 0x679   : > { %v4776_v46 = vpop.f32.mrf.mxu3  ;;  %v4827_v26 = vadd.f32 %v4826_v61, %v4825_v39  ;;  %v4834_v2 = vsel %vm333_vm1, %v8727_v12, 0.0  ;;  %v4855_v33 = vmul.f32 256.0, %v5759_v7  ;;  %vm4859_vm12 = vweird.f32 %v5759_v7 }
 0x67b   : > { %v4829_v30 = vadd.f32 %v4828_v16, %v4827_v26  ;;  %v4856_v26 = vsub.f32 1.0, %v4855_v33 }
 0x67d   : > { %v4831_v19 = vadd.f32 %v4830_v14, %v4829_v30  ;;  %v4857_v30 = vmul.f32 %v5759_v7, %v4856_v26 }
 0x67f   : > { %v4833_v15 = vadd.f32 %v4832_v29, %v4831_v19  ;;  %v4858_v19 = vadd.f32 %v5759_v7, %v4857_v30 }
 0x681   : > { %v4835_v8 = vadd.f32 %v4834_v2, %v4833_v15 }
 0x685   : > { %v4654_v51 = vpop.f32.mrf.mxu2 }
 0x686   : > { %v4655_v53 = vadd.f32 %v8496_v9, %v4654_v51 }
 0x688   : > { %v8733_v20 = vadd.f32 %v8623_v10, %v4655_v53 }
 0x68a   : > { %v4836_v11 = vsel %vm333_vm1, %v8733_v20, 0.0 }
 0x697   : > { %v4657_v5 = vpop.f32.mrf.mxu2 }
 0x698   : > { %v4658_v56 = vadd.f32 %v8496_v9, %v4657_v5  ;;  %v4779_v5 = vpop.f32.mrf.mxu3 }
 0x69a   : > { %v8738_v37 = vadd.f32 %v4770_v58, %v4658_v56  ;;  %v4837_v58 = vadd.f32 %v4836_v11, %v4835_v8  ;;  %v4890_v8 = vld [vmem:[%s9356_s8] sm:$0x1] }
 0x69c   : > { %v4838_v47 = vsel %vm333_vm1, %v8738_v37, 0.0 }
 0x69d   : > { %v4839_v27 = vadd.f32 %v4838_v47, %v4837_v58 }
 0x6a0   : > { %v4782_v34 = vpop.f32.mrf.mxu3 }
 0x6ac   : > { %v4660_v22 = vpop.f32.mrf.mxu2 }
 0x6ad   : > { %v4661_v36 = vadd.f32 %v8496_v9, %v4660_v22 }
 0x6af   : > { %v8743_v10 = vadd.f32 %v4773_v32, %v4661_v36 }
 0x6b1   : > { %v4840_v17 = vsel %vm333_vm1, %v8743_v10, 0.0 }
 0x6b2   : > { %v4841_v62 = vadd.f32 %v4840_v17, %v4839_v27 }
 0x6bd   : > { %v4663_v41 = vpop.f32.mrf.mxu2 }
 0x6be   : > { %v4664_v55 = vadd.f32 %v8496_v9, %v4663_v41 }
 0x6c0   : > { %v8748_v31 = vadd.f32 %v4776_v46, %v4664_v55  ;;  %v4860_v55 = vsel %vm4859_vm12, %v5759_v7, %v4858_v19 }
 0x6c2   : > { %v4842_v32 = vsel %vm333_vm1, %v8748_v31, 0.0 }
 0x6c3   : > { %v4843_v46 = vadd.f32 %v4842_v32, %v4841_v62 }
 0x6ce   : > { %v4666_v51 = vpop.f32.mrf.mxu2 }
 0x6cf   : > { %v4667_v22 = vadd.f32 %v8496_v9, %v4666_v51 }
 0x6d1   : > { %v8752_v4 = vadd.f32 %v4779_v5, %v4667_v22  ;;  %v4864_v5 = vld [vmem:[%s9354_s6] sm:$0x1] }
 0x6d3   : > { %v4844_v41 = vsel %vm333_vm1, %v8752_v4, 0.0 }
 0x6d4   : > { %v4845_v16 = vadd.f32 %v4844_v41, %v4843_v46 }
 0x6e4   : > { %v4669_v59 = vpop.f32.mrf.mxu2 }
 0x6e5   : > { %v4670_v61 = vadd.f32 %v8496_v9, %v4669_v59 }
 0x6e7   : > { %v8759_v39 = vadd.f32 %v4782_v34, %v4670_v61 }
 0x6e9   : > { %v4846_v53 = vsel %vm333_vm1, %v8759_v39, 0.0 }
 0x6ea   : > { %v4847_v14 = vadd.f32 %v4846_v53, %v4845_v16 }
 0x6ec   : > { %v4848_v56 = vrot.slane %v4847_v14, 4 }
 0x6ee   : > { %v4849_v29 = vadd.f32 %v4848_v56, %v4847_v14 }
 0x6f0   : > { %v4850_v36 = vrot.slane %v4849_v29, 2 }
 0x6f2   : > { %v4851_v51 = vadd.f32 %v4850_v36, %v4849_v29 }
 0x6f4   : > { %v4852_v2 = vrot.slane %v4851_v51, 1 }
 0x6f6   : > { %v4853_v9 = vadd.f32 %v4852_v2, %v4851_v51  ;;  %v9467_v2 = vld [vmem:[#allocation10_spill] sm:$0xff] }
 0x6f8   : > { %v4861_v15 = vmul.f32 %v4860_v55, %v4853_v9  ;;  %v9468_v55 = vld [vmem:[#allocation7_spill] sm:$0xff]  ;;  %v9469_v9 = vld [vmem:[#allocation13_spill] sm:$0xff] }
 0x6fa   : > { %5729 = vmatmul.msk.f32.vlgmr.msrb.gmra.mxu1 %vm333_vm1, %v4861_v15  ;;  %v9470_v15 = vld [vmem:[#allocation6_spill] sm:$0xff] }
 0x777   : > { %v4885_v3 = vpop.f32.mrf.mxu1 }
 0x778   : > { %v4886_v11 = vadd.f32 %v4885_v3, %v4864_v5  ;;  %v9471_v5 = vld [vmem:[#allocation12_spill] sm:$0xff]  ;;  %v9472_v3 = vld [vmem:[#allocation9_spill] sm:$0xff] }
 0x77a   : > { %v4888_v22 = vmax.f32 %v4886_v11, 0.0 }
 0x77c   : > { %5731 = vmatmul.msk.f32.vlgmr.msrb.gmra.mxu3 %vm4891_vm13, %v4888_v22  ;;  %v9473_v22 = vld [vmem:[#allocation11_spill] sm:$0xff] }
 0x7ff   : > { %v4916_v47 = vpop.f32.mrf.mxu3 }
 0x800   : > { %v4917_v58 = vadd.f32 %v4916_v47, %v4890_v8  ;;  %v9474_v47 = vld [vmem:[#allocation8_spill] sm:$0xff] }
 0x802   : > { %v5732_v17 = vmul.f32 -1.442695, %v4917_v58 }
 0x804   : > { %5760 = vpow2.f32 %v5732_v17 }
 0x80a   : > { %v5761_v7 = vpop.eup %5760 }
 0x80b   : > { %v4922_v27 = vadd.f32 1.0, %v5761_v7 }
 0x80d   : > { %5762 = vrcp.f32 %v4922_v27  ;;  %v4934_v41 = vand.u32 2147483648, %v4922_v27  ;;  %v4932_v61 = vand.u32 2147483647, %v4922_v27  ;;  %vm4928_vm15 = vweird.f32 %v4922_v27 }
 0x80f   : > { %v4935_v16 = vor.u32 1.1754944e-38, %v4934_v41  ;;  %vm4933_vm3 = vcmp.eq.f32.partialorder %v4932_v61, 8.507059e+37 }
 0x813   : > { %v5763_v32 = vpop.eup %5762 }
 0x814   : > { %v4924_v62 = vmul.f32 %v5763_v32, %v4922_v27  ;;  %vm4929_vm14 = vweird.f32 %v5763_v32 }
 0x815   : > { %vm4930_vm2 = vmor %vm4928_vm15, %vm4929_vm14 }
 0x816   : > { %v4925_v59 = vsub.f32 1.0, %v4924_v62 }
 0x818   : > { %v4926_v34 = vmul.f32 %v5763_v32, %v4925_v59 }
 0x81a   : > { %v4927_v33 = vadd.f32 %v5763_v32, %v4926_v34  ;;  %v9475_v34 = vld [vmem:[#allocation4_spill] sm:$0xff] }
 0x81c   : > { %v4931_v46 = vsel %vm4930_vm2, %v5763_v32, %v4927_v33 }
 0x81d   : > { %v4936_v53 = vsel %vm4933_vm3, %v4935_v16, %v4931_v46 }
 0x81e   : > { %v8770_v26 = vperm.slane %v4936_v53, 0 }
 0x820   : > { %v4959_v14 = vmul.f32 %v8770_v26, %v8499_v54  ;;  %v4961_v56 = vmul.f32 %v8770_v26, %v8707_v1  ;;  %v4955_v30 = vmul.f32 %v8770_v26, %v8670_v18  ;;  %v4957_v29 = vmul.f32 %v8770_v26, %v8684_v60 }
 0x821   : > { %v4963_v36 = vmul.f32 %v8770_v26, %v8721_v6  ;;  %v4965_v19 = vmul.f32 %v8770_v26, %v8733_v20  ;;  %v4967_v51 = vmul.f32 %v8770_v26, %v8743_v10  ;;  %v4969_v54 = vmul.f32 %v8770_v26, %v8752_v4 }
 0x822   : > { %v8789_v1 = vadd.f32 %v4959_v14, %v9467_v2  ;;  %v8792_v18 = vadd.f32 %v4961_v56, %v9468_v55  ;;  %v8801_v20 = vadd.f32 %v4955_v30, %v9471_v5  ;;  %v8804_v10 = vadd.f32 %v4957_v29, %v9472_v3  ;;  %v9479_v55 = vld [vmem:[#allocation20_spill] sm:$0xff] }
 0x823   : > { %v8795_v60 = vadd.f32 %v4967_v51, %v9469_v9  ;;  %v8798_v6 = vadd.f32 %v4969_v54, %v9470_v15  ;;  %v8809_v8 = vadd.f32 %v4963_v36, %v9473_v22  ;;  %v8812_v58 = vadd.f32 %v4965_v19, %v9474_v47  ;;  %v9476_v36 = vld [vmem:[#allocation16_spill] sm:$0xff]  ;;  %v9477_v51 = vld [vmem:[#allocation17_spill] sm:$0xff]  ;;  %v9482_v22 = vld [vmem:[#allocation15_spill] sm:$0xff] }
 0x824   : > { %v5115_v4 = vrot.slane %v8789_v1, 4  ;;  %v5127_v11 = vrot.slane %v8792_v18, 4  ;;  %v4943_v27 = vmul.f32 %v8770_v26, %v8580_v63  ;;  %v4945_v59 = vmul.f32 %v8770_v26, %v8596_v25  ;;  %v9480_v15 = vld [vmem:[#allocation21_spill] sm:$0xff] }
 0x825   : > { %v5139_v17 = vrot.slane %v8795_v60, 4  ;;  %v5151_v7 = vrot.slane %v8798_v6, 4  ;;  %v4951_v63 = vmul.f32 %v8770_v26, %v8642_v52  ;;  %v4953_v46 = vmul.f32 %v8770_v26, %v8656_v38 }
 0x826   : > { %v5116_v32 = vsel %vm472_vm0, %v5115_v4, %v8801_v20  ;;  %v5128_v62 = vsel %vm472_vm0, %v5127_v11, %v8804_v10  ;;  %v4939_v25 = vmul.f32 %v8770_v26, %v8559_v44  ;;  %v4941_v56 = vmul.f32 %v8770_v26, %v8562_v13  ;;  %v9478_v13 = vld [vmem:[#allocation5_spill] sm:$0xff]  ;;  %v9481_v4 = vld [vmem:[#allocation14_spill] sm:$0xff] }
 0x827   : > { %v8825_v41 = vperm.slane %v5128_v62, %v9475_v34  ;;  %v5140_v61 = vsel %vm472_vm0, %v5139_v17, %v8809_v8  ;;  %v5152_v33 = vsel %vm472_vm0, %v5151_v7, %v8812_v58  ;;  %v8841_v53 = vperm.slane %v5116_v32, %v9475_v34  ;;  %v9483_v17 = vld [vmem:[#allocation18_spill] sm:$0xff] }
 0x828   : > { %v8836_v16 = vperm.slane %v5152_v33, %v9475_v34  ;;  %v4947_v52 = vmul.f32 %v8770_v26, %v8612_v42  ;;  %v8849_v30 = vperm.slane %v5140_v61, %v9475_v34  ;;  %v4949_v29 = vmul.f32 %v8770_v26, %v8628_v40 }
 0x829   : > { %v5163_v14 = vrot.slane %v8825_v41, 4  ;;  %v8857_v19 = vadd.f32 %v4943_v27, %v9476_v36  ;;  %v8860_v54 = vadd.f32 %v4945_v59, %v9477_v51  ;;  %v8868_v9 = vadd.f32 %v4951_v63, %v9479_v55  ;;  %v9484_v27 = vld [vmem:[#allocation19_spill] sm:$0xff] }
 0x82a   : > { %v5187_v38 = vrot.slane %v8836_v16, 4  ;;  %v8871_v40 = vadd.f32 %v4953_v46, %v9480_v15  ;;  %v8878_v11 = vadd.f32 %v4939_v25, %v9481_v4  ;;  %v8881_v47 = vadd.f32 %v4941_v56, %v9482_v22 }
 0x82b   : > { %v5164_v44 = vsel %vm472_vm0, %v5163_v14, %v8841_v53  ;;  %v8884_v7 = vadd.f32 %v4947_v52, %v9483_v17  ;;  %v8887_v32 = vadd.f32 %v4949_v29, %v9484_v27  ;;  %v5003_v62 = vrot.slane %v8857_v19, 4 }
 0x82c   : > { %v8863_v2 = vperm.slane %v5164_v44, %v9478_v13  ;;  %v5188_v42 = vsel %vm472_vm0, %v5187_v38, %v8849_v30  ;;  %v5015_v61 = vrot.slane %v8860_v54, 4  ;;  %v5027_v33 = vrot.slane %v8868_v9, 4 }
 0x82d   : > { %v8874_v5 = vperm.slane %v5188_v42, %v9478_v13  ;;  %v5039_v63 = vrot.slane %v8871_v40, 4  ;;  %v5004_v46 = vsel %vm472_vm0, %v5003_v62, %v8878_v11  ;;  %v4940_v29 = vmul.f32 %v8770_v26, %v8554_v35 }
 0x82e   : > { %v5213_v3 = vrot.slane %v8863_v2, 4  ;;  %v5010_v25 = vperm.slane %v5004_v46, %v9475_v34  ;;  %v5016_v14 = vsel %vm472_vm0, %v5015_v61, %v8881_v47  ;;  %v5028_v56 = vsel %vm472_vm0, %v5027_v33, %v8884_v7 }
 0x82f   : > { %v5040_v52 = vsel %vm472_vm0, %v5039_v63, %v8887_v32  ;;  %v5034_v38 = vperm.slane %v5028_v56, %v9475_v34  ;;  %v4942_v44 = vmul.f32 %v8770_v26, %v8571_v50  ;;  %v4944_v51 = vmul.f32 %v8770_v26, %v8587_v49  ;;  %v9486_v63 = vld [vmem:[#allocation23_spill] sm:$0xff] }
 0x830   : > { %v5214_v59 = vsel %vm472_vm0, %v8874_v5, %v5213_v3  ;;  %v5053_v36 = vrot.slane %v5010_v25, 4  ;;  %v5022_v42 = vperm.slane %v5016_v14, %v9475_v34  ;;  %v5046_v55 = vperm.slane %v5040_v52, %v9475_v34  ;;  %v9489_v52 = vld [vmem:[#allocation24_spill] sm:$0xff] }
 0x831   : > { %5455 = vrot.lane.b32.xlu0 %v5214_v59, %s5779_s21  ;;  %v5077_v15 = vrot.slane %v5034_v38, 4  ;;  %v4946_v3 = vmul.f32 %v8770_v26, %v8605_v48  ;;  %v4948_v4 = vmul.f32 %v8770_v26, %v8619_v23  ;;  %v4950_v35 = vmul.f32 %v8770_v26, %v8635_v21  ;;  %v9485_v59 = vld [vmem:[#allocation25_spill] sm:$0xff] }
 0x832   : > { %v4952_v50 = vmul.f32 %v8770_v26, %v8649_v0  ;;  %v4954_v49 = vmul.f32 %v8770_v26, %v8663_v43  ;;  %v4956_v22 = vmul.f32 %v8770_v26, %v8677_v57  ;;  %v5054_v17 = vsel %vm472_vm0, %v5022_v42, %v5053_v36 }
 0x833   : > { %v5078_v27 = vsel %vm472_vm0, %v5046_v55, %v5077_v15  ;;  %v4958_v48 = vmul.f32 %v8770_v26, %v8689_v24  ;;  %v4960_v23 = vmul.f32 %v8770_v26, %v8700_v28  ;;  %v4962_v21 = vmul.f32 %v8770_v26, %v8714_v45 }
 0x834   : > { %v5086_v0 = vperm.slane %v5078_v27, %v9478_v13  ;;  %v4964_v43 = vmul.f32 %v8770_v26, %v8727_v12  ;;  %v4966_v57 = vmul.f32 %v8770_v26, %v8738_v37  ;;  %v4968_v62 = vmul.f32 %v8770_v26, %v8748_v31  ;;  %v9487_v12 = vld [vmem:[#allocation29_spill] sm:$0xff]  ;;  %v9488_v37 = vld [vmem:[#allocation26_spill] sm:$0xff] }
 0x835   : > { %v4970_v24 = vmul.f32 %v8770_v26, %v8759_v39  ;;  %v8944_v61 = vadd.f32 %v4940_v29, %v9485_v59  ;;  %v5062_v28 = vperm.slane %v5054_v17, %v9478_v13  ;;  %v5051_v33 = vrot.slane %v5022_v42, 4  ;;  %v9490_v42 = vld [vmem:[#allocation22_spill] sm:$0xff] }
 0x836   : > { %v5103_v45 = vrot.slane %v5086_v0, 4  ;;  %v8948_v46 = vadd.f32 %v4942_v44, %v9486_v63  ;;  %v8951_v14 = vadd.f32 %v4944_v51, %v9487_v12  ;;  %v8954_v56 = vadd.f32 %v4946_v3, %v9488_v37  ;;  %v9491_v44 = vld [vmem:[#allocation27_spill] sm:$0xff]  ;;  %v9492_v3 = vld [vmem:[#allocation28_spill] sm:$0xff] }
 0x837   : > { %v5075_v31 = vrot.slane %v5046_v55, 4  ;;  %v8957_v36 = vadd.f32 %v4948_v4, %v9489_v52  ;;  %v5153_v39 = vrot.slane %v8812_v58, 4  ;;  %v5052_v29 = vsel %vm472_vm0, %v5051_v33, %v5010_v25  ;;  %v9493_v58 = vld [vmem:[#allocation36_spill] sm:$0xff]  ;;  %v9494_v25 = vld [vmem:[#allocation33_spill] sm:$0xff]  ;;  %v9497_v37 = vld [vmem:[#allocation35_spill] sm:$0xff] }
 0x838   : > { %v5104_v26 = vsel %vm472_vm0, %v5103_v45, %v5062_v28  ;;  %v8963_v15 = vadd.f32 %v4950_v35, %v9490_v42  ;;  %v8966_v17 = vadd.f32 %v4952_v50, %v9491_v44  ;;  %v8970_v51 = vperm.slane %v5052_v29, %v9478_v13  ;;  %v9495_v50 = vld [vmem:[#allocation34_spill] sm:$0xff]  ;;  %v9499_v29 = vld [vmem:[#allocation37_spill] sm:$0xff] }
 0x839   : > { %5461 = vrot.lane.b32.xlu1 %v5104_v26, %s5778_s20  ;;  %v5076_v55 = vsel %vm472_vm0, %v5075_v31, %v5034_v38  ;;  %v8974_v4 = vadd.f32 %v4954_v49, %v9492_v3  ;;  %v8977_v27 = vadd.f32 %v4956_v22, %v9493_v58  ;;  %v8980_v59 = vadd.f32 %v4958_v48, %v9494_v25  ;;  %v9496_v49 = vld [vmem:[#allocation31_spill] sm:$0xff]  ;;  %v9498_v26 = vld [vmem:[#allocation32_spill] sm:$0xff] }
 0x83a   : > { %v5017_v35 = vrot.slane %v8881_v47, 4  ;;  %v8984_v45 = vadd.f32 %v4960_v23, %v9495_v50  ;;  %v5117_v33 = vrot.slane %v8801_v20, 4  ;;  %v8988_v63 = vperm.slane %v5076_v55, %v9478_v13 }
 0x83b   : > { %v5101_v38 = vrot.slane %v8970_v51, 4  ;;  %v8992_v12 = vadd.f32 %v4962_v21, %v9496_v49  ;;  %v5129_v22 = vrot.slane %v8804_v10, 4  ;;  %v5141_v48 = vrot.slane %v8809_v8, 4  ;;  %v9500_v8 = vld [vmem:[#allocation30_spill] sm:$0xff] }
 0x83c   : > { %v5154_v47 = vsel %vm472_vm0, %v8798_v6, %v5153_v39  ;;  %v8999_v23 = vadd.f32 %v4964_v43, %v9497_v37  ;;  %v5029_v20 = vrot.slane %v8884_v7, 4  ;;  %v5041_v31 = vrot.slane %v8887_v32, 4 }
 0x83d   : > { %v5102_v52 = vsel %vm472_vm0, %v8988_v63, %v5101_v38  ;;  %v9006_v21 = vadd.f32 %v4966_v57, %v9498_v26  ;;  %v9009_v10 = vadd.f32 %v4968_v62, %v9499_v29  ;;  %v9012_v42 = vadd.f32 %v4970_v24, %v9500_v8 }
 0x83e   : > { %5453 = vrot.lane.b32.xlu2 %v5102_v52, %s5779_s21  ;;  %v5018_v6 = vsel %vm472_vm0, %v8860_v54, %v5017_v35  ;;  %v5005_v7 = vrot.slane %v8878_v11, 4  ;;  %v5118_v32 = vsel %vm472_vm0, %v8789_v1, %v5117_v33  ;;  %v9021_v43 = vperm.slane %v5154_v47, %v9475_v34 }
 0x83f   : > { %v5105_v57 = vrot.slane %v5062_v28, 4  ;;  %v5130_v62 = vsel %vm472_vm0, %v8792_v18, %v5129_v22  ;;  %v5142_v24 = vsel %vm472_vm0, %v8795_v60, %v5141_v48  ;;  %v5227_v39 = vrot.slane %v8951_v14, 4 }
 0x840   : > { %v5239_v44 = vrot.slane %v8954_v56, 4  ;;  %v5030_v54 = vsel %vm472_vm0, %v8868_v9, %v5029_v20  ;;  %v5042_v1 = vsel %vm472_vm0, %v8871_v40, %v5041_v31  ;;  %v5026_v28 = vperm.slane %v5018_v6, %v9475_v34 }
 0x841   : > { %v5106_v11 = vsel %vm472_vm0, %v5086_v0, %v5105_v57  ;;  %v5229_v55 = vrot.slane %v8944_v61, 4  ;;  %v5263_v18 = vrot.slane %v8974_v4, 4  ;;  %v5351_v60 = vrot.slane %v8992_v12, 4 }
 0x842   : > { %v5363_v3 = vrot.slane %v9009_v10, 4  ;;  %5469 = vrot.lane.b32.xlu0 %v5106_v11, %s5777_s19  ;;  %v5006_v9 = vsel %vm472_vm0, %v8857_v19, %v5005_v7  ;;  %v9043_v58 = vperm.slane %v5118_v32, %v9475_v34  ;;  %v9046_v40 = vperm.slane %v5130_v62, %v9475_v34 }
 0x843   : > { %v5199_v0 = vrot.slane %v9021_v43, 4  ;;  %v5038_v25 = vperm.slane %v5030_v54, %v9475_v34  ;;  %v5050_v35 = vperm.slane %v5042_v1, %v9475_v34  ;;  %v5165_v50 = vrot.slane %v8841_v53, 4 }
 0x844   : > { %v5189_v33 = vrot.slane %v8849_v30, 4  ;;  %v5150_v38 = vperm.slane %v5142_v24, %v9475_v34  ;;  %v5228_v19 = vsel %vm472_vm0, %v5227_v39, %v8944_v61  ;;  %v5240_v49 = vsel %vm472_vm0, %v5239_v44, %v8948_v46 }
 0x845   : > { %v5063_v22 = vrot.slane %v5026_v28, 4  ;;  %v5264_v48 = vsel %vm472_vm0, %v5263_v18, %v8963_v15  ;;  %v5014_v47 = vperm.slane %v5006_v9, %v9475_v34  ;;  %v5166_v37 = vsel %vm472_vm0, %v8825_v41, %v5165_v50 }
 0x846   : > { %v5190_v53 = vsel %vm472_vm0, %v8836_v16, %v5189_v33  ;;  %v5174_v30 = vperm.slane %v5166_v37, %v9478_v13  ;;  %v5175_v31 = vrot.slane %v9046_v40, 4  ;;  %v5200_v52 = vsel %vm472_vm0, %v5199_v0, %v5150_v38 }
 0x847   : > { %v5198_v20 = vperm.slane %v5190_v53, %v9478_v13  ;;  %v5089_v26 = vrot.slane %v5038_v25, 4  ;;  %v9070_v29 = vperm.slane %v5200_v52, %v9478_v13  ;;  %v5064_v8 = vsel %vm472_vm0, %v5063_v22, %v5014_v47 }
 0x848   : > { %v5087_v6 = vrot.slane %v5050_v35, 4  ;;  %v9074_v41 = vperm.slane %v5240_v49, %v9475_v34  ;;  %v5217_v7 = vrot.slane %v5174_v30, 4  ;;  %v5176_v32 = vsel %vm472_vm0, %v5175_v31, %v9043_v58 }
 0x849   : > { %v5215_v16 = vrot.slane %v5198_v20, 4  ;;  %v9079_v57 = vperm.slane %v5176_v32, %v9478_v13  ;;  %v5219_v62 = vrot.slane %v9070_v29, 4  ;;  %v5070_v24 = vperm.slane %v5064_v8, %v9478_v13 }
 0x84a   : > { %v5088_v39 = vsel %vm472_vm0, %v5087_v6, %v5038_v25  ;;  %v5218_v44 = vsel %vm472_vm0, %v5198_v20, %v5217_v7  ;;  %v5065_v11 = vrot.slane %v5014_v47, 4  ;;  %v5352_v18 = vsel %vm472_vm0, %v5351_v60, %v8980_v59 }
 0x84b   : > { %v5216_v54 = vsel %vm472_vm0, %v5215_v16, %v5174_v30  ;;  %v5094_v1 = vperm.slane %v5088_v39, %v9478_v13  ;;  %v5201_v9 = vrot.slane %v5150_v38, 4  ;;  %5471 = vrot.lane.b32.xlu1 %v5218_v44, %s5777_s19  ;;  %v5220_v0 = vsel %vm472_vm0, %v5219_v62, %v9079_v57 }
 0x84c   : > { %5463 = vrot.lane.b32.xlu2 %v5216_v54, %s5778_s20  ;;  %v5090_v25 = vsel %vm472_vm0, %v5050_v35, %v5089_v26  ;;  %v5251_v50 = vrot.slane %v8966_v17, 4  ;;  %v5339_v33 = vrot.slane %v8984_v45, 4  ;;  %v5375_v49 = vrot.slane %v9012_v42, 4  ;;  %5479 = vrot.lane.b32.xlu0 %v5220_v0, %s5776_s18 }
 0x84d   : > { %v9099_v60 = vperm.slane %v5090_v25, %v9478_v13  ;;  %v5364_v38 = vsel %vm472_vm0, %v5363_v3, %v8999_v23  ;;  %v9104_v22 = vperm.slane %v5228_v19, %v9475_v34  ;;  %v9107_v47 = vperm.slane %v5264_v48, %v9475_v34 }
 0x84e   : > { %v5109_v35 = vrot.slane %v5070_v24, 4  ;;  %v9110_v37 = vperm.slane %v5352_v18, %v9475_v34  ;;  %v5107_v53 = vrot.slane %v5094_v1, 4  ;;  %v5066_v30 = vsel %vm472_vm0, %v5026_v28, %v5065_v11 }
 0x84f   : > { %v5275_v20 = vrot.slane %v9074_v41, 4  ;;  %v5241_v31 = vrot.slane %v8948_v46, 4  ;;  %v5265_v52 = vrot.slane %v8963_v15, 4  ;;  %v5111_v3 = vrot.slane %v9099_v60, 4 }
 0x850   : > { %v5202_v19 = vsel %vm472_vm0, %v9021_v43, %v5201_v9  ;;  %v5252_v48 = vsel %vm472_vm0, %v5251_v50, %v8957_v36  ;;  %v5340_v26 = vsel %vm472_vm0, %v5339_v33, %v8977_v27  ;;  %v5370_v8 = vperm.slane %v5364_v38, %v9475_v34 }
 0x851   : > { %v5276_v28 = vsel %vm472_vm0, %v5275_v20, %v9104_v22  ;;  %v5376_v46 = vsel %vm472_vm0, %v5375_v49, %v9006_v21  ;;  %v5110_v15 = vsel %vm472_vm0, %v5094_v1, %v5109_v35  ;;  %v9130_v6 = vperm.slane %v5066_v30, %v9478_v13 }
 0x852   : > { %v5177_v43 = vrot.slane %v9043_v58, 4  ;;  %v5108_v7 = vsel %vm472_vm0, %v5107_v53, %v5070_v24  ;;  %v9135_v16 = vperm.slane %v5202_v19, %v9478_v13  ;;  %v5299_v32 = vrot.slane %v9107_v47, 4 }
 0x853   : > { %v5387_v62 = vrot.slane %v9110_v37, 4  ;;  %v5253_v39 = vrot.slane %v8957_v36, 4  ;;  %v5266_v44 = vsel %vm472_vm0, %v8974_v4, %v5265_v52  ;;  %5485 = vrot.lane.b32.xlu1 %v5110_v15, %s5775_s17  ;;  %v5112_v58 = vsel %vm472_vm0, %v5111_v3, %v9130_v6 }
 0x854   : > { %5477 = vrot.lane.b32.xlu2 %v5108_v7, %s5776_s18  ;;  %v9147_v24 = vperm.slane %v5276_v28, %v9478_v13  ;;  %v5346_v54 = vperm.slane %v5340_v26, %v9475_v34  ;;  %v5382_v1 = vperm.slane %v5376_v46, %v9475_v34  ;;  %5493 = vrot.lane.b32.xlu0 %v5112_v58, %s5773_s15  ;;  %v5413_v11 = vrot.slane %v5370_v8, 4 }
 0x855   : > { %v5258_v36 = vperm.slane %v5252_v48, %v9475_v34  ;;  %v5341_v4 = vrot.slane %v8977_v27, 4  ;;  %v5353_v18 = vrot.slane %v8980_v59, 4  ;;  %v5377_v9 = vrot.slane %v9006_v21, 4 }
 0x856   : > { %v5178_v0 = vsel %vm472_vm0, %v9046_v40, %v5177_v43  ;;  %v5223_v25 = vrot.slane %v9135_v16, 4  ;;  %v5221_v50 = vrot.slane %v9079_v57, 4  ;;  %v5388_v49 = vsel %vm472_vm0, %v5387_v62, %v5346_v54 }
 0x857   : > { %v5300_v33 = vsel %vm472_vm0, %v5299_v32, %v5258_v36  ;;  %v5365_v38 = vrot.slane %v8999_v23, 4  ;;  %v9164_v35 = vperm.slane %v5266_v44, %v9475_v34  ;;  %v5325_v27 = vrot.slane %v9147_v24, 4 }
 0x858   : > { %v5414_v59 = vsel %vm472_vm0, %v5382_v1, %v5413_v11  ;;  %v5242_v21 = vsel %vm472_vm0, %v8954_v56, %v5241_v31  ;;  %v5254_v40 = vsel %vm472_vm0, %v8966_v17, %v5253_v39  ;;  %v9173_v57 = vperm.slane %v5178_v0, %v9478_v13 }
 0x859   : > { %v5411_v53 = vrot.slane %v5382_v1, 4  ;;  %v5378_v23 = vsel %vm472_vm0, %v9012_v42, %v5377_v9  ;;  %v5306_v30 = vperm.slane %v5300_v33, %v9478_v13  ;;  %v5394_v20 = vperm.slane %v5388_v49, %v9478_v13 }
 0x85a   : > { %v5389_v52 = vrot.slane %v5346_v54, 4  ;;  %v5354_v3 = vsel %vm472_vm0, %v8992_v12, %v5353_v18  ;;  %v5224_v56 = vsel %vm472_vm0, %v5223_v25, %v9173_v57  ;;  %v5222_v17 = vsel %vm472_vm0, %v9070_v29, %v5221_v50 }
 0x85b   : > { %v9186_v31 = vperm.slane %v5414_v59, %v9478_v13  ;;  %v5311_v19 = vrot.slane %v9164_v35, 4  ;;  %5495 = vrot.lane.b32.xlu1 %v5224_v56, %s5773_s15  ;;  %v5326_v42 = vsel %vm472_vm0, %v5306_v30, %v5325_v27  ;;  %v5277_v48 = vrot.slane %v9104_v22, 4 }
 0x85c   : > { %5487 = vrot.lane.b32.xlu2 %v5222_v17, %s5775_s17  ;;  %v5301_v12 = vrot.slane %v5258_v36, 4  ;;  %v9194_v26 = vperm.slane %v5242_v21, %v9475_v34  ;;  %v9197_v28 = vperm.slane %v5378_v23, %v9475_v34  ;;  %5509 = vrot.lane.b32.xlu0 %v5326_v42, %s5779_s21  ;;  %v5412_v29 = vsel %vm472_vm0, %v5411_v53, %v5370_v8 }
 0x85d   : > { %v5113_v46 = vrot.slane %v9130_v6, 4  ;;  %v5230_v15 = vsel %vm472_vm0, %v8951_v14, %v5229_v55  ;;  %v5262_v22 = vperm.slane %v5254_v40, %v9475_v34  ;;  %v5437_v43 = vrot.slane %v5394_v20, 4 }
 0x85e   : > { %v5390_v7 = vsel %vm472_vm0, %v9110_v37, %v5389_v52  ;;  %v5342_v32 = vsel %vm472_vm0, %v8984_v45, %v5341_v4  ;;  %v5366_v62 = vsel %vm472_vm0, %v9009_v10, %v5365_v38  ;;  %v9214_v8 = vperm.slane %v5354_v3, %v9475_v34 }
 0x85f   : > { %v5439_v61 = vrot.slane %v9186_v31, 4  ;;  %v5418_v6 = vperm.slane %v5412_v29, %v9478_v13  ;;  %v5278_v14 = vsel %vm472_vm0, %v9074_v41, %v5277_v48  ;;  %v5302_v55 = vsel %vm472_vm0, %v9107_v47, %v5301_v12 }
 0x860   : > { %v5312_v37 = vsel %vm472_vm0, %v5311_v19, %v5262_v22  ;;  %v5423_v45 = vrot.slane %v9197_v28, 4  ;;  %v5114_v10 = vsel %vm472_vm0, %v9099_v60, %v5113_v46  ;;  %v5398_v39 = vperm.slane %v5390_v7, %v9478_v13 }
 0x861   : > { %v5287_v44 = vrot.slane %v9194_v26, 4  ;;  %v5438_v58 = vsel %vm472_vm0, %v5418_v6, %v5437_v43  ;;  %v5099_v54 = vrot.slane %v8988_v63, 4  ;;  %v5211_v41 = vrot.slane %v8874_v5, 4 }
 0x862   : > { %v5323_v1 = vrot.slane %v5306_v30, 4  ;;  %v5440_v47 = vsel %vm472_vm0, %v5439_v61, %v5398_v39  ;;  %v5286_v36 = vperm.slane %v5278_v14, %v9478_v13  ;;  %v5310_v11 = vperm.slane %v5302_v55, %v9478_v13 }
 0x863   : > { %v5318_v4 = vperm.slane %v5312_v37, %v9478_v13  ;;  %5511 = vrot.lane.b32.xlu1 %v5438_v58, %s5779_s21  ;;  %v9239_v60 = vsel %vm472_vm0, %v5099_v54, %v8970_v51  ;;  %v9243_v5 = vsel %vm472_vm0, %v5211_v41, %v8863_v2  ;;  %v5435_v18 = vrot.slane %v5418_v6, 4 }
 0x864   : > { %5501 = vrot.lane.b32.xlu2 %v5114_v10, %s5774_s16  ;;  %v9247_v63 = vsel %vm472_vm0, %v5323_v1, %v9147_v24  ;;  %v5238_v9 = vperm.slane %v5230_v15, %v9475_v34  ;;  %5519 = vrot.lane.b32.xlu0 %v5440_v47, %s5778_s20  ;;  %v5399_v0 = vrot.slane %v9214_v8, 4  ;;  %v5374_v25 = vperm.slane %v5366_v62, %v9475_v34 }
 0x865   : > { %v9254_v51 = vsel %vm472_vm0, %v5435_v18, %v5394_v20  ;;  %v5350_v50 = vperm.slane %v5342_v32, %v9475_v34  ;;  %v5329_v2 = vrot.slane %v5286_v36, 4  ;;  %v5327_v33 = vrot.slane %v5310_v11, 4 }
 0x866   : > { %v5288_v49 = vsel %vm472_vm0, %v5287_v44, %v5238_v9  ;;  %v5331_v24 = vrot.slane %v5318_v4, 4  ;;  %v5424_v38 = vsel %vm472_vm0, %v5423_v45, %v5374_v25  ;;  %v5313_v23 = vrot.slane %v5262_v22, 4 }
 0x867   : > { %v5400_v27 = vsel %vm472_vm0, %v5399_v0, %v5350_v50  ;;  %v5294_v59 = vperm.slane %v5288_v49, %v9478_v13  ;;  %v5330_v21 = vsel %vm472_vm0, %v5310_v11, %v5329_v2  ;;  %v5328_v40 = vsel %vm472_vm0, %v5327_v33, %v5286_v36 }
 0x868   : > { %v5430_v53 = vperm.slane %v5424_v38, %v9478_v13  ;;  %v5406_v30 = vperm.slane %v5400_v27, %v9478_v13  ;;  %v5441_v52 = vrot.slane %v5398_v39, 4  ;;  %v5314_v56 = vsel %vm472_vm0, %v9164_v35, %v5313_v23 }
 0x869   : > { %v5332_v34 = vsel %vm472_vm0, %v5331_v24, %v5294_v59  ;;  %v5289_v17 = vrot.slane %v5238_v9, 4  ;;  %v5322_v48 = vperm.slane %v5314_v56, %v9478_v13  ;;  %v5425_v12 = vrot.slane %v5374_v25, 4 }
 0x86a   : > { %v5443_v20 = vrot.slane %v5430_v53, 4  ;;  %v5445_v3 = vrot.slane %v5406_v30, 4  ;;  %v5442_v42 = vsel %vm472_vm0, %v9186_v31, %v5441_v52  ;;  %v5333_v15 = vrot.slane %v5294_v59, 4 }
 0x86b   : > { %5525 = vrot.lane.b32.xlu1 %v5330_v21, %s5777_s19  ;;  %v5290_v35 = vsel %vm472_vm0, %v9194_v26, %v5289_v17  ;;  %v5335_v46 = vrot.slane %v5322_v48, 4  ;;  %v5225_v22 = vrot.slane %v9173_v57, 4  ;;  %v5426_v31 = vsel %vm472_vm0, %v9197_v28, %v5425_v12 }
 0x86c   : > { %5517 = vrot.lane.b32.xlu2 %v5328_v40, %s5778_s20  ;;  %5533 = vrot.lane.b32.xlu0 %v5332_v34, %s5776_s18  ;;  %v5444_v19 = vsel %vm472_vm0, %v5443_v20, %v5406_v30  ;;  %v5446_v29 = vsel %vm472_vm0, %v5430_v53, %v5445_v3  ;;  %v5298_v43 = vperm.slane %v5290_v35, %v9478_v13  ;;  %v5401_v7 = vrot.slane %v5350_v50, 4 }
 0x86d   : > { %v5334_v62 = vsel %vm472_vm0, %v5318_v4, %v5333_v15  ;;  %v5434_v61 = vperm.slane %v5426_v31, %v9478_v13  ;;  %v5226_v26 = vsel %vm472_vm0, %v9135_v16, %v5225_v22 }
 0x86e   : > { %v5336_v32 = vsel %vm472_vm0, %v5335_v46, %v5298_v43  ;;  %v5402_v57 = vsel %vm472_vm0, %v9214_v8, %v5401_v7  ;;  %v5337_v28 = vrot.slane %v5298_v43, 4 }
 0x86f   : > { %v5447_v6 = vrot.slane %v5434_v61, 4  ;;  %v5410_v14 = vperm.slane %v5402_v57, %v9478_v13 }
 0x870   : > { %v5338_v55 = vsel %vm472_vm0, %v5322_v48, %v5337_v28 }
 0x871   : > { %v5448_v37 = vsel %vm472_vm0, %v5447_v6, %v5410_v14  ;;  %v5449_v45 = vrot.slane %v5410_v14, 4 }
 0x873   : > { %5535 = vrot.lane.b32.xlu1 %v5444_v19, %s5776_s18  ;;  %v5450_v16 = vsel %vm472_vm0, %v5434_v61, %v5449_v45  ;;  %vm5568_vm0 = vcmask 392192  }
 0x874   : > { %5527 = vrot.lane.b32.xlu2 %v5442_v42, %s5777_s19  ;;  %5543 = vrot.lane.b32.xlu0 %v5446_v29, %s5775_s17 }
 0x87b   : > { %5549 = vrot.lane.b32.xlu1 %v5336_v32, %s5773_s15 }
 0x87c   : > { %5541 = vrot.lane.b32.xlu2 %v5334_v62, %s5775_s17  ;;  %5503 = vrot.lane.b32.xlu0 %v5226_v26, %s5774_s16  ;;  %s9316_s17 = scalar_lea.vmem %s9357_s9, %s5735_s11 }
 0x883   : > { %5557 = vrot.lane.b32.xlu1 %v5338_v55, %s5774_s16 }
 0x884   : > { %5551 = vrot.lane.b32.xlu2 %v5448_v37, %s5773_s15 }
 0x88c   : > { %5559 = vrot.lane.b32.xlu2 %v5450_v16, %s5774_s16 }
 0x898   : > { %v5454_v10 = vpop.permute.xlu2 %5453 }
 0x899   : > { %v5563_v4 = vsel %vm333_vm1, %v9239_v60, %v5454_v10 }
 0x8a3   : > { %v5456_v39 = vpop.permute.xlu0 %5455 }
 0x8a4   : > { %v5564_v8 = vsel %vm333_vm1, %v9243_v5, %v5456_v39 }
 0x8a6   : > { %v5464_v13 = vpop.permute.xlu2 %5463 }
 0x8a7   : > { %v5567_v44 = vsel %vm5565_vm4, %v5564_v8, %v5464_v13 }
 0x8ab   : > { %v5462_v54 = vpop.permute.xlu1 %5461 }
 0x8ac   : > { %v5566_v18 = vsel %vm5565_vm4, %v5563_v4, %v5462_v54 }
 0x8ae   : > { %v5478_v58 = vpop.permute.xlu2 %5477 }
 0x8b4   : > { %v5470_v41 = vpop.permute.xlu0 %5469 }
 0x8b5   : > { %v5569_v5 = vsel %vm5568_vm0, %v5566_v18, %v5470_v41 }
 0x8b6   : > { %v5488_v1 = vpop.permute.xlu2 %5487  ;;  %v5572_v0 = vsel %vm5571_vm5, %v5569_v5, %v5478_v58 }
 0x8bd   : > { %v5472_v47 = vpop.permute.xlu1 %5471 }
 0x8be   : > { %v5502_v36 = vpop.permute.xlu2 %5501  ;;  %v5480_v11 = vpop.permute.xlu0 %5479  ;;  %v5570_v48 = vsel %vm5568_vm0, %v5567_v44, %v5472_v47 }
 0x8c5   : > { %v5486_v9 = vpop.permute.xlu1 %5485 }
 0x8c6   : > { %v5518_v25 = vpop.permute.xlu2 %5517  ;;  %v5575_v50 = vsel %vm5574_vm6, %v5572_v0, %v5486_v9  ;;  %v5494_v60 = vpop.permute.xlu0 %5493 }
 0x8c7   : > { %v5578_v2 = vsel %vm5577_vm7, %v5575_v50, %v5494_v60 }
 0x8c8   : > { %v5581_v33 = vsel %vm5580_vm8, %v5578_v2, %v5502_v36 }
 0x8c9   : > { %5597 = vst [vmem:[%s9316_s17] sm:$0xff] %v5581_v33 }
 0x8cd   : > { %v5496_v49 = vpop.permute.xlu1 %5495 }
 0x8ce   : > { %v5528_v24 = vpop.permute.xlu2 %5527  ;;  %v5510_v38 = vpop.permute.xlu0 %5509 }
 0x8cf   : > { %v5583_v29 = vsel %vm333_vm1, %v9247_v63, %v5510_v38 }
 0x8d0   : > { %v5585_v31 = vsel %vm5565_vm4, %v5583_v29, %v5518_v25 }
 0x8d5   : > { %v5512_v27 = vpop.permute.xlu1 %5511 }
 0x8d6   : > { %v5542_v59 = vpop.permute.xlu2 %5541  ;;  %v5520_v21 = vpop.permute.xlu0 %5519  ;;  %v5584_v34 = vsel %vm333_vm1, %v9254_v51, %v5512_v27  ;;  %v5573_v51 = vsel %vm5571_vm5, %v5570_v48, %v5480_v11 }
 0x8d7   : > { %v5586_v30 = vsel %vm5565_vm4, %v5584_v34, %v5520_v21  ;;  %v5576_v35 = vsel %vm5574_vm6, %v5573_v51, %v5488_v1 }
 0x8d8   : > { %v5588_v52 = vsel %vm5568_vm0, %v5586_v30, %v5528_v24  ;;  %v5579_v15 = vsel %vm5577_vm7, %v5576_v35, %v5496_v49 }
 0x8dd   : > { %v5526_v40 = vpop.permute.xlu1 %5525 }
 0x8de   : > { %v5552_v53 = vpop.permute.xlu2 %5551  ;;  %v5534_v23 = vpop.permute.xlu0 %5533  ;;  %v5587_v7 = vsel %vm5568_vm0, %v5585_v31, %v5526_v40 }
 0x8df   : > { %v5589_v32 = vsel %vm5571_vm5, %v5587_v7, %v5534_v23 }
 0x8e0   : > { %v5591_v62 = vsel %vm5574_vm6, %v5589_v32, %v5542_v59 }
 0x8e5   : > { %v5536_v20 = vpop.permute.xlu1 %5535 }
 0x8e6   : > { %v5590_v3 = vsel %vm5571_vm5, %v5588_v52, %v5536_v20  ;;  %v5544_v56 = vpop.permute.xlu0 %5543  ;;  %v5560_v19 = vpop.permute.xlu2 %5559 }
 0x8e7   : > { %v5592_v17 = vsel %vm5574_vm6, %v5590_v3, %v5544_v56 }
 0x8e8   : > { %v5594_v42 = vsel %vm5577_vm7, %v5592_v17, %v5552_v53 }
 0x8e9   : > { %v5596_v12 = vsel %vm5580_vm8, %v5594_v42, %v5560_v19 }
 0x8ea   : > { %5600 = vst [vmem:[%s9316_s17 + $0x18] sm:$0xff] %v5596_v12 }
 0x8ed   : > { %v5550_v46 = vpop.permute.xlu1 %5549 }
 0x8ee   : > { %v5504_v22 = vpop.permute.xlu0 %5503  ;;  %v5593_v61 = vsel %vm5577_vm7, %v5591_v62, %v5550_v46 }
 0x8ef   : > { %v5582_v43 = vsel %vm5580_vm8, %v5579_v15, %v5504_v22 }
 0x8f0   : > { %5599 = vst [vmem:[%s9316_s17 + $0x10] sm:$0xff] %v5582_v43 }
 0x8f5   : > { %v5558_v63 = vpop.permute.xlu1 %5557 }
 0x8f6   : > { %v5595_v26 = vsel %vm5580_vm8, %v5593_v61, %v5558_v63 }
 0x8f7   : > { %5598 = vst [vmem:[%s9316_s17 + $0x8] sm:$0xff] %v5595_v26 }
 0x8f8 PF: > { %s19_s30 = sadd.s32 1, %s5771_s30  }
 0x8f9   : > { %p16_p4 = scmp.ge.s32.totalorder %s19_s30, 4  }
 0x8fb   :  { %18 = sbr.rel (!%p16_p4) target bundleno = 1 (0x1), region = 89 }

</bundles_post_ra>
